<compile_context>
chip_gen: v5e
topology: v5e:2x2
jax: 0.10.0
libtpu: 0.0.40
codegen_flags: <defaults>
</compile_context>

<pallas_src>
import functools

import jax
import jax.numpy as jnp
import numpy as np
from jax.experimental import pallas as pl
from jax.experimental.pallas import tpu as pltpu

IN_DIM = 512
H0 = 256
H1 = 100          # natural hidden width of the torch module
H1_PAD = 128      # padded hidden width used inside the kernel
N_MID = 7         # seven Linear(100,100)+ReLU blocks between the 256->100 layer and the head


def _round_up(v, m):
    return -(-v // m) * m


def _mlp_kernel(x_ref, w0_ref, b0_ref, w1_ref, b1_ref, wm_ref, bm_ref,
                wl_ref, bl_ref, o_ref, *, pack, n_chunks):
    # x: (TB, 512) bf16, resident for the whole A-block sweep.
    x = x_ref[...]
    bias_row = bl_ref[...]                                    # (1, g_size) f32

    for p in range(n_chunks):
        # Layer 0: x @ [W0_h0 | W0_h1 | ...] -> (TB, pack*256).  N=256/512 fully
        # fills the MXU; no group-wide f32 temporary.
        h = jnp.dot(x, w0_ref[p], preferred_element_type=jnp.float32)
        h = jnp.maximum(h + b0_ref[p], 0.0).astype(jnp.bfloat16)

        # Linear(256,100)+ReLU, block-diagonal across the pack:
        # (TB, pack*256) @ (pack*256, pack*128).  Dropout -> identity.
        h = jnp.maximum(
            jnp.dot(h, w1_ref[p], preferred_element_type=jnp.float32)
            + b1_ref[p], 0.0).astype(jnp.bfloat16)

        # 7 x [Linear(100,100)+ReLU], block-diagonal 256x256 on v6e/v7x
        # (pack=2) or native 128x128 on v5e (pack=1).  Dropout -> identity.
        for j in range(N_MID):
            h = jnp.maximum(
                jnp.dot(h, wm_ref[p * N_MID + j],
                        preferred_element_type=jnp.float32)
                + bm_ref[p * N_MID + j], 0.0).astype(jnp.bfloat16)

        # Final Linear(100, 1) per head: VPU multiply + lane reduce (XLU),
        # written straight into the head's output column (no concat).
        prod = h.astype(jnp.float32) * wl_ref[p].astype(jnp.float32)
        for c in range(pack):
            head = p * pack + c
            col = jnp.sum(prod[:, c * H1_PAD:(c + 1) * H1_PAD],
                          axis=-1, keepdims=True)              # (TB, 1) f32
            o_ref[:, head:head + 1] = col + bias_row[:, head:head + 1]


def _block_diag(w):
    """(..., pack, K, N) -> (..., pack*K, pack*N) block-diagonal.

    Off-diagonal blocks are exactly zero, so packed heads never mix."""
    *lead, p, K, N = w.shape
    eye = jnp.eye(p, dtype=w.dtype)
    out = jnp.einsum('...pkn,pq->...pkqn', w, eye)
    return out.reshape(*lead, p * K, p * N)


def prepare_params(params, g_size, pack):
    """One-time repack: pad 100->128 and A->a_pad, group heads into blocks of
    g_size, pack `pack` heads per chunk (layer 0: column concat; layers 1..8:
    block-diagonal).  Weights bf16, biases f32 with an explicit sublane-1 dim."""
    w0, b0, w1, b1, wm, bm, wl, bl = params
    A = w0.shape[0]
    a_pad = _round_up(A, g_size)
    nblk = a_pad // g_size
    n_chunks = g_size // pack
    bf = jnp.bfloat16
    dh = H1_PAD - H1

    def pad_a(t):
        return jnp.pad(t, [(0, a_pad - A)] + [(0, 0)] * (t.ndim - 1))

    w0p = pad_a(w0)                                                # (Ap,512,256)
    b0p = pad_a(b0)                                                # (Ap,256)
    w1p = pad_a(jnp.pad(w1, ((0, 0), (0, 0), (0, dh))))            # (Ap,256,128)
    b1p = pad_a(jnp.pad(b1, ((0, 0), (0, dh))))                    # (Ap,128)
    wmp = pad_a(jnp.pad(wm, ((0, 0), (0, 0), (0, dh), (0, dh))))   # (Ap,7,128,128)
    bmp = pad_a(jnp.pad(bm, ((0, 0), (0, 0), (0, dh))))            # (Ap,7,128)
    wlp = pad_a(jnp.pad(wl, ((0, 0), (0, dh))))                    # (Ap,128)
    blp = pad_a(bl)                                                # (Ap,)

    # Layer 0: heads of a chunk share the input x -> concat along output axis.
    w0g = (w0p.reshape(nblk, n_chunks, pack, IN_DIM, H0)
               .transpose(0, 1, 3, 2, 4)
               .reshape(nblk, n_chunks, IN_DIM, pack * H0).astype(bf))
    b0g = b0p.reshape(nblk, n_chunks, 1, pack * H0).astype(jnp.float32)

    # Layer 1 + mid layers: block-diagonal across the pack.
    w1g = _block_diag(w1p.reshape(nblk, n_chunks, pack, H0, H1_PAD)).astype(bf)
    b1g = b1p.reshape(nblk, n_chunks, 1, pack * H1_PAD).astype(jnp.float32)

    wmg = _block_diag(
        wmp.reshape(nblk, n_chunks, pack, N_MID, H1_PAD, H1_PAD)
           .transpose(0, 1, 3, 2, 4, 5)
           .reshape(nblk, n_chunks * N_MID, pack, H1_PAD, H1_PAD)).astype(bf)
    bmg = (bmp.reshape(nblk, n_chunks, pack, N_MID, H1_PAD)
              .transpose(0, 1, 3, 2, 4)
              .reshape(nblk, n_chunks * N_MID, 1, pack * H1_PAD)
              .astype(jnp.float32))

    wlg = wlp.reshape(nblk, n_chunks, 1, pack * H1_PAD).astype(bf)
    blg = blp.reshape(nblk, 1, g_size).astype(jnp.float32)
    return (w0g, b0g, w1g, b1g, wmg, bmg, wlg, blg), a_pad, nblk, n_chunks


def _chip_config():
    """Per-chip knobs: pack width, batch-tile cap, scoped VMEM limit."""
    kind = ""
    try:
        kind = jax.devices()[0].device_kind.lower()
    except Exception:
        pass
    is_v5e = ("v5 lite" in kind) or ("v5e" in kind) or ("v5litepod" in kind)
    is_v7x = "7" in kind
    # v5e MXU is 4x128^2 -> 128x128 mid matmuls already run at full rate and
    # block-diag 256 tiles would double the MACs for zero blocks.  v6e/v7x MXUs
    # are 2x256^2 -> pair packing doubles effective fill.
    pack = 1 if is_v5e else 2
    if is_v5e or ("v6" in kind) or ("v5" in kind):
        tb_cap, vmem_limit = 4096, 88 * 1024 * 1024     # 128 MiB physical VMEM
    else:
        # v7x (64 MiB/TC) or unknown chip: conservative.
        tb_cap, vmem_limit = 2048, 48 * 1024 * 1024
    return pack, tb_cap, vmem_limit


def compound_classifier_forward(x, params, *, g_size=None, pack=None):
    """x: (B, 512) float32. params: natural per-head stacked params.
    Returns (B, attr_num) float32 == torch.cat(out, 1) in eval mode."""
    A = params[0].shape[0]
    B = x.shape[0]
    auto_pack, tb_cap, vmem_limit = _chip_config()
    if pack is None:
        pack = auto_pack

    if g_size is None:
        g_size = min(8, _round_up(A, pack))
        # Grid floor: prefer >=2 A-blocks so weight DMA overlaps compute and
        # v7x's two TensorCores split the A axis with disjoint weight streams.
        while g_size > pack and -(-A // g_size) < 2:
            g_size = max(pack, _round_up(g_size // 2, pack))
    g_size = _round_up(g_size, pack)
    assert g_size % pack == 0

    prepared, a_pad, nblk, n_chunks = prepare_params(params, g_size, pack)
    w0g, b0g, w1g, b1g, wmg, bmg, wlg, blg = prepared

    # Batch tiling.  Keep the tile as big as VMEM allows; if the A axis gives
    # only one grid step, split the batch into >=2 tiles instead.
    b_req = _round_up(max(B, 8), 8)
    if b_req <= tb_cap:
        if nblk < 2 and b_req >= 16:
            tb = _round_up(-(-b_req // 2), 8)
        else:
            tb = b_req
    else:
        tb = tb_cap
    b_pad = _round_up(B, tb)
    b_blocks = b_pad // tb

    xb = x if b_pad == B else jnp.pad(x, ((0, b_pad - B), (0, 0)))
    xb = xb.astype(jnp.bfloat16)

    out = pl.pallas_call(
        functools.partial(_mlp_kernel, pack=pack, n_chunks=n_chunks),
        out_shape=jax.ShapeDtypeStruct((nblk, b_pad, g_size), jnp.float32),
        grid_spec=pltpu.PrefetchScalarGridSpec(
            num_scalar_prefetch=0,
            # A-blocks outer (leading parallel axis), batch inner -> the whole
            # per-block weight set is DMA'd once per A-block.
            grid=(nblk, b_blocks),
            in_specs=[
                pl.BlockSpec((tb, IN_DIM), lambda i, j: (j, 0)),                              # x
                pl.BlockSpec((None, n_chunks, IN_DIM, pack * H0), lambda i, j: (i, 0, 0, 0)),  # W0
                pl.BlockSpec((None, n_chunks, 1, pack * H0), lambda i, j: (i, 0, 0, 0)),       # b0
                pl.BlockSpec((None, n_chunks, pack * H0, pack * H1_PAD),
                             lambda i, j: (i, 0, 0, 0)),                                       # W1 (blk-diag)
                pl.BlockSpec((None, n_chunks, 1, pack * H1_PAD), lambda i, j: (i, 0, 0, 0)),   # b1
                pl.BlockSpec((None, n_chunks * N_MID, pack * H1_PAD, pack * H1_PAD),
                             lambda i, j: (i, 0, 0, 0)),                                       # W2..W8 (blk-diag)
                pl.BlockSpec((None, n_chunks * N_MID, 1, pack * H1_PAD),
                             lambda i, j: (i, 0, 0, 0)),                                       # b2..b8
                pl.BlockSpec((None, n_chunks, 1, pack * H1_PAD), lambda i, j: (i, 0, 0, 0)),   # W_last (rows)
                pl.BlockSpec((None, 1, g_size), lambda i, j: (i, 0, 0)),                       # b_last
            ],
            out_specs=pl.BlockSpec((None, tb, g_size), lambda i, j: (i, j, 0)),
        ),
        compiler_params=pltpu.CompilerParams(
            dimension_semantics=("parallel", "parallel"),
            vmem_limit_bytes=vmem_limit),
    )(xb, w0g, b0g, w1g, b1g, wmg, bmg, wlg, blg)

    # (nblk, B_pad, G) -> (B_pad, A_pad); column i*G+g is head i*G+g.  The
    # output is tiny (B x A f32), so this transpose/reshape is negligible.
    out = out.transpose(1, 0, 2).reshape(b_pad, a_pad)
    return out[:B, :A]


def init_params(key, attr_num):
    """Deterministic synthetic parameters, nn.Linear-style uniform(+/-1/sqrt(fan_in)).
    Weights stored transposed vs torch (in_dim, out_dim) so y = x @ W + b."""
    def uniform(k, shape, fan_in):
        bound = 1.0 / float(np.sqrt(fan_in))
        return jax.random.uniform(k, shape, jnp.float32, -bound, bound)

    ks = jax.random.split(key, 8)
    A = attr_num
    w0 = uniform(ks[0], (A, IN_DIM, H0), IN_DIM)
    b0 = uniform(ks[1], (A, H0), IN_DIM)
    w1 = uniform(ks[2], (A, H0, H1), H0)
    b1 = uniform(ks[3], (A, H1), H0)
    wm = uniform(ks[4], (A, N_MID, H1, H1), H1)
    bm = uniform(ks[5], (A, N_MID, H1), H1)
    wl = uniform(ks[6], (A, H1), H1)
    bl = uniform(ks[7], (A,), H1)
    return (w0, b0, w1, b1, wm, bm, wl, bl)


def reference_forward(x, params):
    """Pure-JAX reference (eval mode: dropout = identity), precision-matched to
    the kernel: bf16 weights/activations, f32 accumulation."""
    w0, b0, w1, b1, wm, bm, wl, bl = params
    A = w0.shape[0]
    bf = jnp.bfloat16
    xb = x.astype(bf)
    cols = []
    for a in range(A):
        h = jnp.maximum(
            jnp.dot(xb, w0[a].astype(bf), preferred_element_type=jnp.float32)
            + b0[a], 0.0).astype(bf)
        h = jnp.maximum(
            jnp.dot(h, w1[a].astype(bf), preferred_element_type=jnp.float32)
            + b1[a], 0.0).astype(bf)
        for j in range(N_MID):
            h = jnp.maximum(
                jnp.dot(h, wm[a, j].astype(bf), preferred_element_type=jnp.float32)
                + bm[a, j], 0.0).astype(bf)
        col = jnp.sum(h.astype(jnp.float32) * wl[a].astype(bf).astype(jnp.float32),
                      axis=-1, keepdims=True) + bl[a]
        cols.append(col)
    return jnp.concatenate(cols, axis=1)


if __name__ == "__main__":
    key = jax.random.PRNGKey(0)

    # Small config matching the module (attr_num heads on 512-d features).
    attr_num, B = 4, 8
    kx, kp, kx2, kp2 = jax.random.split(key, 4)
    x = jax.random.normal(kx, (B, IN_DIM), jnp.float32)
    params = init_params(kp, attr_num)

    y = jax.block_until_ready(compound_classifier_forward(x, params))
    y_ref = reference_forward(x, params)
    assert y.shape == (B, attr_num), y.shape
    np.testing.assert_allclose(np.asarray(y), np.asarray(y_ref), rtol=1e-2, atol=1e-3)

    # Second config: exercises multi-chunk packing, head padding and A-block grid.
    attr_num2, B2 = 10, 48
    x2 = jax.random.normal(kx2, (B2, IN_DIM), jnp.float32)
    params2 = init_params(kp2, attr_num2)
    y2 = jax.block_until_ready(compound_classifier_forward(x2, params2))
    y2_ref = reference_forward(x2, params2)
    assert y2.shape == (B2, attr_num2), y2.shape
    np.testing.assert_allclose(np.asarray(y2), np.asarray(y2_ref), rtol=1e-2, atol=1e-3)

    print("KERNEL_OK")
</pallas_src>

<mosaic_0001>
module attributes {stable_mosaic.version = 11 : i64} {
  func.func @_mlp_kernel(%arg0: i32, %arg1: i32, %arg2: memref<8x512xbf16, #tpu.memory_space<vmem>>, %arg3: memref<1x1x512x512xbf16, #tpu.memory_space<vmem>>, %arg4: memref<1x1x1x512xf32, #tpu.memory_space<vmem>>, %arg5: memref<1x1x512x256xbf16, #tpu.memory_space<vmem>>, %arg6: memref<1x1x1x256xf32, #tpu.memory_space<vmem>>, %arg7: memref<1x7x256x256xbf16, #tpu.memory_space<vmem>>, %arg8: memref<1x7x1x256xf32, #tpu.memory_space<vmem>>, %arg9: memref<1x1x1x256xbf16, #tpu.memory_space<vmem>>, %arg10: memref<1x1x2xf32, #tpu.memory_space<vmem>>, %arg11: memref<1x8x2xf32, #tpu.memory_space<vmem>>) attributes {dimension_semantics = [#tpu.dimension_semantics<parallel>, #tpu.dimension_semantics<parallel>], iteration_bounds = array<i64: 2, 1>, scalar_prefetch = 0 : i64, scratch_operands = 0 : i64, tpu.core_type = #tpu.core_type<tc>, window_params = [{transform_indices = @transform_0, window_bounds = array<i64: 8, 512>}, {transform_indices = @transform_1, window_bounds = array<i64: 1, 1, 512, 512>}, {transform_indices = @transform_2, window_bounds = array<i64: 1, 1, 1, 512>}, {transform_indices = @transform_3, window_bounds = array<i64: 1, 1, 512, 256>}, {transform_indices = @transform_4, window_bounds = array<i64: 1, 1, 1, 256>}, {transform_indices = @transform_5, window_bounds = array<i64: 1, 7, 256, 256>}, {transform_indices = @transform_6, window_bounds = array<i64: 1, 7, 1, 256>}, {transform_indices = @transform_7, window_bounds = array<i64: 1, 1, 1, 256>}, {transform_indices = @transform_8, window_bounds = array<i64: 1, 1, 2>}, {transform_indices = @transform_9, window_bounds = array<i64: 1, 8, 2>}]} {
    %c0 = arith.constant 0 : index
    %c0_0 = arith.constant 0 : index
    %0 = vector.load %arg2[%c0, %c0_0] : memref<8x512xbf16, #tpu.memory_space<vmem>>, vector<8x512xbf16>
    %c0_1 = arith.constant 0 : index
    %c0_2 = arith.constant 0 : index
    %c0_3 = arith.constant 0 : index
    %1 = vector.load %arg10[%c0_1, %c0_2, %c0_3] : memref<1x1x2xf32, #tpu.memory_space<vmem>>, vector<1x1x2xf32>
    %2 = vector.shape_cast %1 : vector<1x1x2xf32> to vector<1x2xf32>
    %c0_4 = arith.constant 0 : index
    %c0_5 = arith.constant 0 : index
    %c0_6 = arith.constant 0 : index
    %c0_7 = arith.constant 0 : index
    %3 = vector.load %arg3[%c0_4, %c0_5, %c0_6, %c0_7] : memref<1x1x512x512xbf16, #tpu.memory_space<vmem>>, vector<1x1x512x512xbf16>
    %4 = vector.shape_cast %3 : vector<1x1x512x512xbf16> to vector<512x512xbf16>
    %cst = arith.constant dense<0.000000e+00> : vector<8x512xf32>
    %5 = tpu.matmul %0, %4, %cst {dimension_numbers = #tpu.dot_dimension_numbers<[1], [0], [0], [1], [0, 0, 1, 1], [], []>} : vector<8x512xbf16>, vector<512x512xbf16>, vector<8x512xf32> -> vector<8x512xf32>
    %c0_8 = arith.constant 0 : index
    %c0_9 = arith.constant 0 : index
    %c0_10 = arith.constant 0 : index
    %c0_11 = arith.constant 0 : index
    %6 = vector.load %arg4[%c0_8, %c0_9, %c0_10, %c0_11] : memref<1x1x1x512xf32, #tpu.memory_space<vmem>>, vector<1x1x1x512xf32>
    %7 = vector.shape_cast %6 : vector<1x1x1x512xf32> to vector<1x512xf32>
    %8 = vector.broadcast %7 : vector<1x512xf32> to vector<8x512xf32>
    %9 = arith.addf %5, %8 : vector<8x512xf32>
    %cst_12 = arith.constant 0.000000e+00 : f32
    %10 = vector.broadcast %cst_12 : f32 to vector<8x512xf32>
    %11 = arith.maximumf %9, %10 : vector<8x512xf32>
    %12 = arith.truncf %11 : vector<8x512xf32> to vector<8x512xbf16>
    %c0_13 = arith.constant 0 : index
    %c0_14 = arith.constant 0 : index
    %c0_15 = arith.constant 0 : index
    %c0_16 = arith.constant 0 : index
    %13 = vector.load %arg5[%c0_13, %c0_14, %c0_15, %c0_16] : memref<1x1x512x256xbf16, #tpu.memory_space<vmem>>, vector<1x1x512x256xbf16>
    %14 = vector.shape_cast %13 : vector<1x1x512x256xbf16> to vector<512x256xbf16>
    %cst_17 = arith.constant dense<0.000000e+00> : vector<8x256xf32>
    %15 = tpu.matmul %12, %14, %cst_17 {dimension_numbers = #tpu.dot_dimension_numbers<[1], [0], [0], [1], [0, 0, 1, 1], [], []>} : vector<8x512xbf16>, vector<512x256xbf16>, vector<8x256xf32> -> vector<8x256xf32>
    %c0_18 = arith.constant 0 : index
    %c0_19 = arith.constant 0 : index
    %c0_20 = arith.constant 0 : index
    %c0_21 = arith.constant 0 : index
    %16 = vector.load %arg6[%c0_18, %c0_19, %c0_20, %c0_21] : memref<1x1x1x256xf32, #tpu.memory_space<vmem>>, vector<1x1x1x256xf32>
    %17 = vector.shape_cast %16 : vector<1x1x1x256xf32> to vector<1x256xf32>
    %18 = vector.broadcast %17 : vector<1x256xf32> to vector<8x256xf32>
    %19 = arith.addf %15, %18 : vector<8x256xf32>
    %cst_22 = arith.constant 0.000000e+00 : f32
    %20 = vector.broadcast %cst_22 : f32 to vector<8x256xf32>
    %21 = arith.maximumf %19, %20 : vector<8x256xf32>
    %22 = arith.truncf %21 : vector<8x256xf32> to vector<8x256xbf16>
    %c0_23 = arith.constant 0 : index
    %c0_24 = arith.constant 0 : index
    %c0_25 = arith.constant 0 : index
    %c0_26 = arith.constant 0 : index
    %23 = vector.load %arg7[%c0_23, %c0_24, %c0_25, %c0_26] : memref<1x7x256x256xbf16, #tpu.memory_space<vmem>>, vector<1x1x256x256xbf16>
    %24 = vector.shape_cast %23 : vector<1x1x256x256xbf16> to vector<256x256xbf16>
    %cst_27 = arith.constant dense<0.000000e+00> : vector<8x256xf32>
    %25 = tpu.matmul %22, %24, %cst_27 {dimension_numbers = #tpu.dot_dimension_numbers<[1], [0], [0], [1], [0, 0, 1, 1], [], []>} : vector<8x256xbf16>, vector<256x256xbf16>, vector<8x256xf32> -> vector<8x256xf32>
    %c0_28 = arith.constant 0 : index
    %c0_29 = arith.constant 0 : index
    %c0_30 = arith.constant 0 : index
    %c0_31 = arith.constant 0 : index
    %26 = vector.load %arg8[%c0_28, %c0_29, %c0_30, %c0_31] : memref<1x7x1x256xf32, #tpu.memory_space<vmem>>, vector<1x1x1x256xf32>
    %27 = vector.shape_cast %26 : vector<1x1x1x256xf32> to vector<1x256xf32>
    %28 = vector.broadcast %27 : vector<1x256xf32> to vector<8x256xf32>
    %29 = arith.addf %25, %28 : vector<8x256xf32>
    %cst_32 = arith.constant 0.000000e+00 : f32
    %30 = vector.broadcast %cst_32 : f32 to vector<8x256xf32>
    %31 = arith.maximumf %29, %30 : vector<8x256xf32>
    %32 = arith.truncf %31 : vector<8x256xf32> to vector<8x256xbf16>
    %c0_33 = arith.constant 0 : index
    %c1 = arith.constant 1 : index
    %c0_34 = arith.constant 0 : index
    %c0_35 = arith.constant 0 : index
    %33 = vector.load %arg7[%c0_33, %c1, %c0_34, %c0_35] : memref<1x7x256x256xbf16, #tpu.memory_space<vmem>>, vector<1x1x256x256xbf16>
    %34 = vector.shape_cast %33 : vector<1x1x256x256xbf16> to vector<256x256xbf16>
    %cst_36 = arith.constant dense<0.000000e+00> : vector<8x256xf32>
    %35 = tpu.matmul %32, %34, %cst_36 {dimension_numbers = #tpu.dot_dimension_numbers<[1], [0], [0], [1], [0, 0, 1, 1], [], []>} : vector<8x256xbf16>, vector<256x256xbf16>, vector<8x256xf32> -> vector<8x256xf32>
    %c0_37 = arith.constant 0 : index
    %c1_38 = arith.constant 1 : index
    %c0_39 = arith.constant 0 : index
    %c0_40 = arith.constant 0 : index
    %36 = vector.load %arg8[%c0_37, %c1_38, %c0_39, %c0_40] : memref<1x7x1x256xf32, #tpu.memory_space<vmem>>, vector<1x1x1x256xf32>
    %37 = vector.shape_cast %36 : vector<1x1x1x256xf32> to vector<1x256xf32>
    %38 = vector.broadcast %37 : vector<1x256xf32> to vector<8x256xf32>
    %39 = arith.addf %35, %38 : vector<8x256xf32>
    %cst_41 = arith.constant 0.000000e+00 : f32
    %40 = vector.broadcast %cst_41 : f32 to vector<8x256xf32>
    %41 = arith.maximumf %39, %40 : vector<8x256xf32>
    %42 = arith.truncf %41 : vector<8x256xf32> to vector<8x256xbf16>
    %c0_42 = arith.constant 0 : index
    %c2 = arith.constant 2 : index
    %c0_43 = arith.constant 0 : index
    %c0_44 = arith.constant 0 : index
    %43 = vector.load %arg7[%c0_42, %c2, %c0_43, %c0_44] : memref<1x7x256x256xbf16, #tpu.memory_space<vmem>>, vector<1x1x256x256xbf16>
    %44 = vector.shape_cast %43 : vector<1x1x256x256xbf16> to vector<256x256xbf16>
    %cst_45 = arith.constant dense<0.000000e+00> : vector<8x256xf32>
    %45 = tpu.matmul %42, %44, %cst_45 {dimension_numbers = #tpu.dot_dimension_numbers<[1], [0], [0], [1], [0, 0, 1, 1], [], []>} : vector<8x256xbf16>, vector<256x256xbf16>, vector<8x256xf32> -> vector<8x256xf32>
    %c0_46 = arith.constant 0 : index
    %c2_47 = arith.constant 2 : index
    %c0_48 = arith.constant 0 : index
    %c0_49 = arith.constant 0 : index
    %46 = vector.load %arg8[%c0_46, %c2_47, %c0_48, %c0_49] : memref<1x7x1x256xf32, #tpu.memory_space<vmem>>, vector<1x1x1x256xf32>
    %47 = vector.shape_cast %46 : vector<1x1x1x256xf32> to vector<1x256xf32>
    %48 = vector.broadcast %47 : vector<1x256xf32> to vector<8x256xf32>
    %49 = arith.addf %45, %48 : vector<8x256xf32>
    %cst_50 = arith.constant 0.000000e+00 : f32
    %50 = vector.broadcast %cst_50 : f32 to vector<8x256xf32>
    %51 = arith.maximumf %49, %50 : vector<8x256xf32>
    %52 = arith.truncf %51 : vector<8x256xf32> to vector<8x256xbf16>
    %c0_51 = arith.constant 0 : index
    %c3 = arith.constant 3 : index
    %c0_52 = arith.constant 0 : index
    %c0_53 = arith.constant 0 : index
    %53 = vector.load %arg7[%c0_51, %c3, %c0_52, %c0_53] : memref<1x7x256x256xbf16, #tpu.memory_space<vmem>>, vector<1x1x256x256xbf16>
    %54 = vector.shape_cast %53 : vector<1x1x256x256xbf16> to vector<256x256xbf16>
    %cst_54 = arith.constant dense<0.000000e+00> : vector<8x256xf32>
    %55 = tpu.matmul %52, %54, %cst_54 {dimension_numbers = #tpu.dot_dimension_numbers<[1], [0], [0], [1], [0, 0, 1, 1], [], []>} : vector<8x256xbf16>, vector<256x256xbf16>, vector<8x256xf32> -> vector<8x256xf32>
    %c0_55 = arith.constant 0 : index
    %c3_56 = arith.constant 3 : index
    %c0_57 = arith.constant 0 : index
    %c0_58 = arith.constant 0 : index
    %56 = vector.load %arg8[%c0_55, %c3_56, %c0_57, %c0_58] : memref<1x7x1x256xf32, #tpu.memory_space<vmem>>, vector<1x1x1x256xf32>
    %57 = vector.shape_cast %56 : vector<1x1x1x256xf32> to vector<1x256xf32>
    %58 = vector.broadcast %57 : vector<1x256xf32> to vector<8x256xf32>
    %59 = arith.addf %55, %58 : vector<8x256xf32>
    %cst_59 = arith.constant 0.000000e+00 : f32
    %60 = vector.broadcast %cst_59 : f32 to vector<8x256xf32>
    %61 = arith.maximumf %59, %60 : vector<8x256xf32>
    %62 = arith.truncf %61 : vector<8x256xf32> to vector<8x256xbf16>
    %c0_60 = arith.constant 0 : index
    %c4 = arith.constant 4 : index
    %c0_61 = arith.constant 0 : index
    %c0_62 = arith.constant 0 : index
    %63 = vector.load %arg7[%c0_60, %c4, %c0_61, %c0_62] : memref<1x7x256x256xbf16, #tpu.memory_space<vmem>>, vector<1x1x256x256xbf16>
    %64 = vector.shape_cast %63 : vector<1x1x256x256xbf16> to vector<256x256xbf16>
    %cst_63 = arith.constant dense<0.000000e+00> : vector<8x256xf32>
    %65 = tpu.matmul %62, %64, %cst_63 {dimension_numbers = #tpu.dot_dimension_numbers<[1], [0], [0], [1], [0, 0, 1, 1], [], []>} : vector<8x256xbf16>, vector<256x256xbf16>, vector<8x256xf32> -> vector<8x256xf32>
    %c0_64 = arith.constant 0 : index
    %c4_65 = arith.constant 4 : index
    %c0_66 = arith.constant 0 : index
    %c0_67 = arith.constant 0 : index
    %66 = vector.load %arg8[%c0_64, %c4_65, %c0_66, %c0_67] : memref<1x7x1x256xf32, #tpu.memory_space<vmem>>, vector<1x1x1x256xf32>
    %67 = vector.shape_cast %66 : vector<1x1x1x256xf32> to vector<1x256xf32>
    %68 = vector.broadcast %67 : vector<1x256xf32> to vector<8x256xf32>
    %69 = arith.addf %65, %68 : vector<8x256xf32>
    %cst_68 = arith.constant 0.000000e+00 : f32
    %70 = vector.broadcast %cst_68 : f32 to vector<8x256xf32>
    %71 = arith.maximumf %69, %70 : vector<8x256xf32>
    %72 = arith.truncf %71 : vector<8x256xf32> to vector<8x256xbf16>
    %c0_69 = arith.constant 0 : index
    %c5 = arith.constant 5 : index
    %c0_70 = arith.constant 0 : index
    %c0_71 = arith.constant 0 : index
    %73 = vector.load %arg7[%c0_69, %c5, %c0_70, %c0_71] : memref<1x7x256x256xbf16, #tpu.memory_space<vmem>>, vector<1x1x256x256xbf16>
    %74 = vector.shape_cast %73 : vector<1x1x256x256xbf16> to vector<256x256xbf16>
    %cst_72 = arith.constant dense<0.000000e+00> : vector<8x256xf32>
    %75 = tpu.matmul %72, %74, %cst_72 {dimension_numbers = #tpu.dot_dimension_numbers<[1], [0], [0], [1], [0, 0, 1, 1], [], []>} : vector<8x256xbf16>, vector<256x256xbf16>, vector<8x256xf32> -> vector<8x256xf32>
    %c0_73 = arith.constant 0 : index
    %c5_74 = arith.constant 5 : index
    %c0_75 = arith.constant 0 : index
    %c0_76 = arith.constant 0 : index
    %76 = vector.load %arg8[%c0_73, %c5_74, %c0_75, %c0_76] : memref<1x7x1x256xf32, #tpu.memory_space<vmem>>, vector<1x1x1x256xf32>
    %77 = vector.shape_cast %76 : vector<1x1x1x256xf32> to vector<1x256xf32>
    %78 = vector.broadcast %77 : vector<1x256xf32> to vector<8x256xf32>
    %79 = arith.addf %75, %78 : vector<8x256xf32>
    %cst_77 = arith.constant 0.000000e+00 : f32
    %80 = vector.broadcast %cst_77 : f32 to vector<8x256xf32>
    %81 = arith.maximumf %79, %80 : vector<8x256xf32>
    %82 = arith.truncf %81 : vector<8x256xf32> to vector<8x256xbf16>
    %c0_78 = arith.constant 0 : index
    %c6 = arith.constant 6 : index
    %c0_79 = arith.constant 0 : index
    %c0_80 = arith.constant 0 : index
    %83 = vector.load %arg7[%c0_78, %c6, %c0_79, %c0_80] : memref<1x7x256x256xbf16, #tpu.memory_space<vmem>>, vector<1x1x256x256xbf16>
    %84 = vector.shape_cast %83 : vector<1x1x256x256xbf16> to vector<256x256xbf16>
    %cst_81 = arith.constant dense<0.000000e+00> : vector<8x256xf32>
    %85 = tpu.matmul %82, %84, %cst_81 {dimension_numbers = #tpu.dot_dimension_numbers<[1], [0], [0], [1], [0, 0, 1, 1], [], []>} : vector<8x256xbf16>, vector<256x256xbf16>, vector<8x256xf32> -> vector<8x256xf32>
    %c0_82 = arith.constant 0 : index
    %c6_83 = arith.constant 6 : index
    %c0_84 = arith.constant 0 : index
    %c0_85 = arith.constant 0 : index
    %86 = vector.load %arg8[%c0_82, %c6_83, %c0_84, %c0_85] : memref<1x7x1x256xf32, #tpu.memory_space<vmem>>, vector<1x1x1x256xf32>
    %87 = vector.shape_cast %86 : vector<1x1x1x256xf32> to vector<1x256xf32>
    %88 = vector.broadcast %87 : vector<1x256xf32> to vector<8x256xf32>
    %89 = arith.addf %85, %88 : vector<8x256xf32>
    %cst_86 = arith.constant 0.000000e+00 : f32
    %90 = vector.broadcast %cst_86 : f32 to vector<8x256xf32>
    %91 = arith.maximumf %89, %90 : vector<8x256xf32>
    %92 = arith.truncf %91 : vector<8x256xf32> to vector<8x256xbf16>
    %93 = arith.extf %92 : vector<8x256xbf16> to vector<8x256xf32>
    %c0_87 = arith.constant 0 : index
    %c0_88 = arith.constant 0 : index
    %c0_89 = arith.constant 0 : index
    %c0_90 = arith.constant 0 : index
    %94 = vector.load %arg9[%c0_87, %c0_88, %c0_89, %c0_90] : memref<1x1x1x256xbf16, #tpu.memory_space<vmem>>, vector<1x1x1x256xbf16>
    %95 = vector.shape_cast %94 : vector<1x1x1x256xbf16> to vector<1x256xbf16>
    %96 = arith.extf %95 : vector<1x256xbf16> to vector<1x256xf32>
    %97 = vector.broadcast %96 : vector<1x256xf32> to vector<8x256xf32>
    %98 = arith.mulf %93, %97 : vector<8x256xf32>
    %99 = vector.extract_strided_slice %98 {offsets = [0, 0], sizes = [8, 128], strides = [1, 1]} : vector<8x256xf32> to vector<8x128xf32>
    %cst_91 = arith.constant dense<0.000000e+00> : vector<8xf32>
    %100 = vector.multi_reduction <add>, %99, %cst_91 [1] : vector<8x128xf32> to vector<8xf32>
    %101 = vector.shape_cast %100 : vector<8xf32> to vector<8x1xf32>
    %102 = vector.extract_strided_slice %2 {offsets = [0, 0], sizes = [1, 1], strides = [1, 1]} : vector<1x2xf32> to vector<1x1xf32>
    %103 = vector.broadcast %102 : vector<1x1xf32> to vector<8x1xf32>
    %104 = arith.addf %101, %103 : vector<8x1xf32>
    %c0_92 = arith.constant 0 : index
    %c0_93 = arith.constant 0 : index
    %c0_94 = arith.constant 0 : index
    %105 = vector.load %arg11[%c0_92, %c0_93, %c0_94] : memref<1x8x2xf32, #tpu.memory_space<vmem>>, vector<1x8x1xf32>
    %106 = vector.shape_cast %105 : vector<1x8x1xf32> to vector<8x1xf32>
    %107 = vector.shape_cast %104 : vector<8x1xf32> to vector<1x8x1xf32>
    tpu.vector_store %arg11[%c0_92, %c0_93, %c0_94], %107 {strides = array<i32>} : memref<1x8x2xf32, #tpu.memory_space<vmem>>, vector<1x8x1xf32>,
    %108 = vector.extract_strided_slice %98 {offsets = [0, 128], sizes = [8, 128], strides = [1, 1]} : vector<8x256xf32> to vector<8x128xf32>
    %cst_95 = arith.constant dense<0.000000e+00> : vector<8xf32>
    %109 = vector.multi_reduction <add>, %108, %cst_95 [1] : vector<8x128xf32> to vector<8xf32>
    %110 = vector.shape_cast %109 : vector<8xf32> to vector<8x1xf32>
    %111 = vector.extract_strided_slice %2 {offsets = [0, 1], sizes = [1, 1], strides = [1, 1]} : vector<1x2xf32> to vector<1x1xf32>
    %112 = vector.broadcast %111 : vector<1x1xf32> to vector<8x1xf32>
    %113 = arith.addf %110, %112 : vector<8x1xf32>
    %c0_96 = arith.constant 0 : index
    %c0_97 = arith.constant 0 : index
    %c1_98 = arith.constant 1 : index
    %114 = vector.load %arg11[%c0_96, %c0_97, %c1_98] : memref<1x8x2xf32, #tpu.memory_space<vmem>>, vector<1x8x1xf32>
    %115 = vector.shape_cast %114 : vector<1x8x1xf32> to vector<8x1xf32>
    %116 = vector.shape_cast %113 : vector<8x1xf32> to vector<1x8x1xf32>
    tpu.vector_store %arg11[%c0_96, %c0_97, %c1_98], %116 {strides = array<i32>} : memref<1x8x2xf32, #tpu.memory_space<vmem>>, vector<1x8x1xf32>,
    return
  }
  func.func @transform_0(%arg0: i32, %arg1: i32) -> (i32, i32) {
    %c0_i32 = arith.constant 0 : i32
    %c0_i32_0 = arith.constant 0 : i32
    return %arg1, %c0_i32 : i32, i32
  }
  func.func @transform_1(%arg0: i32, %arg1: i32) -> (i32, i32, i32, i32) {
    %c0_i32 = arith.constant 0 : i32
    %c0_i32_0 = arith.constant 0 : i32
    %c0_i32_1 = arith.constant 0 : i32
    %c0_i32_2 = arith.constant 0 : i32
    return %arg0, %c0_i32, %c0_i32_0, %c0_i32_1 : i32, i32, i32, i32
  }
  func.func @transform_2(%arg0: i32, %arg1: i32) -> (i32, i32, i32, i32) {
    %c0_i32 = arith.constant 0 : i32
    %c0_i32_0 = arith.constant 0 : i32
    %c0_i32_1 = arith.constant 0 : i32
    %c0_i32_2 = arith.constant 0 : i32
    return %arg0, %c0_i32, %c0_i32_0, %c0_i32_1 : i32, i32, i32, i32
  }
  func.func @transform_3(%arg0: i32, %arg1: i32) -> (i32, i32, i32, i32) {
    %c0_i32 = arith.constant 0 : i32
    %c0_i32_0 = arith.constant 0 : i32
    %c0_i32_1 = arith.constant 0 : i32
    %c0_i32_2 = arith.constant 0 : i32
    return %arg0, %c0_i32, %c0_i32_0, %c0_i32_1 : i32, i32, i32, i32
  }
  func.func @transform_4(%arg0: i32, %arg1: i32) -> (i32, i32, i32, i32) {
    %c0_i32 = arith.constant 0 : i32
    %c0_i32_0 = arith.constant 0 : i32
    %c0_i32_1 = arith.constant 0 : i32
    %c0_i32_2 = arith.constant 0 : i32
    return %arg0, %c0_i32, %c0_i32_0, %c0_i32_1 : i32, i32, i32, i32
  }
  func.func @transform_5(%arg0: i32, %arg1: i32) -> (i32, i32, i32, i32) {
    %c0_i32 = arith.constant 0 : i32
    %c0_i32_0 = arith.constant 0 : i32
    %c0_i32_1 = arith.constant 0 : i32
    %c0_i32_2 = arith.constant 0 : i32
    return %arg0, %c0_i32, %c0_i32_0, %c0_i32_1 : i32, i32, i32, i32
  }
  func.func @transform_6(%arg0: i32, %arg1: i32) -> (i32, i32, i32, i32) {
    %c0_i32 = arith.constant 0 : i32
    %c0_i32_0 = arith.constant 0 : i32
    %c0_i32_1 = arith.constant 0 : i32
    %c0_i32_2 = arith.constant 0 : i32
    return %arg0, %c0_i32, %c0_i32_0, %c0_i32_1 : i32, i32, i32, i32
  }
  func.func @transform_7(%arg0: i32, %arg1: i32) -> (i32, i32, i32, i32) {
    %c0_i32 = arith.constant 0 : i32
    %c0_i32_0 = arith.constant 0 : i32
    %c0_i32_1 = arith.constant 0 : i32
    %c0_i32_2 = arith.constant 0 : i32
    return %arg0, %c0_i32, %c0_i32_0, %c0_i32_1 : i32, i32, i32, i32
  }
  func.func @transform_8(%arg0: i32, %arg1: i32) -> (i32, i32, i32) {
    %c0_i32 = arith.constant 0 : i32
    %c0_i32_0 = arith.constant 0 : i32
    %c0_i32_1 = arith.constant 0 : i32
    return %arg0, %c0_i32, %c0_i32_0 : i32, i32, i32
  }
  func.func @transform_9(%arg0: i32, %arg1: i32) -> (i32, i32, i32) {
    %c0_i32 = arith.constant 0 : i32
    %c0_i32_0 = arith.constant 0 : i32
    return %arg0, %arg1, %c0_i32 : i32, i32, i32
  }
}

</mosaic_0001>

<bundles_post_ra>
// kernel: tpu_custom_call.1
= control target key start
LH: loop header
LB: loop body
LE: loop exit
PB: predicated region body
PF: predicated region fallthrough
CT: control target
= control target key end

     0   :  { %s8099_s0 = inlined_call_operand.hbm [shape: bf16[8,512], index: 0, kind: input, shape index: {}]   ;;  %s8100_s1 = inlined_call_operand.hbm [shape: bf16[2,1,512,512], index: 1, kind: input, shape index: {}]   ;;  %s8101_s2 = inlined_call_operand.hbm [shape: f32[2,1,1,512], index: 2, kind: input, shape index: {}]   ;;  %s8102_s3 = inlined_call_operand.hbm [shape: bf16[2,1,512,256], index: 3, kind: input, shape index: {}]   ;;  %s8103_s4 = inlined_call_operand.hbm [shape: f32[2,1,1,256], index: 4, kind: input, shape index: {}]   ;;  %s8104_s5 = inlined_call_operand.hbm [shape: bf16[2,7,256,256], index: 5, kind: input, shape index: {}]   ;;  %s8105_s6 = inlined_call_operand.hbm [shape: f32[2,7,1,256], index: 6, kind: input, shape index: {}]   ;;  %s8106_s7 = inlined_call_operand.vmem [shape: bf16[2,1,1,256], index: 7, kind: input, shape index: {}]   ;;  %s8107_s8 = inlined_call_operand.hbm [shape: f32[2,1,2], index: 8, kind: input, shape index: {}]   ;;  %s8108_s9 = inlined_call_operand.vmem [shape: f32[2,8,2], index: 9, kind: output, shape index: {}]  }
   0x1   :  { %8115 = sst [smem:[#allocation23_spill]] %s8099_s0 }
   0x2   :  { %8116 = sst [smem:[#allocation24_spill]] %s8100_s1 }
   0x3   :  { %8117 = sst [smem:[#allocation25_spill]] %s8101_s2 }
   0x4   :  { %8118 = sst [smem:[#allocation26_spill]] %s8102_s3 }
   0x5   :  { %8119 = sst [smem:[#allocation27_spill]] %s8104_s5 }
   0x6   :  { %14 = vsyncpa [#allocation3], 0 }
   0x7   :  { %15 = vsyncpa [#allocation5], 0 }
   0x8   :  { %17 = vsyncpa [#allocation5 + $0x1], 0 }
   0x9   :  { %18 = vsyncpa [#allocation8], 0 }
   0xa   :  { %20 = vsyncpa [#allocation8 + $0x1], 0 }
   0xb   :  { %21 = vsyncpa [#allocation11], 0 }
   0xc   :  { %23 = vsyncpa [#allocation11 + $0x1], 0 }
   0xd   :  { %24 = vsyncpa [#allocation14], 0 }
   0xe   :  { %26 = vsyncpa [#allocation14 + $0x1], 0  ;;  %s6980_s30 = smov 0   ;;  %s6982_s10 = smov 0  }
   0xf   :  { %s6984_s11 = smov 0   ;;  %s6986_s12 = smov 0  }
  0x10   :  { %s6988_s13 = smov 0   ;;  %s6990_s14 = smov 0  }
  0x11 LB: > { %8120 = sst [smem:[#allocation20_spill]] %s6909_s11  ;;  %s44_s15 = sadd.s32 1, %s6917_s13  ;;  %s6921_s14 = sphi %s6990_s14, %s32_s14   ;;  %s6917_s13 = sphi %s6988_s13, %s8143_s13   ;;  %s6913_s12 = sphi %s6986_s12, %s8142_s12   ;;  %s6909_s11 = sphi %s6984_s11, %s8138_s11   ;;  %s6905_s10 = sphi %s6982_s10, %s8141_s10   ;;  %s6901_s30 = sphi %s6980_s30, %s8140_s30  }
  0x12   : > { %s77_s16 = sadd.s32 1, %s6909_s11  ;;  %p46_p0 = scmp.ge.s32.totalorder %s44_s15, 2 }
  0x13   : > { %p84_p1 = scmp.ne.s32.totalorder %s6909_s11, %s6905_s10  ;;  %p85_p2 = scmp.eq.s32.totalorder %s6921_s14, 0 }
  0x14   : > { %s8145_s15 = smov (%p46_p0, %s44_s15), 0  ;;  %p6557_p4 = scmp.lt.s32.totalorder %s6921_s14, 2 }
  0x15   : > { %8121 = sst [smem:[#allocation21_spill]] %s8145_s15  ;;  %p7017_p3 = por %p85_p2, %p84_p1 }
  0x16   : > { %s74_s18 = ssub.s32 %s6917_s13, %s8145_s15  ;;  %s7025_s19 = sand.u32 1, %s6921_s14  }
  0x17   : > { %p75_p5 = scmp.eq.s32.totalorder %s74_s18, 0  ;;  %s7028_s20 = sand.u32 1, %s6909_s11  }
  0x18   : > { %s6088_s21 = sshll.u32 %s6917_s13, 10  ;;  %s4205_s23 = sshll.u32 %s7028_s20, 10 }
  0x19   : > { %s7032_s22 = scalar_select %p75_p5, %s6909_s11, %s77_s16  }
  0x1a   : > { %s8124_s1 = sld [smem:[#allocation24_spill]]  ;;  %s343_s28 = scalar_lea.vmem [#allocation4], %s4205_s23 }
  0x1b   : > { %8123 = sst [smem:[#allocation22_spill]] %s7032_s22  ;;  %s351_s29 = sshll.u32 %s343_s28, 4  ;;  %s352_s29 = int_to_ptr.vmem [resolvable:$true] %s351_s29 }
  0x1c   : > { %p7042_p6 = pnand %p6557_p4, %p7017_p3  ;;  %s8111_s16 = scalar_lea.sflag [#allocation5], %s7025_s19 }
  0x1d   : > { %s6923_s15 = smov 256   ;;  %s4210_s23 = sshll.u32 %s7028_s20, 9 }
  0x1e   : > { %s6089_s24 = sshll.u32 %s6917_s13, 9  ;;  %s8126_s3 = sld [smem:[#allocation26_spill]] }
  0x1f   : > { %s8114_s11 = scalar_lea.sflag [#allocation8], %s7025_s19  ;;  %s8127_s5 = sld [smem:[#allocation27_spill]] }
  0x20   : > { %s348_s26 = scalar_lea.hbm %s8124_s1, %s6088_s21  ;;  %s6924_s21 = smov 16  }
  0x21   : > { %s349_s27 = sshll.u32 %s348_s26, 4  ;;  %s384_s1 = scalar_lea.vmem [#allocation7], %s4210_s23  ;;  %s350_s27 = int_to_ptr.hbm [resolvable:$true] %s349_s27 }
  0x22   : > { %6537 = dma.hbm_to_vmem [thread:$0]  (!%p7042_p6), %s350_s27, 16384, %s352_s29, %s8111_s16, %s6923_s15, %s6923_s15, %s6924_s21  }
  0x23   : > { %s392_s22 = sshll.u32 %s384_s1, 4  ;;  %s6925_s15 = smov 128   ;;  %s393_s22 = int_to_ptr.vmem [resolvable:$true] %s392_s22 }
  0x24   : > { %s389_s26 = scalar_lea.hbm %s8126_s3, %s6089_s24  ;;  %s6926_s27 = smov 8  }
  0x25   : > { %s390_s28 = sshll.u32 %s389_s26, 4  ;;  %s6506_s29 = smul.u32 1792, %s7028_s20  ;;  %s391_s28 = int_to_ptr.hbm [resolvable:$true] %s390_s28 }
  0x26   : > { %6543 = dma.hbm_to_vmem [thread:$0]  (!%p7042_p6), %s391_s28, 8192, %s393_s22, %s8114_s11, %s6925_s15, %s6925_s15, %s6926_s27  }
  0x27   : > { %s6507_s21 = smul.u32 1792, %s6917_s13  ;;  %s425_s25 = scalar_lea.vmem [#allocation10], %s6506_s29 }
  0x28   : > { %s433_s17 = sshll.u32 %s425_s25, 4  ;;  %s8113_s16 = scalar_lea.sflag [#allocation11], %s7025_s19  ;;  %s434_s17 = int_to_ptr.vmem [resolvable:$true] %s433_s17 }
  0x29   : > { %s430_s24 = scalar_lea.hbm %s8127_s5, %s6507_s21  ;;  %s8112_s3 = sadd.s32 4294967295, %s6921_s14  }
  0x2a   : > { %s431_s26 = sshll.u32 %s430_s24, 4  ;;  %p90_p7 = scmp.ne.s32.totalorder %s6905_s10, %s6901_s30  ;;  %s432_s26 = int_to_ptr.hbm [resolvable:$true] %s431_s26 }
  0x2b   : > { %6549 = dma.hbm_to_vmem [thread:$0]  (!%p7042_p6), %s432_s26, 28672, %s434_s17, %s8113_s16, %s6925_s15, %s6925_s15, %s6926_s27  }
  0x2c   : > { %p7076_p8 = scmp.eq.s32.totalorder %s8112_s3, 0  ;;  %p4202_p9 = scmp.ge.s32.totalorder %s6921_s14, 1 }
  0x2d   : > { %p311_p10 = scmp.lt.s32.totalorder %s6921_s14, 3  ;;  %s8131_s0 = sld [smem:[#allocation23_spill]] }
  0x2e   : > { %p7084_p11 = por %p7076_p8, %p90_p7  ;;  %s6927_s21 = smov [#allocation2]  }
  0x2f   : > { %p7088_p12 = pnand %p4202_p9, %p311_p10  ;;  %s328_s23 = sshll.u32 %s6927_s21, 4  ;;  %s329_s23 = int_to_ptr.vmem [resolvable:$true] %s328_s23 }
  0x30   : > { %s4208_s1 = sshll.u32 %s7028_s20, 2  ;;  %s4209_s24 = sshll.u32 %s6917_s13, 2 }
  0x31   : > { %p6530_p13 = pneg %p7088_p12  ;;  %s365_s25 = scalar_lea.vmem [#allocation6], %s4208_s1 }
  0x32   : > { %s373_s17 = sshll.u32 %s365_s25, 4  ;;  %s8132_s2 = sld [smem:[#allocation25_spill]]  ;;  %s374_s17 = int_to_ptr.vmem [resolvable:$true] %s373_s17 }
  0x33   : > { %s326_s27 = sshll.u32 %s8131_s0, 4  ;;  %p6531_p0 = pnand %p6530_p13, %p7076_p8  ;;  %s327_s27 = int_to_ptr.hbm [resolvable:$true] %s326_s27 }
  0x34   : > { %s4213_s21 = sshll.u32 %s7028_s20, 1  ;;  %s8133_s16 = scalar_lea.sflag [#allocation5], %s7025_s19 }
  0x35   : > { %6533 = dma.hbm_to_vmem [thread:$0]  (!%p6531_p0), %s327_s27, 256, %s329_s23, [#allocation3]  }
  0x36   : > { %s4214_s11 = sshll.u32 %s6917_s13, 1  ;;  %s406_s5 = scalar_lea.vmem [#allocation9], %s4213_s21 }
  0x37   : > { %s410_s25 = scalar_lea.hbm %s8103_s4, %s4214_s11  ;;  %s414_s26 = sshll.u32 %s406_s5, 4  ;;  %s415_s26 = int_to_ptr.vmem [resolvable:$true] %s414_s26 }
  0x38   : > { %s369_s30 = scalar_lea.hbm %s8132_s2, %s4209_s24  ;;  %s412_s24 = sshll.u32 %s410_s25, 4  ;;  %s413_s24 = int_to_ptr.hbm [resolvable:$true] %s412_s24 }
  0x39   : > { %s371_s3 = sshll.u32 %s369_s30, 4  ;;  %s6508_s27 = smul.u32 14, %s7028_s20  ;;  %s372_s3 = int_to_ptr.hbm [resolvable:$true] %s371_s3 }
  0x3a   : > { %6540 = dma.hbm_to_vmem [thread:$0]  (!%p7042_p6), %s372_s3, 64, %s374_s17, %s8133_s16  }
  0x3b   : > { %s8134_s23 = scalar_lea.sflag [#allocation8], %s7025_s19  ;;  %s6509_s15 = smul.u32 14, %s6917_s13 }
  0x3c   : > { %6546 = dma.hbm_to_vmem [thread:$0]  (!%p7042_p6), %s413_s24, 32, %s415_s26, %s8134_s23  }
  0x3d   : > { %s447_s3 = scalar_lea.vmem [#allocation12], %s6508_s27  ;;  %s451_s17 = scalar_lea.hbm %s8105_s6, %s6509_s15 }
  0x3e   : > { %s454_s16 = sshll.u32 %s447_s3, 4  ;;  %s452_s5 = sshll.u32 %s451_s17, 4  ;;  %s455_s16 = int_to_ptr.vmem [resolvable:$true] %s454_s16  ;;  %s453_s5 = int_to_ptr.hbm [resolvable:$true] %s452_s5 }
  0x3f   : > { %s6928_s30 = smov 32   ;;  %s6929_s21 = smov 2  }
  0x40   : > { %s8135_s1 = scalar_lea.sflag [#allocation11], %s7025_s19  ;;  %s477_s26 = scalar_lea.hbm %s8107_s8, %s6917_s13 }
  0x41   : > { %6552 = dma.hbm_to_vmem [thread:$0]  (!%p7042_p6), %s453_s5, 224, %s455_s16, %s8135_s1, %s6928_s30, %s6928_s30, %s6929_s21  }
  0x42   : > { %s479_s24 = sshll.u32 %s477_s26, 4  ;;  %s474_s27 = scalar_lea.vmem [#allocation13], %s7028_s20  ;;  %s480_s24 = int_to_ptr.hbm [resolvable:$true] %s479_s24 }
  0x43   : > { %s481_s23 = sshll.u32 %s474_s27, 4  ;;  %s472_s3 = scalar_lea.sflag [#allocation14], %s7028_s20  ;;  %s482_s23 = int_to_ptr.vmem [resolvable:$true] %s481_s23 }
  0x44   : > { %6555 = dma.hbm_to_vmem [thread:$0]  (!%p7042_p6), %s480_s24, 16, %s482_s23, %s472_s3  }
  0x45   : > { %490 = sbr.rel (%p7088_p12) target bundleno = 1614 (0x64e), region = 56 }
  0x4a   : > { %6880 = dma.done.wait (%p7076_p8), [#allocation3], 256  }
  0x4b   : > { %6882 = vsyncadd (%p7076_p8), [#allocation3], 4294967040  ;;  %s8136_s2 = sadd.s32 4294967295, %s6921_s14   ;;  %s7143_s15 = sand.u32 1, %s6905_s10  }
  0x4c   : > { %s497_s19 = sand.u32 1, %s8136_s2   ;;  %s4218_s20 = sshll.u32 %s7143_s15, 10 }
  0x4d   : > { %s498_s18 = scalar_lea.sflag [#allocation5], %s497_s19  ;;  %s7146_s16 = scalar_lea.vmem [#allocation4], %s4218_s20 }
  0x4e   : > { %6884 = dma.done.wait (%p7084_p11), %s498_s18, 16448  }
  0x4f   : > { %6886 = vsyncadd (%p7084_p11), %s498_s18, 4294950848  ;;  %s4219_s22 = sshll.u32 %s7143_s15, 2  ;;  %s4220_s29 = sshll.u32 %s7143_s15, 9 }
  0x50   : > { %s7154_s0 = scalar_lea.vmem [#allocation6], %s4219_s22  ;;  %s518_s11 = scalar_lea.sflag [#allocation8], %s497_s19 }
  0x51   : > { %s7156_s17 = scalar_lea.vmem [#allocation7], %s4220_s29 }
  0x52   : > { %6888 = dma.done.wait (%p7084_p11), %s518_s11, 8224  }
  0x53   : > { %6890 = vsyncadd (%p7084_p11), %s518_s11, 4294959072  ;;  %s4221_s5 = sshll.u32 %s7143_s15, 1  ;;  %s6510_s30 = smul.u32 1792, %s7143_s15 }
  0x54   : > { %s7164_s21 = scalar_lea.vmem [#allocation9], %s4221_s5  ;;  %s538_s1 = scalar_lea.sflag [#allocation11], %s497_s19 }
  0x55   : > { %s7166_s25 = scalar_lea.vmem [#allocation10], %s6510_s30 }
  0x56   : > { %6892 = dma.done.wait (%p7084_p11), %s538_s1, 28896  }
  0x57   : > { %6894 = vsyncadd (%p7084_p11), %s538_s1, 4294938400  ;;  %s6511_s26 = smul.u32 14, %s7143_s15  ;;  %s558_s27 = scalar_lea.sflag [#allocation14], %s7143_s15 }
  0x58   : > { %s560_s23 = scalar_lea.vmem [#allocation13], %s7143_s15 }
  0x59   : > { %s7173_s24 = scalar_lea.vmem [#allocation12], %s6511_s26 }
  0x5a   : > { %6896 = dma.done.wait (%p7084_p11), %s558_s27, 16  }
  0x5b   : > { %6898 = vsyncadd (%p7084_p11), %s558_s27, 4294967280  ;;  %v4338_v0 = vld [vmem:[%s7146_s16 + $0xe0] sm:$0xf]  ;;  %v6120_v1 = vld [vmem:[%s7146_s16 + $0xec] sm:$0xf0]  ;;  %p631_p1 = scmp.lt.s32.totalorder %s6913_s12, 1 }
  0x5c   : > { %v4466_v2 = vld [vmem:[%s7146_s16 + $0x1e0] sm:$0xf]  ;;  %v4339_v3 = vor.u32 %v6120_v1, %v4338_v0  ;;  %v6152_v4 = vld [vmem:[%s7146_s16 + $0x1ec] sm:$0xf0]  ;;  %vm3959_vm0 = vcmask 7168   ;;  %vm3964_vm1 = vcmask 15368  }
  0x5d   : > { %v4594_v5 = vld [vmem:[%s7146_s16 + $0x2e0] sm:$0xf]  ;;  %v6184_v6 = vld [vmem:[%s7146_s16 + $0x2ec] sm:$0xf0]  ;;  %v4467_v7 = vor.u32 %v6152_v4, %v4466_v2  ;;  %s8147_s12 = smov (!%p631_p1, %s6913_s12), 1 }
  0x5e   : > { %v4595_v8 = vor.u32 %v6184_v6, %v4594_v5  ;;  %v4722_v9 = vld [vmem:[%s7146_s16 + $0x3e0] sm:$0xf]  ;;  %v6216_v10 = vld [vmem:[%s7146_s16 + $0x3ec] sm:$0xf0]  ;;  %1437 = vmatpush.bf16.msra.mxu0 %v4339_v3  ;;  %s4222_s28 = sshll.u32 %s8147_s12, 1  ;;  %s4223_s20 = sshll.u32 %s8147_s12, 3 }
  0x5f   : > { %v4322_v11 = vld [vmem:[%s7146_s16 + $0xc0] sm:$0xf]  ;;  %v4723_v12 = vor.u32 %v6216_v10, %v4722_v9  ;;  %v6116_v13 = vld [vmem:[%s7146_s16 + $0xcc] sm:$0xf0]  ;;  %1450 = vmatpush.bf16.msra.mxu1 %v4467_v7  ;;  %s634_s19 = scalar_lea.vmem %s8106_s7, %s4222_s28  ;;  %s641_s22 = scalar_lea.vmem %s8108_s9, %s4223_s20 }
  0x60   : > { %v4450_v14 = vld [vmem:[%s7146_s16 + $0x1c0] sm:$0xf]  ;;  %v6148_v15 = vld [vmem:[%s7146_s16 + $0x1cc] sm:$0xf0]  ;;  %1463 = vmatpush.bf16.msra.mxu2 %v4595_v8  ;;  %v4323_v16 = vor.u32 %v6116_v13, %v4322_v11 }
  0x61   : > { %v4451_v17 = vor.u32 %v6148_v15, %v4450_v14  ;;  %v4578_v18 = vld [vmem:[%s7146_s16 + $0x2c0] sm:$0xf]  ;;  %v6180_v19 = vld [vmem:[%s7146_s16 + $0x2cc] sm:$0xf0]  ;;  %1476 = vmatpush.bf16.msra.mxu3 %v4723_v12 }
  0x62   : > { %v4706_v20 = vld [vmem:[%s7146_s16 + $0x3c0] sm:$0xf]  ;;  %v4579_v21 = vor.u32 %v6180_v19, %v4578_v18  ;;  %v6212_v22 = vld [vmem:[%s7146_s16 + $0x3cc] sm:$0xf0]  ;;  %1438 = vmatpush.bf16.msra.mxu0 %v4323_v16 }
  0x63   : > { %v4306_v23 = vld [vmem:[%s7146_s16 + $0xa0] sm:$0xf]  ;;  %v6112_v24 = vld [vmem:[%s7146_s16 + $0xac] sm:$0xf0]  ;;  %v4707_v25 = vor.u32 %v6212_v22, %v4706_v20  ;;  %1451 = vmatpush.bf16.msra.mxu1 %v4451_v17 }
  0x64   : > { %v4434_v26 = vld [vmem:[%s7146_s16 + $0x1a0] sm:$0xf]  ;;  %v6144_v27 = vld [vmem:[%s7146_s16 + $0x1ac] sm:$0xf0]  ;;  %v4307_v29 = vor.u32 %v6112_v24, %v4306_v23  ;;  %1464 = vmatpush.bf16.msra.mxu2 %v4579_v21 }
  0x65   : > { %v4562_v28 = vld [vmem:[%s7146_s16 + $0x2a0] sm:$0xf]  ;;  %v6176_v30 = vld [vmem:[%s7146_s16 + $0x2ac] sm:$0xf0]  ;;  %v4435_v33 = vor.u32 %v6144_v27, %v4434_v26  ;;  %1477 = vmatpush.bf16.msra.mxu3 %v4707_v25 }
  0x66   : > { %v4690_v31 = vld [vmem:[%s7146_s16 + $0x3a0] sm:$0xf]  ;;  %v6208_v32 = vld [vmem:[%s7146_s16 + $0x3ac] sm:$0xf0]  ;;  %v4563_v34 = vor.u32 %v6176_v30, %v4562_v28  ;;  %1439 = vmatpush.bf16.msra.mxu0 %v4307_v29  ;;  %v6118_v28 = vld [vmem:[%s7146_s16 + $0xe4] sm:$0xf] }
  0x67   : > { %v4290_v35 = vld [vmem:[%s7146_s16 + $0x80] sm:$0xf]  ;;  %v6108_v36 = vld [vmem:[%s7146_s16 + $0x8c] sm:$0xf0]  ;;  %v4691_v38 = vor.u32 %v6208_v32, %v4690_v31  ;;  %1452 = vmatpush.bf16.msra.mxu1 %v4435_v33  ;;  %v4340_v29 = vld [vmem:[%s7146_s16 + $0xf0] sm:$0xf0] }
  0x68   : > { %v4418_v37 = vld [vmem:[%s7146_s16 + $0x180] sm:$0xf]  ;;  %v6140_v39 = vld [vmem:[%s7146_s16 + $0x18c] sm:$0xf0]  ;;  %v4291_v44 = vor.u32 %v6108_v36, %v4290_v35  ;;  %1465 = vmatpush.bf16.msra.mxu2 %v4563_v34  ;;  %v6150_v30 = vld [vmem:[%s7146_s16 + $0x1e4] sm:$0xf] }
  0x69   : > { %v4546_v40 = vld [vmem:[%s7146_s16 + $0x280] sm:$0xf]  ;;  %v6172_v41 = vld [vmem:[%s7146_s16 + $0x28c] sm:$0xf0]  ;;  %v4419_v45 = vor.u32 %v6140_v39, %v4418_v37  ;;  %1478 = vmatpush.bf16.msra.mxu3 %v4691_v38  ;;  %v4468_v31 = vld [vmem:[%s7146_s16 + $0x1f0] sm:$0xf0] }
  0x6a   : > { %v4674_v42 = vld [vmem:[%s7146_s16 + $0x380] sm:$0xf]  ;;  %v6204_v43 = vld [vmem:[%s7146_s16 + $0x38c] sm:$0xf0]  ;;  %v4547_v46 = vor.u32 %v6172_v41, %v4546_v40  ;;  %1440 = vmatpush.bf16.msra.mxu0 %v4291_v44  ;;  %v643_v32 = vld [vmem:[#allocation2 + $0x8] sm:$0xff] }
  0x6b   : > { %v4274_v47 = vld [vmem:[%s7146_s16 + $0x60] sm:$0xf]  ;;  %v6104_v48 = vld [vmem:[%s7146_s16 + $0x6c] sm:$0xf0]  ;;  %v4675_v50 = vor.u32 %v6204_v43, %v4674_v42  ;;  %1453 = vmatpush.bf16.msra.mxu1 %v4419_v45  ;;  %v6182_v34 = vld [vmem:[%s7146_s16 + $0x2e4] sm:$0xf]  ;;  %v787_v36 = vunpack.c.l.b16 %v643_v32  ;;  %v788_v43 = vunpack.c.h.b16 %v643_v32  ;;  %v4343_v45 = vor.u32 %v6118_v28, %v4340_v29 }
  0x6c   : > { %v4402_v49 = vld [vmem:[%s7146_s16 + $0x160] sm:$0xf]  ;;  %v6136_v51 = vld [vmem:[%s7146_s16 + $0x16c] sm:$0xf0]  ;;  %v4275_v56 = vor.u32 %v6104_v48, %v4274_v47  ;;  %1466 = vmatpush.bf16.msra.mxu2 %v4547_v46  ;;  %v4596_v35 = vld [vmem:[%s7146_s16 + $0x2f0] sm:$0xf0]  ;;  %v4471_v47 = vor.u32 %v6150_v30, %v4468_v31 }
  0x6d   : > { %v4530_v52 = vld [vmem:[%s7146_s16 + $0x260] sm:$0xf]  ;;  %v6168_v53 = vld [vmem:[%s7146_s16 + $0x26c] sm:$0xf0]  ;;  %v4403_v57 = vor.u32 %v6136_v51, %v4402_v49  ;;  %1479 = vmatpush.bf16.msra.mxu3 %v4675_v50  ;;  %v6214_v40 = vld [vmem:[%s7146_s16 + $0x3e4] sm:$0xf]  ;;  %v4599_v48 = vor.u32 %v6182_v34, %v4596_v35 }
  0x6e   : > { %v4658_v54 = vld [vmem:[%s7146_s16 + $0x360] sm:$0xf]  ;;  %v6200_v55 = vld [vmem:[%s7146_s16 + $0x36c] sm:$0xf0]  ;;  %v4531_v58 = vor.u32 %v6168_v53, %v4530_v52  ;;  %1441 = vmatpush.bf16.msra.mxu0 %v4275_v56  ;;  %v4724_v41 = vld [vmem:[%s7146_s16 + $0x3f0] sm:$0xf0]  ;;  %v7259_v56 = vpack.c.b16 %v787_v36, %v787_v36 }
  0x6f   : > { %v4258_v59 = vld [vmem:[%s7146_s16 + $0x40] sm:$0xf]  ;;  %v6100_v60 = vld [vmem:[%s7146_s16 + $0x4c] sm:$0xf0]  ;;  %v4659_v62 = vor.u32 %v6200_v55, %v4658_v54  ;;  %1454 = vmatpush.bf16.msra.mxu1 %v4403_v57  ;;  %v6114_v49 = vld [vmem:[%s7146_s16 + $0xc4] sm:$0xf]  ;;  %v4727_v52 = vor.u32 %v6214_v40, %v4724_v41 }
  0x70   : > { %v4386_v61 = vld [vmem:[%s7146_s16 + $0x140] sm:$0xf]  ;;  %v6132_v63 = vld [vmem:[%s7146_s16 + $0x14c] sm:$0xf0]  ;;  %v4259_v4 = vor.u32 %v6100_v60, %v4258_v59  ;;  %1467 = vmatpush.bf16.msra.mxu2 %v4531_v58  ;;  %v4324_v50 = vld [vmem:[%s7146_s16 + $0xd0] sm:$0xf0]  ;;  %v7265_v60 = vpack.c.b16 %v788_v43, %v788_v43 }
  0x71   : > { %v4514_v0 = vld [vmem:[%s7146_s16 + $0x240] sm:$0xf]  ;;  %v6164_v1 = vld [vmem:[%s7146_s16 + $0x24c] sm:$0xf0]  ;;  %v4387_v5 = vor.u32 %v6132_v63, %v4386_v61  ;;  %1480 = vmatpush.bf16.msra.mxu3 %v4659_v62  ;;  %v6146_v51 = vld [vmem:[%s7146_s16 + $0x1c4] sm:$0xf]  ;;  %v4327_v61 = vor.u32 %v6114_v49, %v4324_v50 }
  0x72   : > { %v4642_v2 = vld [vmem:[%s7146_s16 + $0x340] sm:$0xf]  ;;  %v6196_v3 = vld [vmem:[%s7146_s16 + $0x34c] sm:$0xf0]  ;;  %v4515_v6 = vor.u32 %v6164_v1, %v4514_v0  ;;  %1442 = vmatpush.bf16.msra.mxu0 %v4259_v4  ;;  %v4452_v53 = vld [vmem:[%s7146_s16 + $0x1d0] sm:$0xf0] }
  0x73   : > { %v4242_v7 = vld [vmem:[%s7146_s16 + $0x20] sm:$0xf]  ;;  %v6096_v8 = vld [vmem:[%s7146_s16 + $0x2c] sm:$0xf0]  ;;  %v4643_v10 = vor.u32 %v6196_v3, %v4642_v2  ;;  %1455 = vmatpush.bf16.msra.mxu1 %v4387_v5  ;;  %v6178_v54 = vld [vmem:[%s7146_s16 + $0x2c4] sm:$0xf]  ;;  %v4455_v63 = vor.u32 %v6146_v51, %v4452_v53 }
  0x74   : > { %v4370_v9 = vld [vmem:[%s7146_s16 + $0x120] sm:$0xf]  ;;  %v6128_v11 = vld [vmem:[%s7146_s16 + $0x12c] sm:$0xf0]  ;;  %v4243_v17 = vor.u32 %v6096_v8, %v4242_v7  ;;  %1468 = vmatpush.bf16.msra.mxu2 %v4515_v6  ;;  %v4580_v55 = vld [vmem:[%s7146_s16 + $0x2d0] sm:$0xf0] }
  0x75   : > { %v4498_v12 = vld [vmem:[%s7146_s16 + $0x220] sm:$0xf]  ;;  %v6160_v13 = vld [vmem:[%s7146_s16 + $0x22c] sm:$0xf0]  ;;  %v4371_v21 = vor.u32 %v6128_v11, %v4370_v9  ;;  %1481 = vmatpush.bf16.msra.mxu3 %v4643_v10  ;;  %v6210_v57 = vld [vmem:[%s7146_s16 + $0x3c4] sm:$0xf]  ;;  %v4583_v0 = vor.u32 %v6178_v54, %v4580_v55 }
  0x76   : > { %v4626_v14 = vld [vmem:[%s7146_s16 + $0x320] sm:$0xf]  ;;  %v6192_v15 = vld [vmem:[%s7146_s16 + $0x32c] sm:$0xf0]  ;;  %v4499_v22 = vor.u32 %v6160_v13, %v4498_v12  ;;  %1443 = vmatpush.bf16.msra.mxu0 %v4243_v17  ;;  %v4708_v58 = vld [vmem:[%s7146_s16 + $0x3d0] sm:$0xf0] }
  0x77   : > { %v4226_v16 = vld [vmem:[%s7146_s16] sm:$0xf]  ;;  %v6092_v18 = vld [vmem:[%s7146_s16 + $0xc] sm:$0xf0]  ;;  %v4627_v26 = vor.u32 %v6192_v15, %v4626_v14  ;;  %1456 = vmatpush.bf16.msra.mxu1 %v4371_v21  ;;  %v6110_v1 = vld [vmem:[%s7146_s16 + $0xa4] sm:$0xf]  ;;  %v4711_v4 = vor.u32 %v6210_v57, %v4708_v58 }
  0x78   : > { %v4354_v19 = vld [vmem:[%s7146_s16 + $0x100] sm:$0xf]  ;;  %v6124_v20 = vld [vmem:[%s7146_s16 + $0x10c] sm:$0xf0]  ;;  %v4227_v33 = vor.u32 %v6092_v18, %v4226_v16  ;;  %1469 = vmatpush.bf16.msra.mxu2 %v4499_v22  ;;  %v4308_v2 = vld [vmem:[%s7146_s16 + $0xb0] sm:$0xf0] }
  0x79   : > { %v4482_v23 = vld [vmem:[%s7146_s16 + $0x200] sm:$0xf]  ;;  %v6156_v24 = vld [vmem:[%s7146_s16 + $0x20c] sm:$0xf0]  ;;  %v4355_v38 = vor.u32 %v6124_v20, %v4354_v19  ;;  %1482 = vmatpush.bf16.msra.mxu3 %v4627_v26  ;;  %v6142_v3 = vld [vmem:[%s7146_s16 + $0x1a4] sm:$0xf]  ;;  %v4311_v10 = vor.u32 %v6110_v1, %v4308_v2 }
  0x7a   : > { %v4610_v25 = vld [vmem:[%s7146_s16 + $0x300] sm:$0xf]  ;;  %v6188_v27 = vld [vmem:[%s7146_s16 + $0x30c] sm:$0xf0]  ;;  %v4483_v39 = vor.u32 %v6156_v24, %v4482_v23  ;;  %1444 = vmatpush.bf16.msra.mxu0 %v4227_v33  ;;  %v4436_v5 = vld [vmem:[%s7146_s16 + $0x1b0] sm:$0xf0] }
  0x7b   : > { %v642_v37 = vld [vmem:[#allocation2] sm:$0xff]  ;;  %v4611_v44 = vor.u32 %v6188_v27, %v4610_v25  ;;  %1457 = vmatpush.bf16.msra.mxu1 %v4355_v38  ;;  %v6174_v6 = vld [vmem:[%s7146_s16 + $0x2a4] sm:$0xf]  ;;  %v4439_v11 = vor.u32 %v6142_v3, %v4436_v5 }
  0x7c   : > { %v785_v42 = vunpack.c.l.b16 %v642_v37  ;;  %v786_v46 = vunpack.c.h.b16 %v642_v37  ;;  %1470 = vmatpush.bf16.msra.mxu2 %v4483_v39  ;;  %v4564_v7 = vld [vmem:[%s7146_s16 + $0x2b0] sm:$0xf0]  ;;  %v6206_v8 = vld [vmem:[%s7146_s16 + $0x3a4] sm:$0xf] }
  0x7d   : > { %1483 = vmatpush.bf16.msra.mxu3 %v4611_v44  ;;  %v4692_v9 = vld [vmem:[%s7146_s16 + $0x3b0] sm:$0xf0]  ;;  %v4567_v12 = vor.u32 %v6174_v6, %v4564_v7  ;;  %v6106_v13 = vld [vmem:[%s7146_s16 + $0x84] sm:$0xf] }
  0x7e   : > { %v7263_v59 = vpack.c.b16 %v785_v42, %v785_v42  ;;  %1489 = vmatpush.bf16.msrb.mxu0 %v4343_v45  ;;  %v7267_v62 = vpack.c.b16 %v786_v46, %v786_v46  ;;  %v4292_v14 = vld [vmem:[%s7146_s16 + $0x90] sm:$0xf0]  ;;  %v6138_v15 = vld [vmem:[%s7146_s16 + $0x184] sm:$0xf]  ;;  %v4695_v16 = vor.u32 %v6206_v8, %v4692_v9 }
  0x7f   : > { %1502 = vmatpush.bf16.msrb.mxu1 %v4471_v47  ;;  %1471 = vmatmul.bf16.vlgmr.msra.gmra.mxu2 %v7259_v56  ;;  %v4420_v17 = vld [vmem:[%s7146_s16 + $0x190] sm:$0xf0]  ;;  %v6170_v18 = vld [vmem:[%s7146_s16 + $0x284] sm:$0xf]  ;;  %v4295_v22 = vor.u32 %v6106_v13, %v4292_v14  ;;  %v6153_v14 = vld [vmem:[%s7146_s16 + $0x1f4] sm:$0xf0] }
  0x80   : > { %1515 = vmatpush.bf16.msrb.mxu2 %v4599_v48  ;;  %1445 = vmatmul.bf16.vlgmr.msra.gmra.mxu0 %v7263_v59  ;;  %v4548_v19 = vld [vmem:[%s7146_s16 + $0x290] sm:$0xf0]  ;;  %v6202_v20 = vld [vmem:[%s7146_s16 + $0x384] sm:$0xf]  ;;  %v4423_v23 = vor.u32 %v6138_v15, %v4420_v17  ;;  %v4602_v15 = vld [vmem:[%s7146_s16 + $0x2e8] sm:$0xf] }
  0x81   : > { %1528 = vmatpush.bf16.msrb.mxu3 %v4727_v52  ;;  %1458 = vmatmul.bf16.vlgmr.msra.gmra.mxu1 %v7267_v62  ;;  %v4676_v21 = vld [vmem:[%s7146_s16 + $0x390] sm:$0xf0]  ;;  %v4551_v24 = vor.u32 %v6170_v18, %v4548_v19  ;;  %v6102_v25 = vld [vmem:[%s7146_s16 + $0x64] sm:$0xf]  ;;  %v4730_v19 = vld [vmem:[%s7146_s16 + $0x3e8] sm:$0xf] }
  0x82   : > { %1484 = vmatmul.bf16.vlgmr.msra.gmra.mxu3 %v7265_v60  ;;  %1490 = vmatpush.bf16.msrb.mxu0 %v4327_v61  ;;  %v4276_v26 = vld [vmem:[%s7146_s16 + $0x70] sm:$0xf0]  ;;  %v6134_v27 = vld [vmem:[%s7146_s16 + $0x164] sm:$0xf]  ;;  %v4679_v28 = vor.u32 %v6202_v20, %v4676_v21  ;;  %v6217_v20 = vld [vmem:[%s7146_s16 + $0x3f4] sm:$0xf0] }
  0x83   : > { %1503 = vmatpush.bf16.msrb.mxu1 %v4455_v63  ;;  %v4404_v29 = vld [vmem:[%s7146_s16 + $0x170] sm:$0xf0]  ;;  %v6166_v30 = vld [vmem:[%s7146_s16 + $0x264] sm:$0xf]  ;;  %v4279_v34 = vor.u32 %v6102_v25, %v4276_v26  ;;  %v4330_v25 = vld [vmem:[%s7146_s16 + $0xc8] sm:$0xf] }
  0x84   : > { %1516 = vmatpush.bf16.msrb.mxu2 %v4583_v0  ;;  %v4532_v31 = vld [vmem:[%s7146_s16 + $0x270] sm:$0xf0]  ;;  %v6198_v32 = vld [vmem:[%s7146_s16 + $0x364] sm:$0xf]  ;;  %v4407_v35 = vor.u32 %v6134_v27, %v4404_v29  ;;  %v6117_v26 = vld [vmem:[%s7146_s16 + $0xd4] sm:$0xf0] }
  0x85   : > { %1529 = vmatpush.bf16.msrb.mxu3 %v4711_v4  ;;  %v4660_v33 = vld [vmem:[%s7146_s16 + $0x370] sm:$0xf0]  ;;  %v4535_v36 = vor.u32 %v6166_v30, %v4532_v31  ;;  %v6098_v37 = vld [vmem:[%s7146_s16 + $0x44] sm:$0xf]  ;;  %v4458_v27 = vld [vmem:[%s7146_s16 + $0x1c8] sm:$0xf] }
  0x86   : > { %1491 = vmatpush.bf16.msrb.mxu0 %v4311_v10  ;;  %v4260_v38 = vld [vmem:[%s7146_s16 + $0x50] sm:$0xf0]  ;;  %v6130_v39 = vld [vmem:[%s7146_s16 + $0x144] sm:$0xf]  ;;  %v4663_v40 = vor.u32 %v6198_v32, %v4660_v33  ;;  %v4346_v10 = vld [vmem:[%s7146_s16 + $0xe8] sm:$0xf] }
  0x87   : > { %1504 = vmatpush.bf16.msrb.mxu1 %v4439_v11  ;;  %v4388_v41 = vld [vmem:[%s7146_s16 + $0x150] sm:$0xf0]  ;;  %v6162_v42 = vld [vmem:[%s7146_s16 + $0x244] sm:$0xf]  ;;  %v4263_v46 = vor.u32 %v6098_v37, %v4260_v38  ;;  %v6121_v11 = vld [vmem:[%s7146_s16 + $0xf4] sm:$0xf0] }
  0x88   : > { %1517 = vmatpush.bf16.msrb.mxu2 %v4567_v12  ;;  %v4516_v43 = vld [vmem:[%s7146_s16 + $0x250] sm:$0xf0]  ;;  %v6194_v44 = vld [vmem:[%s7146_s16 + $0x344] sm:$0xf]  ;;  %v4391_v47 = vor.u32 %v6130_v39, %v4388_v41  ;;  %v4474_v12 = vld [vmem:[%s7146_s16 + $0x1e8] sm:$0xf] }
  0x89   : > { %1530 = vmatpush.bf16.msrb.mxu3 %v4695_v16  ;;  %v4644_v45 = vld [vmem:[%s7146_s16 + $0x350] sm:$0xf0]  ;;  %v4519_v48 = vor.u32 %v6162_v42, %v4516_v43  ;;  %v6094_v49 = vld [vmem:[%s7146_s16 + $0x24] sm:$0xf]  ;;  %v6185_v16 = vld [vmem:[%s7146_s16 + $0x2f4] sm:$0xf0] }
  0x8a   : > { %1492 = vmatpush.bf16.msrb.mxu0 %v4295_v22  ;;  %v4244_v50 = vld [vmem:[%s7146_s16 + $0x30] sm:$0xf0]  ;;  %v6126_v51 = vld [vmem:[%s7146_s16 + $0x124] sm:$0xf]  ;;  %v4647_v52 = vor.u32 %v6194_v44, %v4644_v45  ;;  %v4347_v22 = vor.u32 %v6121_v11, %v4346_v10  ;;  %v6149_v29 = vld [vmem:[%s7146_s16 + $0x1d4] sm:$0xf0] }
  0x8b   : > { %1505 = vmatpush.bf16.msrb.mxu1 %v4423_v23  ;;  %v4372_v53 = vld [vmem:[%s7146_s16 + $0x130] sm:$0xf0]  ;;  %v6158_v54 = vld [vmem:[%s7146_s16 + $0x224] sm:$0xf]  ;;  %v4247_v61 = vor.u32 %v6094_v49, %v4244_v50  ;;  %v4475_v23 = vor.u32 %v6153_v14, %v4474_v12  ;;  %v4586_v30 = vld [vmem:[%s7146_s16 + $0x2c8] sm:$0xf] }
  0x8c   : > { %1518 = vmatpush.bf16.msrb.mxu2 %v4551_v24  ;;  %v4500_v55 = vld [vmem:[%s7146_s16 + $0x230] sm:$0xf0]  ;;  %v6190_v57 = vld [vmem:[%s7146_s16 + $0x324] sm:$0xf]  ;;  %v4375_v1 = vor.u32 %v6126_v51, %v4372_v53  ;;  %v4603_v24 = vor.u32 %v6185_v16, %v4602_v15  ;;  %v6181_v31 = vld [vmem:[%s7146_s16 + $0x2d4] sm:$0xf0] }
  0x8d   : > { %1531 = vmatpush.bf16.msrb.mxu3 %v4679_v28  ;;  %v4628_v58 = vld [vmem:[%s7146_s16 + $0x330] sm:$0xf0]  ;;  %v6090_v63 = vld [vmem:[%s7146_s16 + $0x4] sm:$0xf]  ;;  %v4503_v2 = vor.u32 %v6158_v54, %v4500_v55  ;;  %v4731_v28 = vor.u32 %v6217_v20, %v4730_v19  ;;  %v4714_v32 = vld [vmem:[%s7146_s16 + $0x3c8] sm:$0xf] }
  0x8e   : > { %1493 = vmatpush.bf16.msrb.mxu0 %v4279_v34  ;;  %v4228_v0 = vld [vmem:[%s7146_s16 + $0x10] sm:$0xf0]  ;;  %v6122_v3 = vld [vmem:[%s7146_s16 + $0x104] sm:$0xf]  ;;  %v4631_v6 = vor.u32 %v6190_v57, %v4628_v58  ;;  %v6213_v33 = vld [vmem:[%s7146_s16 + $0x3d4] sm:$0xf0]  ;;  %v4331_v34 = vor.u32 %v6117_v26, %v4330_v25 }
  0x8f   : > { %1506 = vmatpush.bf16.msrb.mxu1 %v4407_v35  ;;  %v4356_v4 = vld [vmem:[%s7146_s16 + $0x110] sm:$0xf0]  ;;  %v6154_v5 = vld [vmem:[%s7146_s16 + $0x204] sm:$0xf]  ;;  %v4231_v13 = vor.u32 %v6090_v63, %v4228_v0  ;;  %v4459_v35 = vor.u32 %v6149_v29, %v4458_v27  ;;  %v4314_v37 = vld [vmem:[%s7146_s16 + $0xa8] sm:$0xf] }
  0x90   : > { %1519 = vmatpush.bf16.msrb.mxu2 %v4535_v36  ;;  %v4484_v7 = vld [vmem:[%s7146_s16 + $0x210] sm:$0xf0]  ;;  %v6186_v8 = vld [vmem:[%s7146_s16 + $0x304] sm:$0xf]  ;;  %v4359_v17 = vor.u32 %v6122_v3, %v4356_v4  ;;  %v4587_v36 = vor.u32 %v6181_v31, %v4586_v30  ;;  %v6113_v38 = vld [vmem:[%s7146_s16 + $0xb4] sm:$0xf0] }
  0x91   : > { %1532 = vmatpush.bf16.msrb.mxu3 %v4663_v40  ;;  %v4612_v9 = vld [vmem:[%s7146_s16 + $0x310] sm:$0xf0]  ;;  %v4487_v18 = vor.u32 %v6154_v5, %v4484_v7  ;;  %v4442_v39 = vld [vmem:[%s7146_s16 + $0x1a8] sm:$0xf]  ;;  %v4715_v40 = vor.u32 %v6213_v33, %v4714_v32  ;;  %v6145_v41 = vld [vmem:[%s7146_s16 + $0x1b4] sm:$0xf0] }
  0x92   : > { %1494 = vmatpush.bf16.msrb.mxu0 %v4263_v46  ;;  %v4615_v21 = vor.u32 %v6186_v8, %v4612_v9  ;;  %v4570_v42 = vld [vmem:[%s7146_s16 + $0x2a8] sm:$0xf]  ;;  %v6177_v43 = vld [vmem:[%s7146_s16 + $0x2b4] sm:$0xf0]  ;;  %v4315_v46 = vor.u32 %v6113_v38, %v4314_v37 }
  0x93   : > { %1507 = vmatpush.bf16.msrb.mxu1 %v4391_v47  ;;  %v4698_v44 = vld [vmem:[%s7146_s16 + $0x3a8] sm:$0xf]  ;;  %v6209_v45 = vld [vmem:[%s7146_s16 + $0x3b4] sm:$0xf0]  ;;  %v4443_v47 = vor.u32 %v6145_v41, %v4442_v39 }
  0x94   : > { %1520 = vmatpush.bf16.msrb.mxu2 %v4519_v48  ;;  %v4571_v48 = vor.u32 %v6177_v43, %v4570_v42  ;;  %v4298_v49 = vld [vmem:[%s7146_s16 + $0x88] sm:$0xf]  ;;  %v6109_v50 = vld [vmem:[%s7146_s16 + $0x94] sm:$0xf0] }
  0x95   : > { %1533 = vmatpush.bf16.msrb.mxu3 %v4647_v52  ;;  %v4426_v51 = vld [vmem:[%s7146_s16 + $0x188] sm:$0xf]  ;;  %v4699_v52 = vor.u32 %v6209_v45, %v4698_v44  ;;  %v6141_v53 = vld [vmem:[%s7146_s16 + $0x194] sm:$0xf0] }
  0x96   : > { %1495 = vmatpush.bf16.msrb.mxu0 %v4247_v61  ;;  %v4554_v54 = vld [vmem:[%s7146_s16 + $0x288] sm:$0xf]  ;;  %v6173_v55 = vld [vmem:[%s7146_s16 + $0x294] sm:$0xf0]  ;;  %v4299_v61 = vor.u32 %v6109_v50, %v4298_v49  ;;  %v4427_v63 = vor.u32 %v6141_v53, %v4426_v51  ;;  %v4476_v50 = vld [vmem:[%s7146_s16 + $0x1f8] sm:$0xf0] }
  0x97   : > { %1508 = vmatpush.bf16.msrb.mxu1 %v4375_v1  ;;  %v4682_v57 = vld [vmem:[%s7146_s16 + $0x388] sm:$0xf]  ;;  %v6205_v58 = vld [vmem:[%s7146_s16 + $0x394] sm:$0xf0]  ;;  %v4555_v0 = vor.u32 %v6173_v55, %v4554_v54  ;;  %v6183_v51 = vld [vmem:[%s7146_s16 + $0x2ec] sm:$0xf] }
  0x98   : > { %1521 = vmatpush.bf16.msrb.mxu2 %v4503_v2  ;;  %v4282_v1 = vld [vmem:[%s7146_s16 + $0x68] sm:$0xf]  ;;  %v6105_v2 = vld [vmem:[%s7146_s16 + $0x74] sm:$0xf0]  ;;  %v4683_v4 = vor.u32 %v6205_v58, %v4682_v57  ;;  %v6215_v55 = vld [vmem:[%s7146_s16 + $0x3ec] sm:$0xf] }
  0x99   : > { %1534 = vmatpush.bf16.msrb.mxu3 %v4631_v6  ;;  %v4410_v3 = vld [vmem:[%s7146_s16 + $0x168] sm:$0xf]  ;;  %v6137_v5 = vld [vmem:[%s7146_s16 + $0x174] sm:$0xf0]  ;;  %v4283_v10 = vor.u32 %v6105_v2, %v4282_v1  ;;  %v4732_v57 = vld [vmem:[%s7146_s16 + $0x3f8] sm:$0xf0] }
  0x9a   : > { %1496 = vmatpush.bf16.msrb.mxu0 %v4231_v13  ;;  %v4538_v6 = vld [vmem:[%s7146_s16 + $0x268] sm:$0xf]  ;;  %v6169_v7 = vld [vmem:[%s7146_s16 + $0x274] sm:$0xf0]  ;;  %v4411_v11 = vor.u32 %v6137_v5, %v4410_v3  ;;  %v6115_v1 = vld [vmem:[%s7146_s16 + $0xcc] sm:$0xf] }
  0x9b   : > { %1509 = vmatpush.bf16.msrb.mxu1 %v4359_v17  ;;  %v4666_v8 = vld [vmem:[%s7146_s16 + $0x368] sm:$0xf]  ;;  %v6201_v9 = vld [vmem:[%s7146_s16 + $0x374] sm:$0xf0]  ;;  %v4539_v12 = vor.u32 %v6169_v7, %v4538_v6  ;;  %v4332_v2 = vld [vmem:[%s7146_s16 + $0xd8] sm:$0xf0] }
  0x9c   : > { %1522 = vmatpush.bf16.msrb.mxu2 %v4487_v18  ;;  %v4266_v13 = vld [vmem:[%s7146_s16 + $0x48] sm:$0xf]  ;;  %v6101_v14 = vld [vmem:[%s7146_s16 + $0x54] sm:$0xf0]  ;;  %v4667_v16 = vor.u32 %v6201_v9, %v4666_v8  ;;  %v6147_v3 = vld [vmem:[%s7146_s16 + $0x1cc] sm:$0xf] }
  0x9d   : > { %1535 = vmatpush.bf16.msrb.mxu3 %v4615_v21  ;;  %1497 = vmatmul.bf16.vlgmr.msrb.gmra.mxu0 %v7263_v59  ;;  %v4394_v15 = vld [vmem:[%s7146_s16 + $0x148] sm:$0xf]  ;;  %v6133_v17 = vld [vmem:[%s7146_s16 + $0x154] sm:$0xf0]  ;;  %v4460_v5 = vld [vmem:[%s7146_s16 + $0x1d8] sm:$0xf0] }
  0x9e   : > { %1541 = vmatpush.bf16.msra.mxu0 %v4347_v22  ;;  %1510 = vmatmul.bf16.vlgmr.msrb.gmra.mxu1 %v7267_v62  ;;  %v4522_v18 = vld [vmem:[%s7146_s16 + $0x248] sm:$0xf]  ;;  %v6165_v19 = vld [vmem:[%s7146_s16 + $0x254] sm:$0xf0]  ;;  %v4267_v22 = vor.u32 %v6101_v14, %v4266_v13  ;;  %v6179_v6 = vld [vmem:[%s7146_s16 + $0x2cc] sm:$0xf] }
  0x9f   : > { %1554 = vmatpush.bf16.msra.mxu1 %v4475_v23  ;;  %1523 = vmatmul.bf16.vlgmr.msrb.gmra.mxu2 %v7259_v56  ;;  %v4650_v20 = vld [vmem:[%s7146_s16 + $0x348] sm:$0xf]  ;;  %v6197_v21 = vld [vmem:[%s7146_s16 + $0x354] sm:$0xf0]  ;;  %v4395_v23 = vor.u32 %v6133_v17, %v4394_v15  ;;  %v4588_v7 = vld [vmem:[%s7146_s16 + $0x2d8] sm:$0xf0] }
  0xa0   : > { %1567 = vmatpush.bf16.msra.mxu2 %v4603_v24  ;;  %1536 = vmatmul.bf16.vlgmr.msrb.gmra.mxu3 %v7265_v60  ;;  %v4523_v24 = vor.u32 %v6165_v19, %v4522_v18  ;;  %v4250_v25 = vld [vmem:[%s7146_s16 + $0x28] sm:$0xf]  ;;  %v6097_v26 = vld [vmem:[%s7146_s16 + $0x34] sm:$0xf0]  ;;  %v6211_v8 = vld [vmem:[%s7146_s16 + $0x3cc] sm:$0xf] }
  0xa1   : > { %1580 = vmatpush.bf16.msra.mxu3 %v4731_v28  ;;  %v4378_v27 = vld [vmem:[%s7146_s16 + $0x128] sm:$0xf]  ;;  %v4651_v28 = vor.u32 %v6197_v21, %v4650_v20  ;;  %v6129_v29 = vld [vmem:[%s7146_s16 + $0x134] sm:$0xf0]  ;;  %v4716_v9 = vld [vmem:[%s7146_s16 + $0x3d8] sm:$0xf0] }
  0xa2   : > { %1542 = vmatpush.bf16.msra.mxu0 %v4331_v34  ;;  %v4506_v30 = vld [vmem:[%s7146_s16 + $0x228] sm:$0xf]  ;;  %v6161_v31 = vld [vmem:[%s7146_s16 + $0x234] sm:$0xf0]  ;;  %v4251_v34 = vor.u32 %v6097_v26, %v4250_v25  ;;  %v4379_v37 = vor.u32 %v6129_v29, %v4378_v27  ;;  %v6111_v13 = vld [vmem:[%s7146_s16 + $0xac] sm:$0xf] }
  0xa3   : > { %1555 = vmatpush.bf16.msra.mxu1 %v4459_v35  ;;  %v4634_v32 = vld [vmem:[%s7146_s16 + $0x328] sm:$0xf]  ;;  %v6193_v33 = vld [vmem:[%s7146_s16 + $0x334] sm:$0xf0]  ;;  %v4507_v38 = vor.u32 %v6161_v31, %v4506_v30  ;;  %v4316_v14 = vld [vmem:[%s7146_s16 + $0xb8] sm:$0xf0] }
  0xa4   : > { %1568 = vmatpush.bf16.msra.mxu2 %v4587_v36  ;;  %v4234_v35 = vld [vmem:[%s7146_s16 + $0x8] sm:$0xf]  ;;  %v6093_v36 = vld [vmem:[%s7146_s16 + $0x14] sm:$0xf0]  ;;  %v4635_v42 = vor.u32 %v6193_v33, %v4634_v32  ;;  %v6143_v15 = vld [vmem:[%s7146_s16 + $0x1ac] sm:$0xf] }
  0xa5   : > { %1581 = vmatpush.bf16.msra.mxu3 %v4715_v40  ;;  %v4362_v39 = vld [vmem:[%s7146_s16 + $0x108] sm:$0xf]  ;;  %v6125_v40 = vld [vmem:[%s7146_s16 + $0x114] sm:$0xf0]  ;;  %v4235_v49 = vor.u32 %v6093_v36, %v4234_v35  ;;  %v4444_v17 = vld [vmem:[%s7146_s16 + $0x1b8] sm:$0xf0] }
  0xa6   : > { %1543 = vmatpush.bf16.msra.mxu0 %v4315_v46  ;;  %v4490_v41 = vld [vmem:[%s7146_s16 + $0x208] sm:$0xf]  ;;  %v6157_v43 = vld [vmem:[%s7146_s16 + $0x214] sm:$0xf0]  ;;  %v6119_v46 = vld [vmem:[%s7146_s16 + $0xec] sm:$0xf]  ;;  %v4363_v53 = vor.u32 %v6125_v40, %v4362_v39 }
  0xa7   : > { %1556 = vmatpush.bf16.msra.mxu1 %v4443_v47  ;;  %v4618_v44 = vld [vmem:[%s7146_s16 + $0x308] sm:$0xf]  ;;  %v6189_v45 = vld [vmem:[%s7146_s16 + $0x314] sm:$0xf0]  ;;  %v4348_v47 = vld [vmem:[%s7146_s16 + $0xf8] sm:$0xf0]  ;;  %v4491_v54 = vor.u32 %v6157_v43, %v4490_v41 }
  0xa8   : > { %1569 = vmatpush.bf16.msra.mxu2 %v4571_v48  ;;  %v6151_v48 = vld [vmem:[%s7146_s16 + $0x1ec] sm:$0xf]  ;;  %v4619_v58 = vor.u32 %v6189_v45, %v4618_v44  ;;  %v4572_v19 = vld [vmem:[%s7146_s16 + $0x2b8] sm:$0xf0] }
  0xa9   : > { %1582 = vmatpush.bf16.msra.mxu3 %v4699_v52  ;;  %v4604_v52 = vld [vmem:[%s7146_s16 + $0x2f8] sm:$0xf0]  ;;  %v6175_v18 = vld [vmem:[%s7146_s16 + $0x2ac] sm:$0xf] }
  0xaa   : > { %1544 = vmatpush.bf16.msra.mxu0 %v4299_v61  ;;  %v4351_v61 = vor.u32 %v6119_v46, %v4348_v47  ;;  %v6207_v20 = vld [vmem:[%s7146_s16 + $0x3ac] sm:$0xf]  ;;  %v4700_v21 = vld [vmem:[%s7146_s16 + $0x3b8] sm:$0xf0] }
  0xab   : > { %1557 = vmatpush.bf16.msra.mxu1 %v4427_v63  ;;  %v4479_v63 = vor.u32 %v6151_v48, %v4476_v50  ;;  %v6107_v25 = vld [vmem:[%s7146_s16 + $0x8c] sm:$0xf]  ;;  %v4300_v26 = vld [vmem:[%s7146_s16 + $0x98] sm:$0xf0] }
  0xac   : > { %1570 = vmatpush.bf16.msra.mxu2 %v4555_v0  ;;  %v4607_v0 = vor.u32 %v6183_v51, %v4604_v52  ;;  %v6139_v27 = vld [vmem:[%s7146_s16 + $0x18c] sm:$0xf]  ;;  %v4428_v29 = vld [vmem:[%s7146_s16 + $0x198] sm:$0xf0] }
  0xad   : > { %1583 = vmatpush.bf16.msra.mxu3 %v4683_v4  ;;  %v4735_v4 = vor.u32 %v6215_v55, %v4732_v57  ;;  %v6171_v30 = vld [vmem:[%s7146_s16 + $0x28c] sm:$0xf]  ;;  %v4556_v31 = vld [vmem:[%s7146_s16 + $0x298] sm:$0xf0]  ;;  %v4431_v35 = vor.u32 %v6139_v27, %v4428_v29 }
  0xae   : > { %1545 = vmatpush.bf16.msra.mxu0 %v4283_v10  ;;  %v4335_v10 = vor.u32 %v6115_v1, %v4332_v2  ;;  %v6203_v32 = vld [vmem:[%s7146_s16 + $0x38c] sm:$0xf]  ;;  %v4684_v33 = vld [vmem:[%s7146_s16 + $0x398] sm:$0xf0]  ;;  %v4559_v36 = vor.u32 %v6171_v30, %v4556_v31  ;;  %v4786_v31 = vld [vmem:[%s7156_s17 + $0x60] sm:$0xf] }
  0xaf   : > { %1558 = vmatpush.bf16.msra.mxu1 %v4411_v11  ;;  %v4463_v11 = vor.u32 %v6147_v3, %v4460_v5  ;;  %v6135_v39 = vld [vmem:[%s7146_s16 + $0x16c] sm:$0xf]  ;;  %v4687_v40 = vor.u32 %v6203_v32, %v4684_v33  ;;  %v4412_v41 = vld [vmem:[%s7146_s16 + $0x178] sm:$0xf0]  ;;  %v6231_v32 = vld [vmem:[%s7156_s17 + $0x64] sm:$0xf0] }
  0xb0   : > { %1571 = vmatpush.bf16.msra.mxu2 %v4539_v12  ;;  %v4591_v12 = vor.u32 %v6179_v6, %v4588_v7  ;;  %v4540_v43 = vld [vmem:[%s7146_s16 + $0x278] sm:$0xf0]  ;;  %v6199_v44 = vld [vmem:[%s7146_s16 + $0x36c] sm:$0xf]  ;;  %v4415_v47 = vor.u32 %v6135_v39, %v4412_v41  ;;  %v4770_v41 = vld [vmem:[%s7156_s17 + $0x40] sm:$0xf] }
  0xb1   : > { %1584 = vmatpush.bf16.msra.mxu3 %v4667_v16  ;;  %v4719_v16 = vor.u32 %v6211_v8, %v4716_v9  ;;  %v4668_v45 = vld [vmem:[%s7146_s16 + $0x378] sm:$0xf0]  ;;  %v6131_v51 = vld [vmem:[%s7146_s16 + $0x14c] sm:$0xf] }
  0xb2   : > { %1546 = vmatpush.bf16.msra.mxu0 %v4267_v22  ;;  %v4319_v22 = vor.u32 %v6111_v13, %v4316_v14  ;;  %v4268_v50 = vld [vmem:[%s7146_s16 + $0x58] sm:$0xf0]  ;;  %v4671_v52 = vor.u32 %v6199_v44, %v4668_v45  ;;  %v6195_v57 = vld [vmem:[%s7146_s16 + $0x34c] sm:$0xf]  ;;  %v6225_v44 = vld [vmem:[%s7156_s17 + $0x34] sm:$0xf0] }
  0xb3   : > { %1559 = vmatpush.bf16.msra.mxu1 %v4395_v23  ;;  %v4447_v23 = vor.u32 %v6143_v15, %v4444_v17  ;;  %v4524_v55 = vld [vmem:[%s7146_s16 + $0x258] sm:$0xf0]  ;;  %v6095_v1 = vld [vmem:[%s7146_s16 + $0x2c] sm:$0xf] }
  0xb4   : > { %1572 = vmatpush.bf16.msra.mxu2 %v4523_v24  ;;  %v4575_v24 = vor.u32 %v6175_v18, %v4572_v19  ;;  %v4252_v2 = vld [vmem:[%s7146_s16 + $0x38] sm:$0xf0]  ;;  %v6127_v3 = vld [vmem:[%s7146_s16 + $0x12c] sm:$0xf] }
  0xb5   : > { %1585 = vmatpush.bf16.msra.mxu3 %v4651_v28  ;;  %v4703_v28 = vor.u32 %v6207_v20, %v4700_v21  ;;  %v4380_v5 = vld [vmem:[%s7146_s16 + $0x138] sm:$0xf0]  ;;  %v6159_v6 = vld [vmem:[%s7146_s16 + $0x22c] sm:$0xf] }
  0xb6   : > { %1547 = vmatpush.bf16.msra.mxu0 %v4251_v34  ;;  %v4303_v34 = vor.u32 %v6107_v25, %v4300_v26  ;;  %v4508_v7 = vld [vmem:[%s7146_s16 + $0x238] sm:$0xf0]  ;;  %v6191_v8 = vld [vmem:[%s7146_s16 + $0x32c] sm:$0xf]  ;;  %v4858_v25 = vld [vmem:[%s7156_s17 + $0xf0] sm:$0xf] }
  0xb7   : > { %1560 = vmatpush.bf16.msra.mxu1 %v4379_v37  ;;  %v6103_v37 = vld [vmem:[%s7146_s16 + $0x6c] sm:$0xf]  ;;  %v4636_v9 = vld [vmem:[%s7146_s16 + $0x338] sm:$0xf0]  ;;  %v4511_v13 = vor.u32 %v6159_v6, %v4508_v7  ;;  %v6249_v26 = vld [vmem:[%s7156_s17 + $0xf4] sm:$0xf0] }
  0xb8   : > { %1573 = vmatpush.bf16.msra.mxu2 %v4507_v38  ;;  %v4284_v38 = vld [vmem:[%s7146_s16 + $0x78] sm:$0xf0]  ;;  %v6123_v15 = vld [vmem:[%s7146_s16 + $0x10c] sm:$0xf]  ;;  %v4639_v17 = vor.u32 %v6191_v8, %v4636_v9  ;;  %v4859_v33 = vor.u32 %v6249_v26, %v4858_v25  ;;  %v6265_v6 = vld [vmem:[%s7156_s17 + $0x174] sm:$0xf0] }
  0xb9   : > { %1586 = vmatpush.bf16.msra.mxu3 %v4635_v42  ;;  %v6167_v42 = vld [vmem:[%s7146_s16 + $0x26c] sm:$0xf]  ;;  %v4287_v46 = vor.u32 %v6103_v37, %v4284_v38  ;;  %v4236_v14 = vld [vmem:[%s7146_s16 + $0x18] sm:$0xf0]  ;;  %v4778_v37 = vld [vmem:[%s7156_s17 + $0x50] sm:$0xf] }
  0xba   : > { %1548 = vmatpush.bf16.msra.mxu0 %v4235_v49  ;;  %v4543_v48 = vor.u32 %v6167_v42, %v4540_v43  ;;  %v6099_v49 = vld [vmem:[%s7146_s16 + $0x4c] sm:$0xf]  ;;  %v4492_v19 = vld [vmem:[%s7146_s16 + $0x218] sm:$0xf0]  ;;  %v6229_v38 = vld [vmem:[%s7156_s17 + $0x54] sm:$0xf0] }
  0xbb   : > { %1561 = vmatpush.bf16.msra.mxu1 %v4363_v53  ;;  %v4396_v53 = vld [vmem:[%s7146_s16 + $0x158] sm:$0xf0]  ;;  %v6155_v18 = vld [vmem:[%s7146_s16 + $0x20c] sm:$0xf]  ;;  %v6227_v42 = vld [vmem:[%s7156_s17 + $0x44] sm:$0xf0] }
  0xbc   : > { %1574 = vmatpush.bf16.msra.mxu2 %v4491_v54  ;;  %v6163_v54 = vld [vmem:[%s7146_s16 + $0x24c] sm:$0xf]  ;;  %v4620_v21 = vld [vmem:[%s7146_s16 + $0x318] sm:$0xf0]  ;;  %v4762_v43 = vld [vmem:[%s7156_s17 + $0x30] sm:$0xf] }
  0xbd   : > { %1587 = vmatpush.bf16.msra.mxu3 %v4619_v58  ;;  %1549 = vmatmul.bf16.vlgmr.msra.gmra.mxu0 %v7263_v59  ;;  %v4652_v58 = vld [vmem:[%s7146_s16 + $0x358] sm:$0xf0]  ;;  %v6187_v20 = vld [vmem:[%s7146_s16 + $0x30c] sm:$0xf]  ;;  %v4772_v26 = vld [vmem:[%s7156_s17 + $0x48] sm:$0xf0] }
  0xbe   : > { %1593 = vmatpush.bf16.msrb.mxu0 %v4351_v61  ;;  %1562 = vmatmul.bf16.vlgmr.msra.gmra.mxu1 %v7267_v62  ;;  %v4271_v61 = vor.u32 %v6099_v49, %v4268_v50  ;;  %v4623_v29 = vor.u32 %v6187_v20, %v4620_v21  ;;  %v4746_v49 = vld [vmem:[%s7156_s17 + $0x10] sm:$0xf]  ;;  %v6221_v50 = vld [vmem:[%s7156_s17 + $0x14] sm:$0xf0]  ;;  %v6230_v8 = vld [vmem:[%s7156_s17 + $0x64] sm:$0xf] }
  0xbf   : > { %1606 = vmatpush.bf16.msrb.mxu1 %v4479_v63  ;;  %1575 = vmatmul.bf16.vlgmr.msra.gmra.mxu2 %v7259_v56  ;;  %v4399_v63 = vor.u32 %v6131_v51, %v4396_v53  ;;  %v4834_v51 = vld [vmem:[%s7156_s17 + $0xc0] sm:$0xf]  ;;  %v6248_v20 = vld [vmem:[%s7156_s17 + $0xf4] sm:$0xf]  ;;  %v4860_v21 = vld [vmem:[%s7156_s17 + $0xf8] sm:$0xf0] }
  0xc0   : > { %1619 = vmatpush.bf16.msrb.mxu2 %v4607_v0  ;;  %1588 = vmatmul.bf16.vlgmr.msra.gmra.mxu3 %v7265_v60  ;;  %v4527_v0 = vor.u32 %v6163_v54, %v4524_v55  ;;  %v4826_v54 = vld [vmem:[%s7156_s17 + $0xb0] sm:$0xf]  ;;  %v6241_v55 = vld [vmem:[%s7156_s17 + $0xb4] sm:$0xf0]  ;;  %v6226_v25 = vld [vmem:[%s7156_s17 + $0x44] sm:$0xf] }
  0xc1   : > { %1632 = vmatpush.bf16.msrb.mxu3 %v4735_v4  ;;  %v4655_v4 = vor.u32 %v6195_v57, %v4652_v58  ;;  %v4747_v57 = vor.u32 %v6221_v50, %v4746_v49  ;;  %v4738_v58 = vld [vmem:[%s7156_s17] sm:$0xf] }
  0xc2   : > { %1594 = vmatpush.bf16.msrb.mxu0 %v4335_v10  ;;  %v4255_v10 = vor.u32 %v6095_v1, %v4252_v2  ;;  %v4796_v1 = vld [vmem:[%s7156_s17 + $0x78] sm:$0xf0]  ;;  %v4818_v2 = vld [vmem:[%s7156_s17 + $0xa0] sm:$0xf] }
  0xc3   : > { %1607 = vmatpush.bf16.msrb.mxu1 %v4463_v11  ;;  %v6091_v11 = vld [vmem:[%s7146_s16 + $0xc] sm:$0xf] }
  0xc4   : > { %1620 = vmatpush.bf16.msrb.mxu2 %v4591_v12  ;;  %v4383_v12 = vor.u32 %v6127_v3, %v4380_v5  ;;  %v6239_v3 = vld [vmem:[%s7156_s17 + $0xa4] sm:$0xf0]  ;;  %v4922_v5 = vld [vmem:[%s7156_s17 + $0x170] sm:$0xf] }
  0xc5   : > { %1633 = vmatpush.bf16.msrb.mxu3 %v4719_v16  ;;  %v4364_v16 = vld [vmem:[%s7146_s16 + $0x118] sm:$0xf0]  ;;  %v4819_v9 = vor.u32 %v6239_v3, %v4818_v2  ;;  %v6218_v3 = vld [vmem:[%s7156_s17 + $0x4] sm:$0xf] }
  0xc6   : > { %1595 = vmatpush.bf16.msrb.mxu0 %v4319_v22  ;;  %v4794_v22 = vld [vmem:[%s7156_s17 + $0x70] sm:$0xf]  ;;  %v4367_v27 = vor.u32 %v6123_v15, %v4364_v16  ;;  %v6228_v15 = vld [vmem:[%s7156_s17 + $0x54] sm:$0xf] }
  0xc7   : > { %1608 = vmatpush.bf16.msrb.mxu1 %v4447_v23  ;;  %v6233_v23 = vld [vmem:[%s7156_s17 + $0x74] sm:$0xf0] }
  0xc8   : > { %1621 = vmatpush.bf16.msrb.mxu2 %v4575_v24  ;;  %v4239_v24 = vor.u32 %v6091_v11, %v4236_v14  ;;  %v4795_v30 = vor.u32 %v6233_v23, %v4794_v22  ;;  %v4788_v11 = vld [vmem:[%s7156_s17 + $0x68] sm:$0xf0]  ;;  %v7504_v22 = vld [vmem:[%s7154_s0] sm:$0xf] }
  0xc9   : > { %1634 = vmatpush.bf16.msrb.mxu3 %v4703_v28  ;;  %v4495_v28 = vor.u32 %v6155_v18, %v4492_v19  ;;  %v4791_v14 = vor.u32 %v6230_v8, %v4788_v11  ;;  %v4802_v18 = vld [vmem:[%s7156_s17 + $0x80] sm:$0xf]  ;;  %v6235_v19 = vld [vmem:[%s7156_s17 + $0x84] sm:$0xf0]  ;;  %v6257_v8 = vld [vmem:[%s7156_s17 + $0x134] sm:$0xf0] }
  0xca   : > { %1596 = vmatpush.bf16.msrb.mxu0 %v4303_v34  ;;  %v4850_v34 = vld [vmem:[%s7156_s17 + $0xe0] sm:$0xf] }
  0xcb   : > { %1609 = vmatpush.bf16.msrb.mxu1 %v4431_v35  ;;  %v6247_v35 = vld [vmem:[%s7156_s17 + $0xe4] sm:$0xf0] }
  0xcc   : > { %1622 = vmatpush.bf16.msrb.mxu2 %v4559_v36  ;;  %v4787_v36 = vor.u32 %v6231_v32, %v4786_v31  ;;  %v4851_v39 = vor.u32 %v6247_v35, %v4850_v34  ;;  %v6224_v31 = vld [vmem:[%s7156_s17 + $0x34] sm:$0xf]  ;;  %v4764_v32 = vld [vmem:[%s7156_s17 + $0x38] sm:$0xf0]  ;;  %v4914_v35 = vld [vmem:[%s7156_s17 + $0x160] sm:$0xf] }
  0xcd   : > { %1635 = vmatpush.bf16.msrb.mxu3 %v4687_v40  ;;  %v4779_v40 = vor.u32 %v6229_v38, %v4778_v37  ;;  %v6246_v37 = vld [vmem:[%s7156_s17 + $0xe4] sm:$0xf] }
  0xce   : > { %1597 = vmatpush.bf16.msrb.mxu0 %v4287_v46  ;;  %v4754_v46 = vld [vmem:[%s7156_s17 + $0x20] sm:$0xf] }
  0xcf   : > { %1610 = vmatpush.bf16.msrb.mxu1 %v4415_v47  ;;  %v6223_v47 = vld [vmem:[%s7156_s17 + $0x24] sm:$0xf0] }
  0xd0   : > { %1623 = vmatpush.bf16.msrb.mxu2 %v4543_v48  ;;  %v4755_v48 = vor.u32 %v6223_v47, %v4754_v46 }
  0xd1   : > { %1636 = vmatpush.bf16.msrb.mxu3 %v4671_v52  ;;  %v6243_v52 = vld [vmem:[%s7156_s17 + $0xc4] sm:$0xf0] }
  0xd2   : > { %1598 = vmatpush.bf16.msrb.mxu0 %v4271_v61  ;;  %v4835_v53 = vor.u32 %v6243_v52, %v4834_v51  ;;  %v6219_v61 = vld [vmem:[%s7156_s17 + $0x4] sm:$0xf0] }
  0xd3   : > { %1611 = vmatpush.bf16.msrb.mxu1 %v4399_v63  ;;  %v6232_v63 = vld [vmem:[%s7156_s17 + $0x74] sm:$0xf] }
  0xd4   : > { %1624 = vmatpush.bf16.msrb.mxu2 %v4527_v0  ;;  %v4827_v0 = vor.u32 %v6241_v55, %v4826_v54  ;;  %v4799_v7 = vor.u32 %v6232_v63, %v4796_v1  ;;  %v4748_v54 = vld [vmem:[%s7156_s17 + $0x18] sm:$0xf0]  ;;  %v4836_v1 = vld [vmem:[%s7156_s17 + $0xc8] sm:$0xf0] }
  0xd5   : > { %1637 = vmatpush.bf16.msrb.mxu3 %v4655_v4  ;;  %v4739_v4 = vor.u32 %v6219_v61, %v4738_v58  ;;  %v6259_v58 = vld [vmem:[%s7156_s17 + $0x144] sm:$0xf0]  ;;  %v6242_v61 = vld [vmem:[%s7156_s17 + $0xc4] sm:$0xf] }
  0xd6   : > { %1599 = vmatpush.bf16.msrb.mxu0 %v4255_v10  ;;  %v4923_v10 = vor.u32 %v6265_v6, %v4922_v5  ;;  %v4839_v5 = vor.u32 %v6242_v61, %v4836_v1  ;;  %v6258_v1 = vld [vmem:[%s7156_s17 + $0x144] sm:$0xf] }
  0xd7   : > { %1612 = vmatpush.bf16.msrb.mxu1 %v4383_v12  ;;  %v4810_v12 = vld [vmem:[%s7156_s17 + $0x90] sm:$0xf] }
  0xd8   : > { %1625 = vmatpush.bf16.msrb.mxu2 %v4511_v13  ;;  %v6237_v13 = vld [vmem:[%s7156_s17 + $0x94] sm:$0xf0] }
  0xd9   : > { %1638 = vmatpush.bf16.msrb.mxu3 %v4639_v17  ;;  %v4811_v16 = vor.u32 %v6237_v13, %v4810_v12  ;;  %v4780_v17 = vld [vmem:[%s7156_s17 + $0x58] sm:$0xf0]  ;;  %v4882_v13 = vld [vmem:[%s7156_s17 + $0x120] sm:$0xf] }
  0xda   : > { %1600 = vmatpush.bf16.msrb.mxu0 %v4239_v24  ;;  %v4783_v23 = vor.u32 %v6228_v15, %v4780_v17  ;;  %v4803_v24 = vor.u32 %v6235_v19, %v4802_v18  ;;  %v4828_v12 = vld [vmem:[%s7156_s17 + $0xb8] sm:$0xf0]  ;;  %v6238_v17 = vld [vmem:[%s7156_s17 + $0xa4] sm:$0xf]  ;;  %v4820_v18 = vld [vmem:[%s7156_s17 + $0xa8] sm:$0xf0] }
  0xdb   : > { %1613 = vmatpush.bf16.msrb.mxu1 %v4367_v27  ;;  %v4863_v27 = vor.u32 %v6248_v20, %v4860_v21  ;;  %v4874_v21 = vld [vmem:[%s7156_s17 + $0x110] sm:$0xf] }
  0xdc   : > { %1626 = vmatpush.bf16.msrb.mxu2 %v4495_v28  ;;  %v775_v28 = vperm.slane %v7504_v22, 0 }
  0xdd   : > { %1639 = vmatpush.bf16.msrb.mxu3 %v4623_v29  ;;  %1601 = vmatmul.bf16.vlgmr.msrb.gmra.mxu0 %v7263_v59  ;;  %v4771_v59 = vor.u32 %v6227_v42, %v4770_v41  ;;  %v4775_v29 = vor.u32 %v6226_v25, %v4772_v26  ;;  %v4767_v41 = vor.u32 %v6224_v31, %v4764_v32  ;;  %v4986_v25 = vld [vmem:[%s7156_s17 + $0x1f0] sm:$0xf]  ;;  %v6281_v26 = vld [vmem:[%s7156_s17 + $0x1f4] sm:$0xf0]  ;;  %v4866_v32 = vld [vmem:[%s7156_s17 + $0x100] sm:$0xf] }
  0xde   : > { %2043 = vmatpush.bf16.msra.mxu0 %v4795_v30  ;;  %1614 = vmatmul.bf16.vlgmr.msrb.gmra.mxu1 %v7267_v62  ;;  %v4842_v62 = vld [vmem:[%s7156_s17 + $0xd0] sm:$0xf] }
  0xdf   : > { %2056 = vmatpush.bf16.msra.mxu1 %v4859_v33  ;;  %1627 = vmatmul.bf16.vlgmr.msrb.gmra.mxu2 %v7259_v56  ;;  %v6245_v56 = vld [vmem:[%s7156_s17 + $0xd4] sm:$0xf0] }
  0xe0   : > { %1640 = vmatmul.bf16.vlgmr.msrb.gmra.mxu3 %v7265_v60  ;;  %v4843_v45 = vor.u32 %v6245_v56, %v4842_v62  ;;  %v4763_v60 = vor.u32 %v6225_v44, %v4762_v43  ;;  %2069 = vmatpush.bf16.msra.mxu2 %v4923_v10  ;;  %v4756_v43 = vld [vmem:[%s7156_s17 + $0x28] sm:$0xf0]  ;;  %v4906_v62 = vld [vmem:[%s7156_s17 + $0x150] sm:$0xf]  ;;  %v6261_v56 = vld [vmem:[%s7156_s17 + $0x154] sm:$0xf0] }
  0xe1   : > { %v4907_v47 = vor.u32 %v6261_v56, %v4906_v62 }
  0xe2   : > { %2044 = vmatpush.bf16.msra.mxu0 %v4787_v36  ;;  %v6263_v36 = vld [vmem:[%s7156_s17 + $0x164] sm:$0xf0] }
  0xe3   : > { %2057 = vmatpush.bf16.msra.mxu1 %v4851_v39  ;;  %v4915_v38 = vor.u32 %v6263_v36, %v4914_v35  ;;  %v4852_v39 = vld [vmem:[%s7156_s17 + $0xe8] sm:$0xf0]  ;;  %v6264_v36 = vld [vmem:[%s7156_s17 + $0x174] sm:$0xf] }
  0xe4   : > { %v4855_v42 = vor.u32 %v6246_v37, %v4852_v39  ;;  %v4804_v35 = vld [vmem:[%s7156_s17 + $0x88] sm:$0xf0]  ;;  %v4924_v37 = vld [vmem:[%s7156_s17 + $0x178] sm:$0xf0] }
  0xe5   : > { %2070 = vmatpush.bf16.msra.mxu2 %v4915_v38 }
  0xe6   : > { %2045 = vmatpush.bf16.msra.mxu0 %v4779_v40 }
  0xe7   : > { %2058 = vmatpush.bf16.msra.mxu1 %v4843_v45  ;;  %v6244_v45 = vld [vmem:[%s7156_s17 + $0xd4] sm:$0xf] }
  0xe9   : > { %2071 = vmatpush.bf16.msra.mxu2 %v4907_v47 }
  0xea   : > { %2046 = vmatpush.bf16.msra.mxu0 %v4771_v59  ;;  %v6222_v59 = vld [vmem:[%s7156_s17 + $0x24] sm:$0xf] }
  0xeb   : > { %2059 = vmatpush.bf16.msra.mxu1 %v4835_v53  ;;  %v4759_v49 = vor.u32 %v6222_v59, %v4756_v43  ;;  %v6220_v53 = vld [vmem:[%s7156_s17 + $0x14] sm:$0xf]  ;;  %v4978_v59 = vld [vmem:[%s7156_s17 + $0x1e0] sm:$0xf]  ;;  %v6279_v43 = vld [vmem:[%s7156_s17 + $0x1e4] sm:$0xf0] }
  0xec   : > { %v4751_v2 = vor.u32 %v6220_v53, %v4748_v54  ;;  %v4908_v53 = vld [vmem:[%s7156_s17 + $0x158] sm:$0xf0] }
  0xee   : > { %2047 = vmatpush.bf16.msra.mxu0 %v4763_v60 }
  0xef   : > { %2060 = vmatpush.bf16.msra.mxu1 %v4827_v0 }
  0xf2   : > { %2048 = vmatpush.bf16.msra.mxu0 %v4755_v48  ;;  %v4844_v48 = vld [vmem:[%s7156_s17 + $0xd8] sm:$0xf0] }
  0xf3   : > { %2061 = vmatpush.bf16.msra.mxu1 %v4819_v9  ;;  %v4847_v50 = vor.u32 %v6244_v45, %v4844_v48  ;;  %v6240_v9 = vld [vmem:[%s7156_s17 + $0xb4] sm:$0xf]  ;;  %v4979_v45 = vor.u32 %v6279_v43, %v4978_v59  ;;  %v4970_v48 = vld [vmem:[%s7156_s17 + $0x1d0] sm:$0xf] }
  0xf6   : > { %2049 = vmatpush.bf16.msra.mxu0 %v4747_v57  ;;  %v4898_v57 = vld [vmem:[%s7156_s17 + $0x140] sm:$0xf] }
  0xf7   : > { %2062 = vmatpush.bf16.msra.mxu1 %v4811_v16  ;;  %v4899_v0 = vor.u32 %v6259_v58, %v4898_v57  ;;  %v4831_v16 = vor.u32 %v6240_v9, %v4828_v12  ;;  %v6273_v9 = vld [vmem:[%s7156_s17 + $0x1b4] sm:$0xf0] }
  0xf9   : > { %2072 = vmatpush.bf16.msra.mxu2 %v4899_v0  ;;  %v6275_v0 = vld [vmem:[%s7156_s17 + $0x1c4] sm:$0xf0] }
  0xfa   : > { %2050 = vmatpush.bf16.msra.mxu0 %v4739_v4  ;;  %v4740_v4 = vld [vmem:[%s7156_s17 + $0x8] sm:$0xf0] }
  0xfb   : > { %2063 = vmatpush.bf16.msra.mxu1 %v4803_v24  ;;  %v4743_v19 = vor.u32 %v6218_v3, %v4740_v4  ;;  %v6253_v24 = vld [vmem:[%s7156_s17 + $0x114] sm:$0xf0]  ;;  %v4900_v4 = vld [vmem:[%s7156_s17 + $0x148] sm:$0xf0] }
  0xfd   : > { %v1446_v30 = vpop.f32.mrf.mxu0 }
  0xfe   : > { %2095 = vmatpush.bf16.msrb.mxu0 %v4799_v7  ;;  %v1447_v33 = vadd.f32 %v1446_v30, %v775_v28  ;;  %v1459_v34 = vpop.f32.mrf.mxu1  ;;  %v4890_v7 = vld [vmem:[%s7156_s17 + $0x130] sm:$0xf]  ;;  %v4812_v28 = vld [vmem:[%s7156_s17 + $0x98] sm:$0xf0]  ;;  %v4875_v30 = vor.u32 %v6253_v24, %v4874_v21  ;;  %v6269_v24 = vld [vmem:[%s7156_s17 + $0x194] sm:$0xf0] }
  0xff   : > { %2108 = vmatpush.bf16.msrb.mxu1 %v4863_v27  ;;  %v4891_v11 = vor.u32 %v6257_v8, %v4890_v7  ;;  %v6236_v27 = vld [vmem:[%s7156_s17 + $0x94] sm:$0xf]  ;;  %v4954_v8 = vld [vmem:[%s7156_s17 + $0x1b0] sm:$0xf] }
 0x100   : > { %v1460_v40 = vadd.f32 %v1459_v34, %v1447_v33  ;;  %v4815_v31 = vor.u32 %v6236_v27, %v4812_v28  ;;  %v6251_v33 = vld [vmem:[%s7156_s17 + $0x104] sm:$0xf0]  ;;  %v6234_v34 = vld [vmem:[%s7156_s17 + $0x84] sm:$0xf]  ;;  %v4955_v12 = vor.u32 %v6273_v9, %v4954_v8  ;;  %v4932_v8 = vld [vmem:[%s7156_s17 + $0x188] sm:$0xf0] }
 0x101   : > { %2073 = vmatpush.bf16.msra.mxu2 %v4891_v11  ;;  %v4867_v38 = vor.u32 %v6251_v33, %v4866_v32  ;;  %v4807_v39 = vor.u32 %v6234_v34, %v4804_v35  ;;  %v4868_v32 = vld [vmem:[%s7156_s17 + $0x108] sm:$0xf0]  ;;  %v6280_v35 = vld [vmem:[%s7156_s17 + $0x1f4] sm:$0xf] }
 0x102   : > { %2096 = vmatpush.bf16.msrb.mxu0 %v4791_v14  ;;  %v1472_v44 = vpop.f32.mrf.mxu2  ;;  %v6255_v14 = vld [vmem:[%s7156_s17 + $0x124] sm:$0xf0] }
 0x103   : > { %2109 = vmatpush.bf16.msrb.mxu1 %v4855_v42  ;;  %v1473_v60 = vadd.f32 %v1472_v44, %v1460_v40  ;;  %v4883_v20 = vor.u32 %v6255_v14, %v4882_v13  ;;  %v4927_v40 = vor.u32 %v6264_v36, %v4924_v37  ;;  %v6262_v44 = vld [vmem:[%s7156_s17 + $0x164] sm:$0xf]  ;;  %v4892_v13 = vld [vmem:[%s7156_s17 + $0x138] sm:$0xf0]  ;;  %v4946_v14 = vld [vmem:[%s7156_s17 + $0x1a0] sm:$0xf] }
 0x104   : > { %v4988_v36 = vld [vmem:[%s7156_s17 + $0x1f8] sm:$0xf0] }
 0x105   : > { %v1485_v46 = vpop.f32.mrf.mxu3  ;;  %v1448_v52 = vpop.f32.mrf.mxu0  ;;  %2074 = vmatpush.bf16.msra.mxu2 %v4883_v20  ;;  %v4991_v37 = vor.u32 %v6280_v35, %v4988_v36 }
 0x106   : > { %2097 = vmatpush.bf16.msrb.mxu0 %v4783_v23  ;;  %v1486_v51 = vadd.f32 %v1485_v46, %v1473_v60  ;;  %v1461_v55 = vpop.f32.mrf.mxu1  ;;  %v4823_v23 = vor.u32 %v6238_v17, %v4820_v18  ;;  %v4916_v60 = vld [vmem:[%s7156_s17 + $0x168] sm:$0xf0]  ;;  %v6254_v18 = vld [vmem:[%s7156_s17 + $0x124] sm:$0xf] }
 0x107   : > { %2110 = vmatpush.bf16.msrb.mxu1 %v4847_v50  ;;  %v4919_v46 = vor.u32 %v6262_v44, %v4916_v60  ;;  %v6260_v50 = vld [vmem:[%s7156_s17 + $0x154] sm:$0xf] }
 0x108   : > { %v1645_v63 = vmax.f32 %v1486_v51, 0.0  ;;  %v4911_v57 = vor.u32 %v6260_v50, %v4908_v53 }
 0x109   : > { %2075 = vmatpush.bf16.msra.mxu2 %v4875_v30  ;;  %v6267_v30 = vld [vmem:[%s7156_s17 + $0x184] sm:$0xf0] }
 0x10a   : > { %2098 = vmatpush.bf16.msrb.mxu0 %v4775_v29  ;;  %v1649_v6 = vpack.c.bf16 %v1645_v63, %v1645_v63  ;;  %v1474_v10 = vpop.f32.mrf.mxu2  ;;  %v4987_v29 = vor.u32 %v6281_v26, %v4986_v25  ;;  %v4962_v63 = vld [vmem:[%s7156_s17 + $0x1c0] sm:$0xf]  ;;  %v6252_v25 = vld [vmem:[%s7156_s17 + $0x114] sm:$0xf]  ;;  %v4876_v26 = vld [vmem:[%s7156_s17 + $0x118] sm:$0xf0] }
 0x10b   : > { %2111 = vmatpush.bf16.msrb.mxu1 %v4839_v5  ;;  %v4963_v3 = vor.u32 %v6275_v0, %v4962_v63  ;;  %v6256_v10 = vld [vmem:[%s7156_s17 + $0x134] sm:$0xf]  ;;  %v4879_v28 = vor.u32 %v6252_v25, %v4876_v26  ;;  %v6270_v63 = vld [vmem:[%s7156_s17 + $0x1a4] sm:$0xf]  ;;  %v4948_v0 = vld [vmem:[%s7156_s17 + $0x1a8] sm:$0xf0] }
 0x10c   : > { %2051 = vmatmul.bf16.vlgmr.msra.gmra.mxu0 %v1649_v6  ;;  %2082 = vmatpush.bf16.msra.mxu3 %v4987_v29  ;;  %v4895_v17 = vor.u32 %v6256_v10, %v4892_v13  ;;  %v4930_v29 = vld [vmem:[%s7156_s17 + $0x180] sm:$0xf]  ;;  %v778_v10 = vperm.slane %v7504_v22, 3 }
 0x10d   : > { %v1487_v15 = vpop.f32.mrf.mxu3  ;;  %2076 = vmatpush.bf16.msra.mxu2 %v4867_v38  ;;  %v4931_v33 = vor.u32 %v6267_v30, %v4930_v29  ;;  %v777_v38 = vperm.slane %v7504_v22, 2  ;;  %v5050_v30 = vld [vmem:[%s7166_s25 + $0x70] sm:$0xf] }
 0x10e   : > { %2099 = vmatpush.bf16.msrb.mxu0 %v4767_v41  ;;  %v776_v41 = vperm.slane %v7504_v22, 1  ;;  %v6271_v15 = vld [vmem:[%s7156_s17 + $0x1a4] sm:$0xf0] }
 0x10f   : > { %2112 = vmatpush.bf16.msrb.mxu1 %v4831_v16  ;;  %v4947_v20 = vor.u32 %v6271_v15, %v4946_v14 }
 0x110   : > { %2083 = vmatpush.bf16.msra.mxu3 %v4979_v45 }
 0x111   : > { %2121 = vmatpush.bf16.msrb.mxu2 %v4927_v40  ;;  %v4980_v40 = vld [vmem:[%s7156_s17 + $0x1e8] sm:$0xf0] }
 0x112   : > { %2100 = vmatpush.bf16.msrb.mxu0 %v4759_v49  ;;  %v6277_v49 = vld [vmem:[%s7156_s17 + $0x1d4] sm:$0xf0] }
 0x113   : > { %2113 = vmatpush.bf16.msrb.mxu1 %v4823_v23  ;;  %v4971_v52 = vor.u32 %v6277_v49, %v4970_v48  ;;  %v4938_v23 = vld [vmem:[%s7156_s17 + $0x190] sm:$0xf]  ;;  %v6274_v48 = vld [vmem:[%s7156_s17 + $0x1c4] sm:$0xf]  ;;  %v4964_v49 = vld [vmem:[%s7156_s17 + $0x1c8] sm:$0xf0] }
 0x114   : > { %v4939_v27 = vor.u32 %v6269_v24, %v4938_v23 }
 0x115   : > { %2122 = vmatpush.bf16.msrb.mxu2 %v4919_v46  ;;  %2084 = vmatpush.bf16.msra.mxu3 %v4971_v52  ;;  %v4967_v52 = vor.u32 %v6274_v48, %v4964_v49  ;;  %v6290_v48 = vld [vmem:[%s7166_s25 + $0x44] sm:$0xf] }
 0x116   : > { %2101 = vmatpush.bf16.msrb.mxu0 %v4751_v2 }
 0x117   : > { %2114 = vmatpush.bf16.msrb.mxu1 %v4815_v31  ;;  %v6250_v31 = vld [vmem:[%s7156_s17 + $0x104] sm:$0xf] }
 0x118   : > { %v4871_v34 = vor.u32 %v6250_v31, %v4868_v32  ;;  %v6297_v31 = vld [vmem:[%s7166_s25 + $0x74] sm:$0xf0]  ;;  %v6296_v32 = vld [vmem:[%s7166_s25 + $0x74] sm:$0xf] }
 0x119   : > { %2123 = vmatpush.bf16.msrb.mxu2 %v4911_v57  ;;  %2085 = vmatpush.bf16.msra.mxu3 %v4963_v3  ;;  %v4956_v57 = vld [vmem:[%s7156_s17 + $0x1b8] sm:$0xf0]  ;;  %v4951_v3 = vor.u32 %v6270_v63, %v4948_v0  ;;  %v5020_v63 = vld [vmem:[%s7166_s25 + $0x38] sm:$0xf0]  ;;  %v6312_v0 = vld [vmem:[%s7166_s25 + $0xf4] sm:$0xf] }
 0x11a   : > { %2102 = vmatpush.bf16.msrb.mxu0 %v4743_v19  ;;  %v1498_v42 = vpop.f32.mrf.mxu0  ;;  %v4884_v19 = vld [vmem:[%s7156_s17 + $0x128] sm:$0xf0] }
 0x11b   : > { %2115 = vmatpush.bf16.msrb.mxu1 %v4807_v39  ;;  %v1499_v62 = vadd.f32 %v1498_v42, %v776_v41  ;;  %v1511_v56 = vpop.f32.mrf.mxu1  ;;  %v4887_v21 = vor.u32 %v6254_v18, %v4884_v19  ;;  %v6278_v39 = vld [vmem:[%s7156_s17 + $0x1e4] sm:$0xf] }
 0x11c   : > { %v4983_v42 = vor.u32 %v6278_v39, %v4980_v40  ;;  %v6294_v39 = vld [vmem:[%s7166_s25 + $0x64] sm:$0xf] }
 0x11d   : > { %2103 = vmatmul.bf16.vlgmr.msrb.gmra.mxu0 %v1649_v6  ;;  %v1512_v47 = vadd.f32 %v1511_v56, %v1499_v62  ;;  %v4903_v6 = vor.u32 %v6258_v1, %v4900_v4  ;;  %2086 = vmatpush.bf16.msra.mxu3 %v4955_v12  ;;  %v6276_v62 = vld [vmem:[%s7156_s17 + $0x1d4] sm:$0xf]  ;;  %v4972_v56 = vld [vmem:[%s7156_s17 + $0x1d8] sm:$0xf0] }
 0x11e   : > { %v4975_v45 = vor.u32 %v6276_v62, %v4972_v56  ;;  %v6268_v4 = vld [vmem:[%s7156_s17 + $0x194] sm:$0xf]  ;;  %v5036_v62 = vld [vmem:[%s7166_s25 + $0x58] sm:$0xf0] }
 0x11f   : > { %2124 = vmatpush.bf16.msrb.mxu2 %v4903_v6 }
 0x121   : > { %2087 = vmatpush.bf16.msra.mxu3 %v4947_v20 }
 0x122   : > { %v1524_v51 = vpop.f32.mrf.mxu2  ;;  %v1500_v61 = vpop.f32.mrf.mxu0 }
 0x123   : > { %v1525_v54 = vadd.f32 %v1524_v51, %v1512_v47  ;;  %v1537_v55 = vpop.f32.mrf.mxu3  ;;  %v1513_v2 = vpop.f32.mrf.mxu1  ;;  %2125 = vmatpush.bf16.msrb.mxu2 %v4895_v17 }
 0x125   : > { %v1538_v58 = vadd.f32 %v1537_v55, %v1525_v54  ;;  %2088 = vmatpush.bf16.msra.mxu3 %v4939_v27  ;;  %v6272_v55 = vld [vmem:[%s7156_s17 + $0x1b4] sm:$0xf] }
 0x126   : > { %v4959_v61 = vor.u32 %v6272_v55, %v4956_v57  ;;  %v6313_v55 = vld [vmem:[%s7166_s25 + $0xf4] sm:$0xf0]  ;;  %v6288_v57 = vld [vmem:[%s7166_s25 + $0x34] sm:$0xf] }
 0x127   : > { %v1646_v5 = vmax.f32 %v1538_v58, 0.0  ;;  %2126 = vmatpush.bf16.msrb.mxu2 %v4887_v21 }
 0x129   : > { %v1650_v7 = vpack.c.bf16 %v1646_v5, %v1646_v5  ;;  %2089 = vmatpush.bf16.msra.mxu3 %v4931_v33  ;;  %v4940_v5 = vld [vmem:[%s7156_s17 + $0x198] sm:$0xf0]  ;;  %v5051_v33 = vor.u32 %v6297_v31, %v5050_v30  ;;  %v5100_v30 = vld [vmem:[%s7166_s25 + $0xd8] sm:$0xf0] }
 0x12a   : > { %v1526_v11 = vpop.f32.mrf.mxu2  ;;  %v4943_v6 = vor.u32 %v6268_v4, %v4940_v5  ;;  %v5010_v5 = vld [vmem:[%s7166_s25 + $0x20] sm:$0xf] }
 0x12b   : > { %2064 = vmatmul.bf16.vlgmr.msra.gmra.mxu1 %v1650_v7  ;;  %v1539_v16 = vpop.f32.mrf.mxu3  ;;  %2127 = vmatpush.bf16.msrb.mxu2 %v4879_v28 }
 0x12c   : > { %2349 = vmatpush.bf16.msra.mxu0 %v5051_v33  ;;  %v4994_v33 = vld [vmem:[%s7166_s25] sm:$0xf] }
 0x12d   : > { %2134 = vmatpush.bf16.msrb.mxu3 %v4991_v37  ;;  %v5042_v37 = vld [vmem:[%s7166_s25 + $0x60] sm:$0xf] }
 0x12f   : > { %2128 = vmatpush.bf16.msrb.mxu2 %v4871_v34  ;;  %v5052_v34 = vld [vmem:[%s7166_s25 + $0x78] sm:$0xf0] }
 0x130   : > { %v5055_v35 = vor.u32 %v6296_v32, %v5052_v34  ;;  %v6283_v34 = vld [vmem:[%s7166_s25 + $0x4] sm:$0xf0] }
 0x131   : > { %2135 = vmatpush.bf16.msrb.mxu3 %v4983_v42  ;;  %v5034_v42 = vld [vmem:[%s7166_s25 + $0x50] sm:$0xf] }
 0x135   : > { %2136 = vmatpush.bf16.msrb.mxu3 %v4975_v45 }
 0x139   : > { %2137 = vmatpush.bf16.msrb.mxu3 %v4967_v52  ;;  %v6289_v52 = vld [vmem:[%s7166_s25 + $0x34] sm:$0xf0] }
 0x13a   : > { %v1550_v41 = vpop.f32.mrf.mxu0 }
 0x13b   : > { %2116 = vmatmul.bf16.vlgmr.msrb.gmra.mxu1 %v1650_v7  ;;  %v1551_v59 = vadd.f32 %v1550_v41, %v777_v38  ;;  %v1563_v43 = vpop.f32.mrf.mxu1  ;;  %v6266_v7 = vld [vmem:[%s7156_s17 + $0x184] sm:$0xf]  ;;  %v6295_v38 = vld [vmem:[%s7166_s25 + $0x64] sm:$0xf0]  ;;  %v5044_v41 = vld [vmem:[%s7166_s25 + $0x68] sm:$0xf0] }
 0x13c   : > { %v4935_v9 = vor.u32 %v6266_v7, %v4932_v8  ;;  %v5043_v40 = vor.u32 %v6295_v38, %v5042_v37  ;;  %v5106_v7 = vld [vmem:[%s7166_s25 + $0xe0] sm:$0xf]  ;;  %v6307_v37 = vld [vmem:[%s7166_s25 + $0xc4] sm:$0xf0]  ;;  %v6282_v38 = vld [vmem:[%s7166_s25 + $0x4] sm:$0xf] }
 0x13d   : > { %v1564_v44 = vadd.f32 %v1563_v43, %v1551_v59  ;;  %2138 = vmatpush.bf16.msrb.mxu3 %v4959_v61  ;;  %v6293_v59 = vld [vmem:[%s7166_s25 + $0x54] sm:$0xf0]  ;;  %v5047_v43 = vor.u32 %v6294_v39, %v5044_v41  ;;  %v4996_v39 = vld [vmem:[%s7166_s25 + $0x8] sm:$0xf0] }
 0x13e   : > { %2350 = vmatpush.bf16.msra.mxu0 %v5043_v40  ;;  %v5035_v56 = vor.u32 %v6293_v59, %v5034_v42  ;;  %v4999_v41 = vor.u32 %v6282_v38, %v4996_v39  ;;  %v6306_v42 = vld [vmem:[%s7166_s25 + $0xc4] sm:$0xf]  ;;  %v5092_v59 = vld [vmem:[%s7166_s25 + $0xc8] sm:$0xf0] }
 0x141   : > { %2139 = vmatpush.bf16.msrb.mxu3 %v4951_v3  ;;  %v5023_v3 = vor.u32 %v6288_v57, %v5020_v63  ;;  %v6301_v57 = vld [vmem:[%s7166_s25 + $0x94] sm:$0xf0]  ;;  %v5068_v63 = vld [vmem:[%s7166_s25 + $0x98] sm:$0xf0] }
 0x142   : > { %v1576_v60 = vpop.f32.mrf.mxu2  ;;  %v1552_v51 = vpop.f32.mrf.mxu0  ;;  %2351 = vmatpush.bf16.msra.mxu0 %v5035_v56  ;;  %v6304_v56 = vld [vmem:[%s7166_s25 + $0xb4] sm:$0xf] }
 0x143   : > { %v1577_v46 = vadd.f32 %v1576_v60, %v1564_v44  ;;  %v1589_v47 = vpop.f32.mrf.mxu3  ;;  %v1565_v53 = vpop.f32.mrf.mxu1  ;;  %v6292_v44 = vld [vmem:[%s7166_s25 + $0x54] sm:$0xf]  ;;  %v5018_v51 = vld [vmem:[%s7166_s25 + $0x30] sm:$0xf] }
 0x144   : > { %v5039_v60 = vor.u32 %v6292_v44, %v5036_v62  ;;  %v5082_v44 = vld [vmem:[%s7166_s25 + $0xb0] sm:$0xf]  ;;  %v6305_v62 = vld [vmem:[%s7166_s25 + $0xb4] sm:$0xf0] }
 0x145   : > { %v1590_v50 = vadd.f32 %v1589_v47, %v1577_v46  ;;  %2140 = vmatpush.bf16.msrb.mxu3 %v4943_v6  ;;  %v5026_v46 = vld [vmem:[%s7166_s25 + $0x40] sm:$0xf]  ;;  %v6291_v47 = vld [vmem:[%s7166_s25 + $0x44] sm:$0xf0] }
 0x146   : > { %v5027_v49 = vor.u32 %v6291_v47, %v5026_v46  ;;  %v6287_v6 = vld [vmem:[%s7166_s25 + $0x24] sm:$0xf0]  ;;  %v5084_v46 = vld [vmem:[%s7166_s25 + $0xb8] sm:$0xf0] }
 0x147   : > { %v1647_v54 = vmax.f32 %v1590_v50, 0.0  ;;  %v5028_v50 = vld [vmem:[%s7166_s25 + $0x48] sm:$0xf0]  ;;  %v5011_v8 = vor.u32 %v6287_v6, %v5010_v5  ;;  %v5087_v47 = vor.u32 %v6304_v56, %v5084_v46  ;;  %v6298_v5 = vld [vmem:[%s7166_s25 + $0x84] sm:$0xf] }
 0x148   : > { %v5031_v53 = vor.u32 %v6290_v48, %v5028_v50  ;;  %2352 = vmatpush.bf16.msra.mxu0 %v5027_v49  ;;  %v5074_v48 = vld [vmem:[%s7166_s25 + $0xa0] sm:$0xf]  ;;  %v6303_v49 = vld [vmem:[%s7166_s25 + $0xa4] sm:$0xf0]  ;;  %v6302_v50 = vld [vmem:[%s7166_s25 + $0xa4] sm:$0xf] }
 0x149   : > { %v1651_v58 = vpack.c.bf16 %v1647_v54, %v1647_v54  ;;  %2141 = vmatpush.bf16.msrb.mxu3 %v4935_v9  ;;  %v5114_v54 = vld [vmem:[%s7166_s25 + $0xf0] sm:$0xf]  ;;  %v6311_v9 = vld [vmem:[%s7166_s25 + $0xe4] sm:$0xf0] }
 0x14a   : > { %v1578_v1 = vpop.f32.mrf.mxu2  ;;  %v5115_v61 = vor.u32 %v6313_v55, %v5114_v54  ;;  %v5066_v55 = vld [vmem:[%s7166_s25 + $0x90] sm:$0xf] }
 0x14b   : > { %2077 = vmatmul.bf16.vlgmr.msra.gmra.mxu2 %v1651_v58  ;;  %v1591_v2 = vpop.f32.mrf.mxu3  ;;  %v5116_v1 = vld [vmem:[%s7166_s25 + $0xf8] sm:$0xf0]  ;;  %v5195_v56 = vld [vmem:[%s7166_s25 + $0x150] sm:$0xf] }
 0x14c   : > { %2375 = vmatpush.bf16.msra.mxu2 %v5055_v35  ;;  %v5119_v4 = vor.u32 %v6312_v0, %v5116_v1  ;;  %2362 = vmatpush.bf16.msra.mxu1 %v5115_v61  ;;  %v5090_v35 = vld [vmem:[%s7166_s25 + $0xc0] sm:$0xf]  ;;  %v5067_v61 = vor.u32 %v6301_v57, %v5066_v55  ;;  %v1717_v1 = vld [vmem:[%s7164_s21] sm:$0x3] }
 0x14d   : > { %v5091_v40 = vor.u32 %v6307_v37, %v5090_v35  ;;  %v1720_v39 = vperm.slane %v1717_v1, 1 }
 0x150   : > { %2376 = vmatpush.bf16.msra.mxu2 %v5047_v43  ;;  %v5095_v43 = vor.u32 %v6306_v42, %v5092_v59 }
 0x154   : > { %2377 = vmatpush.bf16.msra.mxu2 %v5039_v60  ;;  %v5083_v60 = vor.u32 %v6305_v62, %v5082_v44 }
 0x158   : > { %2378 = vmatpush.bf16.msra.mxu2 %v5031_v53  ;;  %v5075_v53 = vor.u32 %v6303_v49, %v5074_v48  ;;  %v5267_v48 = vld [vmem:[%s7166_s25 + $0x1e0] sm:$0xf]  ;;  %v6343_v49 = vld [vmem:[%s7166_s25 + $0x1e4] sm:$0xf0] }
 0x15a   : > { %v1602_v11 = vpop.f32.mrf.mxu0 }
 0x15b   : > { %v1603_v12 = vadd.f32 %v1602_v11, %v778_v10  ;;  %v1615_v13 = vpop.f32.mrf.mxu1  ;;  %2129 = vmatmul.bf16.vlgmr.msrb.gmra.mxu2 %v1651_v58  ;;  %v5019_v58 = vor.u32 %v6289_v52, %v5018_v51  ;;  %v6286_v10 = vld [vmem:[%s7166_s25 + $0x24] sm:$0xf]  ;;  %v5012_v11 = vld [vmem:[%s7166_s25 + $0x28] sm:$0xf0] }
 0x15c   : > { %2379 = vmatpush.bf16.msra.mxu2 %v5023_v3  ;;  %v5076_v51 = vld [vmem:[%s7166_s25 + $0xa8] sm:$0xf0]  ;;  %v5058_v3 = vld [vmem:[%s7166_s25 + $0x80] sm:$0xf] }
 0x15d   : > { %v1616_v14 = vadd.f32 %v1615_v13, %v1603_v12  ;;  %2353 = vmatpush.bf16.msra.mxu0 %v5019_v58  ;;  %v5107_v12 = vor.u32 %v6311_v9, %v5106_v7  ;;  %v5015_v13 = vor.u32 %v6286_v10, %v5012_v11  ;;  %v5079_v54 = vor.u32 %v6302_v50, %v5076_v51  ;;  %v6300_v58 = vld [vmem:[%s7166_s25 + $0x94] sm:$0xf]  ;;  %v5060_v7 = vld [vmem:[%s7166_s25 + $0x88] sm:$0xf0]  ;;  %v5211_v10 = vld [vmem:[%s7166_s25 + $0x170] sm:$0xf] }
 0x15e   : > { %v5071_v0 = vor.u32 %v6300_v58, %v5068_v63  ;;  %v1719_v9 = vperm.slane %v1717_v1, 0  ;;  %v6329_v11 = vld [vmem:[%s7166_s25 + $0x174] sm:$0xf0]  ;;  %v6342_v50 = vld [vmem:[%s7166_s25 + $0x1e4] sm:$0xf]  ;;  %v5268_v51 = vor.u32 %v6343_v49, %v5267_v48 }
 0x15f   : > { %2363 = vmatpush.bf16.msra.mxu1 %v5107_v12  ;;  %v6328_v12 = vld [vmem:[%s7166_s25 + $0x174] sm:$0xf]  ;;  %v6322_v58 = vld [vmem:[%s7166_s25 + $0x144] sm:$0xf]  ;;  %v6341_v1 = vld [vmem:[%s7166_s25 + $0x1d4] sm:$0xf0] }
 0x160   : > { %2380 = vmatpush.bf16.msra.mxu2 %v5015_v13  ;;  %v5229_v48 = vld [vmem:[%s7166_s25 + $0x198] sm:$0xf0] }
 0x161   : > { %2354 = vmatpush.bf16.msra.mxu0 %v5011_v8  ;;  %v5063_v8 = vor.u32 %v6298_v5, %v5060_v7  ;;  %v6321_v7 = vld [vmem:[%s7166_s25 + $0x134] sm:$0xf0] }
 0x162   : > { %v1628_v15 = vpop.f32.mrf.mxu2  ;;  %v1604_v18 = vpop.f32.mrf.mxu0 }
 0x163   : > { %v1629_v16 = vadd.f32 %v1628_v15, %v1616_v14  ;;  %v1641_v17 = vpop.f32.mrf.mxu3  ;;  %v1617_v19 = vpop.f32.mrf.mxu1  ;;  %v6310_v14 = vld [vmem:[%s7166_s25 + $0xe4] sm:$0xf]  ;;  %v5108_v15 = vld [vmem:[%s7166_s25 + $0xe8] sm:$0xf0]  ;;  %v6285_v18 = vld [vmem:[%s7166_s25 + $0x14] sm:$0xf0] }
 0x164   : > { %v5098_v19 = vld [vmem:[%s7166_s25 + $0xd0] sm:$0xf] }
 0x165   : > { %v1642_v20 = vadd.f32 %v1641_v17, %v1629_v16  ;;  %v5111_v16 = vor.u32 %v6310_v14, %v5108_v15  ;;  %v5002_v17 = vld [vmem:[%s7166_s25 + $0x10] sm:$0xf]  ;;  %v5212_v14 = vor.u32 %v6329_v11, %v5211_v10  ;;  %v5213_v15 = vld [vmem:[%s7166_s25 + $0x178] sm:$0xf0] }
 0x166   : > { %v5181_v10 = vld [vmem:[%s7166_s25 + $0x138] sm:$0xf0] }
 0x167   : > { %v1648_v21 = vmax.f32 %v1642_v20, 0.0  ;;  %v5003_v20 = vor.u32 %v6285_v18, %v5002_v17  ;;  %v6327_v17 = vld [vmem:[%s7166_s25 + $0x164] sm:$0xf0] }
 0x169   : > { %v1652_v23 = vpack.c.bf16 %v1648_v21, %v1648_v21  ;;  %v6309_v21 = vld [vmem:[%s7166_s25 + $0xd4] sm:$0xf0]  ;;  %2355 = vmatpush.bf16.msra.mxu0 %v5003_v20  ;;  %v6326_v20 = vld [vmem:[%s7166_s25 + $0x164] sm:$0xf] }
 0x16a   : > { %v1630_v24 = vpop.f32.mrf.mxu2 }
 0x16b   : > { %v1643_v22 = vpop.f32.mrf.mxu3  ;;  %2090 = vmatmul.bf16.vlgmr.msra.gmra.mxu3 %v1652_v23  ;;  %v5004_v24 = vld [vmem:[%s7166_s25 + $0x18] sm:$0xf0] }
 0x16c   : > { %2388 = vmatpush.bf16.msra.mxu3 %v5119_v4  ;;  %v5099_v22 = vor.u32 %v6309_v21, %v5098_v19  ;;  %v6299_v4 = vld [vmem:[%s7166_s25 + $0x84] sm:$0xf0]  ;;  %v5216_v19 = vor.u32 %v6328_v12, %v5213_v15  ;;  %v5205_v21 = vld [vmem:[%s7166_s25 + $0x168] sm:$0xf0]  ;;  %v5251_v12 = vld [vmem:[%s7166_s25 + $0x1c0] sm:$0xf] }
 0x16d   : > { %v5059_v6 = vor.u32 %v6299_v4, %v5058_v3  ;;  %v5261_v4 = vld [vmem:[%s7166_s25 + $0x1d8] sm:$0xf0] }
 0x16e   : > { %2364 = vmatpush.bf16.msra.mxu1 %v5099_v22  ;;  %v6345_v22 = vld [vmem:[%s7166_s25 + $0x1f4] sm:$0xf0] }
 0x170   : > { %2389 = vmatpush.bf16.msra.mxu3 %v5111_v16  ;;  %v5203_v16 = vld [vmem:[%s7166_s25 + $0x160] sm:$0xf] }
 0x172   : > { %2365 = vmatpush.bf16.msra.mxu1 %v5091_v40 }
 0x176   : > { %2366 = vmatpush.bf16.msra.mxu1 %v5083_v60  ;;  %v6325_v60 = vld [vmem:[%s7166_s25 + $0x154] sm:$0xf0] }
 0x177   : > { %v5196_v46 = vor.u32 %v6325_v60, %v5195_v56  ;;  %v5157_v56 = vld [vmem:[%s7166_s25 + $0x108] sm:$0xf0] }
 0x17a   : > { %2367 = vmatpush.bf16.msra.mxu1 %v5075_v53  ;;  %v5187_v53 = vld [vmem:[%s7166_s25 + $0x140] sm:$0xf] }
 0x17b   : > { %2142 = vmatmul.bf16.vlgmr.msrb.gmra.mxu3 %v1652_v23  ;;  %v6284_v23 = vld [vmem:[%s7166_s25 + $0x14] sm:$0xf] }
 0x17e   : > { %2368 = vmatpush.bf16.msra.mxu1 %v5067_v61  ;;  %v5189_v61 = vld [vmem:[%s7166_s25 + $0x148] sm:$0xf0] }
 0x17f   : > { %v5192_v63 = vor.u32 %v6322_v58, %v5189_v61  ;;  %v6361_v58 = vld [vmem:[%s7166_s25 + $0x274] sm:$0xf0]  ;;  %v6360_v61 = vld [vmem:[%s7166_s25 + $0x274] sm:$0xf] }
 0x182   : > { %2369 = vmatpush.bf16.msra.mxu1 %v5059_v6  ;;  %v5179_v6 = vld [vmem:[%s7166_s25 + $0x130] sm:$0xf] }
 0x189   : > { %v7596_v25 = vpop.f32.mrf.mxu0 }
 0x18a   : > { %v2053_v13 = vadd.f32 %v7596_v25, %v1719_v9  ;;  %v5180_v9 = vor.u32 %v6321_v7, %v5179_v6  ;;  %v5366_v6 = vld [vmem:[%s7166_s25 + $0x268] sm:$0xf0]  ;;  %v5436_v7 = vld [vmem:[%s7166_s25 + $0x2f0] sm:$0xf] }
 0x191   : > { %v2054_v26 = vpop.f32.mrf.mxu0 }
 0x192   : > { %v5007_v26 = vor.u32 %v6284_v23, %v5004_v24  ;;  %v5275_v23 = vld [vmem:[%s7166_s25 + $0x1f0] sm:$0xf]  ;;  %v5204_v24 = vor.u32 %v6327_v17, %v5203_v16  ;;  %v5253_v16 = vld [vmem:[%s7166_s25 + $0x1c8] sm:$0xf0]  ;;  %v5171_v17 = vld [vmem:[%s7166_s25 + $0x120] sm:$0xf] }
 0x194   : > { %2381 = vmatpush.bf16.msra.mxu2 %v5007_v26  ;;  %v6344_v26 = vld [vmem:[%s7166_s25 + $0x1f4] sm:$0xf] }
 0x198   : > { %2382 = vmatpush.bf16.msra.mxu2 %v4999_v41 }
 0x19a   : > { %v7598_v27 = vpop.f32.mrf.mxu0 }
 0x19c   : > { %2631 = vmatpush.bf16.msrb.mxu2 %v5216_v19 }
 0x1a2   : > { %v2106_v28 = vpop.f32.mrf.mxu0 }
 0x1a3   : > { %v6308_v28 = vld [vmem:[%s7166_s25 + $0xd4] sm:$0xf] }
 0x1a4   : > { %v5103_v31 = vor.u32 %v6308_v28, %v5100_v30  ;;  %v5277_v28 = vld [vmem:[%s7166_s25 + $0x1f8] sm:$0xf0]  ;;  %v5208_v30 = vor.u32 %v6326_v20, %v5205_v21  ;;  %v6318_v21 = vld [vmem:[%s7166_s25 + $0x124] sm:$0xf] }
 0x1a6   : > { %2390 = vmatpush.bf16.msra.mxu3 %v5103_v31  ;;  %v5276_v31 = vor.u32 %v6345_v22, %v5275_v23  ;;  %2632 = vmatpush.bf16.msrb.mxu2 %v5208_v30  ;;  %v5173_v23 = vld [vmem:[%s7166_s25 + $0x128] sm:$0xf0]  ;;  %v5243_v22 = vld [vmem:[%s7166_s25 + $0x1b0] sm:$0xf] }
 0x1a8   : > { %v7600_v29 = vpop.f32.mrf.mxu1  ;;  %2618 = vmatpush.bf16.msrb.mxu1 %v5276_v31  ;;  %v5245_v31 = vld [vmem:[%s7166_s25 + $0x1b8] sm:$0xf0] }
 0x1a9   : > { %v2066_v25 = vadd.f32 %v7600_v29, %v2053_v13  ;;  %v2105_v29 = vadd.f32 %v7598_v27, %v1720_v39  ;;  %v6324_v27 = vld [vmem:[%s7166_s25 + $0x154] sm:$0xf]  ;;  %v6339_v13 = vld [vmem:[%s7166_s25 + $0x1c4] sm:$0xf0]  ;;  %v5235_v39 = vld [vmem:[%s7166_s25 + $0x1a0] sm:$0xf] }
 0x1aa   : > { %2391 = vmatpush.bf16.msra.mxu3 %v5095_v43  ;;  %v5252_v15 = vor.u32 %v6339_v13, %v5251_v12 }
 0x1ac   : > { %2619 = vmatpush.bf16.msrb.mxu1 %v5268_v51  ;;  %v6331_v51 = vld [vmem:[%s7166_s25 + $0x184] sm:$0xf0] }
 0x1ae   : > { %2392 = vmatpush.bf16.msra.mxu3 %v5087_v47 }
 0x1b0   : > { %v2067_v36 = vpop.f32.mrf.mxu1 }
 0x1b1   : > { %v4995_v36 = vor.u32 %v6283_v34, %v4994_v33  ;;  %v5280_v33 = vor.u32 %v6344_v26, %v5277_v28  ;;  %v6337_v26 = vld [vmem:[%s7166_s25 + $0x1b4] sm:$0xf0]  ;;  %v6336_v28 = vld [vmem:[%s7166_s25 + $0x1b4] sm:$0xf] }
 0x1b2   : > { %2393 = vmatpush.bf16.msra.mxu3 %v5079_v54  ;;  %v6323_v54 = vld [vmem:[%s7166_s25 + $0x144] sm:$0xf0]  ;;  %v5244_v30 = vor.u32 %v6337_v26, %v5243_v22 }
 0x1b3   : > { %2356 = vmatpush.bf16.msra.mxu0 %v4995_v36  ;;  %v5188_v57 = vor.u32 %v6323_v54, %v5187_v53  ;;  %v5221_v54 = vld [vmem:[%s7166_s25 + $0x188] sm:$0xf0] }
 0x1b6   : > { %2394 = vmatpush.bf16.msra.mxu3 %v5071_v0  ;;  %v5259_v0 = vld [vmem:[%s7166_s25 + $0x1d0] sm:$0xf] }
 0x1b7   : > { %2605 = vmatpush.bf16.msrb.mxu0 %v5212_v14  ;;  %v5260_v3 = vor.u32 %v6341_v1, %v5259_v0  ;;  %v6338_v14 = vld [vmem:[%s7166_s25 + $0x1c4] sm:$0xf]  ;;  %v5374_v0 = vld [vmem:[%s7166_s25 + $0x278] sm:$0xf0]  ;;  %v5364_v1 = vld [vmem:[%s7166_s25 + $0x260] sm:$0xf] }
 0x1b8   : > { %v7614_v45 = vpop.f32.mrf.mxu1  ;;  %v5256_v19 = vor.u32 %v6338_v14, %v5253_v16  ;;  %v6357_v16 = vld [vmem:[%s7166_s25 + $0x254] sm:$0xf0] }
 0x1b9   : > { %v2118_v41 = vadd.f32 %v7614_v45, %v2105_v29  ;;  %v5197_v45 = vld [vmem:[%s7166_s25 + $0x158] sm:$0xf0]  ;;  %2620 = vmatpush.bf16.msrb.mxu1 %v5260_v3  ;;  %v6334_v29 = vld [vmem:[%s7166_s25 + $0x1a4] sm:$0xf] }
 0x1ba   : > { %2395 = vmatpush.bf16.msra.mxu3 %v5063_v8  ;;  %v5200_v47 = vor.u32 %v6324_v27, %v5197_v45  ;;  %v6320_v8 = vld [vmem:[%s7166_s25 + $0x134] sm:$0xf]  ;;  %v5227_v27 = vld [vmem:[%s7166_s25 + $0x190] sm:$0xf] }
 0x1bb   : > { %2606 = vmatpush.bf16.msrb.mxu0 %v5204_v24  ;;  %v5184_v11 = vor.u32 %v6320_v8, %v5181_v10  ;;  %v5176_v24 = vor.u32 %v6318_v21, %v5173_v23  ;;  %v6332_v45 = vld [vmem:[%s7166_s25 + $0x194] sm:$0xf]  ;;  %v6374_v23 = vld [vmem:[%s7166_s25 + $0x2e4] sm:$0xf] }
 0x1bc   : > { %2633 = vmatpush.bf16.msrb.mxu2 %v5200_v47  ;;  %v5232_v49 = vor.u32 %v6332_v45, %v5229_v48  ;;  %v6376_v10 = vld [vmem:[%s7166_s25 + $0x2f4] sm:$0xf] }
 0x1bd   : > { %2621 = vmatpush.bf16.msrb.mxu1 %v5252_v15  ;;  %v5356_v15 = vld [vmem:[%s7166_s25 + $0x250] sm:$0xf] }
 0x1be   : > { %2644 = vmatpush.bf16.msrb.mxu3 %v5280_v33  ;;  %v5248_v33 = vor.u32 %v6336_v28, %v5245_v31  ;;  %v5357_v22 = vor.u32 %v6357_v16, %v5356_v15  ;;  %v5348_v28 = vld [vmem:[%s7166_s25 + $0x240] sm:$0xf]  ;;  %v5406_v15 = vld [vmem:[%s7166_s25 + $0x2b8] sm:$0xf0] }
 0x1bf   : > { %2607 = vmatpush.bf16.msrb.mxu0 %v5196_v46  ;;  %v6333_v46 = vld [vmem:[%s7166_s25 + $0x194] sm:$0xf0] }
 0x1c0   : > { %v2119_v2 = vpop.f32.mrf.mxu1  ;;  %2634 = vmatpush.bf16.msrb.mxu2 %v5192_v63  ;;  %v5228_v47 = vor.u32 %v6333_v46, %v5227_v27 }
 0x1c1   : > { %2622 = vmatpush.bf16.msrb.mxu1 %v5244_v30  ;;  %v6355_v30 = vld [vmem:[%s7166_s25 + $0x244] sm:$0xf0] }
 0x1c3   : > { %2608 = vmatpush.bf16.msrb.mxu0 %v5188_v57  ;;  %v5372_v57 = vld [vmem:[%s7166_s25 + $0x270] sm:$0xf] }
 0x1c4   : > { %2635 = vmatpush.bf16.msrb.mxu2 %v5184_v11  ;;  %v5373_v63 = vor.u32 %v6361_v58, %v5372_v57  ;;  %v5438_v11 = vld [vmem:[%s7166_s25 + $0x2f8] sm:$0xf0] }
 0x1c5   : > { %v5441_v14 = vor.u32 %v6376_v10, %v5438_v11  ;;  %v5404_v10 = vld [vmem:[%s7166_s25 + $0x2b0] sm:$0xf]  ;;  %v6369_v11 = vld [vmem:[%s7166_s25 + $0x2b4] sm:$0xf0] }
 0x1c7   : > { %2609 = vmatpush.bf16.msrb.mxu0 %v5180_v9  ;;  %v6377_v9 = vld [vmem:[%s7166_s25 + $0x2f4] sm:$0xf0] }
 0x1c8   : > { %2636 = vmatpush.bf16.msrb.mxu2 %v5176_v24  ;;  %v5437_v13 = vor.u32 %v6377_v9, %v5436_v7  ;;  %v5430_v24 = vld [vmem:[%s7166_s25 + $0x2e8] sm:$0xf0]  ;;  %v6350_v7 = vld [vmem:[%s7166_s25 + $0x224] sm:$0xf] }
 0x1c9   : > { %v5433_v26 = vor.u32 %v6374_v23, %v5430_v24  ;;  %v5334_v9 = vld [vmem:[%s7166_s25 + $0x228] sm:$0xf0]  ;;  %v5396_v24 = vld [vmem:[%s7166_s25 + $0x2a0] sm:$0xf] }
 0x1ce   : > { %v7644_v32 = vpop.f32.mrf.mxu2 }
 0x1cf   : > { %v2079_v34 = vadd.f32 %v7644_v32, %v2066_v25  ;;  %v5163_v25 = vld [vmem:[%s7166_s25 + $0x110] sm:$0xf] }
 0x1d6   : > { %v2080_v52 = vpop.f32.mrf.mxu2 }
 0x1d7   : > { %v5269_v52 = vld [vmem:[%s7166_s25 + $0x1e8] sm:$0xf0] }
 0x1d8   : > { %v5272_v55 = vor.u32 %v6342_v50, %v5269_v52  ;;  %v5219_v50 = vld [vmem:[%s7166_s25 + $0x180] sm:$0xf]  ;;  %v6330_v52 = vld [vmem:[%s7166_s25 + $0x184] sm:$0xf] }
 0x1d9   : > { %v5220_v53 = vor.u32 %v6331_v51, %v5219_v50 }
 0x1da   : > { %2645 = vmatpush.bf16.msrb.mxu3 %v5272_v55  ;;  %v5224_v55 = vor.u32 %v6330_v52, %v5221_v54 }
 0x1de   : > { %v2130_v2 = vpop.f32.mrf.mxu2 }
 0x1df   : > { %v2131_v32 = vadd.f32 %v2130_v2, %v2118_v41  ;;  %v6340_v2 = vld [vmem:[%s7166_s25 + $0x1d4] sm:$0xf] }
 0x1e0   : > { %v5264_v5 = vor.u32 %v6340_v2, %v5261_v4  ;;  %v6359_v2 = vld [vmem:[%s7166_s25 + $0x264] sm:$0xf0]  ;;  %v5377_v4 = vor.u32 %v6360_v61, %v5374_v0 }
 0x1e1   : > { %v5365_v8 = vor.u32 %v6359_v2, %v5364_v1  ;;  %v6371_v0 = vld [vmem:[%s7166_s25 + $0x2c4] sm:$0xf0]  ;;  %v6370_v1 = vld [vmem:[%s7166_s25 + $0x2c4] sm:$0xf] }
 0x1e2   : > { %2646 = vmatpush.bf16.msrb.mxu3 %v5264_v5  ;;  %v6358_v5 = vld [vmem:[%s7166_s25 + $0x264] sm:$0xf] }
 0x1e3   : > { %v5369_v12 = vor.u32 %v6358_v5, %v5366_v6  ;;  %v5332_v5 = vld [vmem:[%s7166_s25 + $0x220] sm:$0xf]  ;;  %v6351_v6 = vld [vmem:[%s7166_s25 + $0x224] sm:$0xf0] }
 0x1e6   : > { %v2132_v18 = vpop.f32.mrf.mxu2  ;;  %2647 = vmatpush.bf16.msrb.mxu3 %v5256_v19  ;;  %v5428_v19 = vld [vmem:[%s7166_s25 + $0x2e0] sm:$0xf] }
 0x1e7   : > { %v6319_v18 = vld [vmem:[%s7166_s25 + $0x124] sm:$0xf0] }
 0x1e8   : > { %v5172_v20 = vor.u32 %v6319_v18, %v5171_v17  ;;  %v6356_v17 = vld [vmem:[%s7166_s25 + $0x254] sm:$0xf]  ;;  %v5358_v18 = vld [vmem:[%s7166_s25 + $0x258] sm:$0xf0] }
 0x1ea   : > { %2610 = vmatpush.bf16.msrb.mxu0 %v5172_v20  ;;  %2648 = vmatpush.bf16.msrb.mxu3 %v5248_v33  ;;  %v6375_v20 = vld [vmem:[%s7166_s25 + $0x2e4] sm:$0xf0]  ;;  %v5361_v33 = vor.u32 %v6356_v17, %v5358_v18  ;;  %v5324_v17 = vld [vmem:[%s7166_s25 + $0x210] sm:$0xf]  ;;  %v6349_v18 = vld [vmem:[%s7166_s25 + $0x214] sm:$0xf0] }
 0x1eb   : > { %v5429_v21 = vor.u32 %v6375_v20, %v5428_v19  ;;  %v6348_v19 = vld [vmem:[%s7166_s25 + $0x214] sm:$0xf]  ;;  %v5325_v20 = vor.u32 %v6349_v18, %v5324_v17  ;;  %v6386_v18 = vld [vmem:[%s7166_s25 + $0x344] sm:$0xf] }
 0x1ec   : > { %v6404_v17 = vld [vmem:[%s7166_s25 + $0x3d4] sm:$0xf] }
 0x1ee   : > { %v2091_v35 = vpop.f32.mrf.mxu3 }
 0x1ef   : > { %v2092_v36 = vadd.f32 %v2091_v35, %v2079_v34  ;;  %v6317_v34 = vld [vmem:[%s7166_s25 + $0x114] sm:$0xf0]  ;;  %v6316_v35 = vld [vmem:[%s7166_s25 + $0x114] sm:$0xf] }
 0x1f1   : > { %v2147_v37 = vmax.f32 %v2092_v36, 0.0  ;;  %v5164_v36 = vor.u32 %v6317_v34, %v5163_v25  ;;  %v5420_v25 = vld [vmem:[%s7166_s25 + $0x2d0] sm:$0xf]  ;;  %v6373_v34 = vld [vmem:[%s7166_s25 + $0x2d4] sm:$0xf0] }
 0x1f3   : > { %v2149_v38 = vpack.c.bf16 %v2147_v37, %v2147_v37  ;;  %v5165_v37 = vld [vmem:[%s7166_s25 + $0x118] sm:$0xf0]  ;;  %2611 = vmatpush.bf16.msrb.mxu0 %v5164_v36  ;;  %v6354_v36 = vld [vmem:[%s7166_s25 + $0x244] sm:$0xf] }
 0x1f5   : > { %2357 = vmatmul.bf16.vlgmr.msra.gmra.mxu0 %v2149_v38  ;;  %2383 = vmatmul.bf16.vlgmr.msra.gmra.mxu2 %v2149_v38  ;;  %v5168_v38 = vor.u32 %v6316_v35, %v5165_v37  ;;  %v6372_v35 = vld [vmem:[%s7166_s25 + $0x2d4] sm:$0xf]  ;;  %v5350_v37 = vld [vmem:[%s7166_s25 + $0x248] sm:$0xf0] }
 0x1f6   : > { %v2093_v40 = vpop.f32.mrf.mxu3 }
 0x1f7   : > { %v6335_v40 = vld [vmem:[%s7166_s25 + $0x1a4] sm:$0xf0]  ;;  %2637 = vmatpush.bf16.msrb.mxu2 %v5168_v38  ;;  %v5422_v38 = vld [vmem:[%s7166_s25 + $0x2d8] sm:$0xf0] }
 0x1f8   : > { %v5236_v41 = vor.u32 %v6335_v40, %v5235_v39  ;;  %v2183_v39 = vld [vmem:[%s7173_s24] sm:$0x3] }
 0x1f9   : > { %v2186_v48 = vperm.slane %v2183_v39, 1 }
 0x1fa   : > { %2623 = vmatpush.bf16.msrb.mxu1 %v5236_v41  ;;  %v5425_v41 = vor.u32 %v6372_v35, %v5422_v38  ;;  %v5388_v38 = vld [vmem:[%s7166_s25 + $0x290] sm:$0xf] }
 0x1fe   : > { %v2143_v42 = vpop.f32.mrf.mxu3  ;;  %2624 = vmatpush.bf16.msrb.mxu1 %v5228_v47 }
 0x1ff   : > { %v2144_v59 = vadd.f32 %v2143_v42, %v2131_v32  ;;  %v5237_v32 = vld [vmem:[%s7166_s25 + $0x1a8] sm:$0xf0] }
 0x200   : > { %v5240_v42 = vor.u32 %v6334_v29, %v5237_v32  ;;  %v5421_v29 = vor.u32 %v6373_v34, %v5420_v25  ;;  %v5349_v32 = vor.u32 %v6355_v30, %v5348_v28  ;;  %v6366_v28 = vld [vmem:[%s7166_s25 + $0x2a4] sm:$0xf]  ;;  %v5398_v30 = vld [vmem:[%s7166_s25 + $0x2a8] sm:$0xf0]  ;;  %v6347_v25 = vld [vmem:[%s7166_s25 + $0x204] sm:$0xf0] }
 0x201   : > { %v2148_v43 = vmax.f32 %v2144_v59, 0.0  ;;  %v5155_v59 = vld [vmem:[%s7166_s25 + $0x100] sm:$0xf]  ;;  %v6346_v34 = vld [vmem:[%s7166_s25 + $0x204] sm:$0xf] }
 0x202   : > { %2649 = vmatpush.bf16.msrb.mxu3 %v5240_v42  ;;  %2625 = vmatpush.bf16.msrb.mxu1 %v5220_v53  ;;  %v5353_v42 = vor.u32 %v6354_v36, %v5350_v37  ;;  %v5318_v36 = vld [vmem:[%s7166_s25 + $0x208] sm:$0xf0] }
 0x203   : > { %v2150_v44 = vpack.c.bf16 %v2148_v43, %v2148_v43  ;;  %v6315_v43 = vld [vmem:[%s7166_s25 + $0x104] sm:$0xf0]  ;;  %v5321_v37 = vor.u32 %v6346_v34, %v5318_v36  ;;  %v5503_v34 = vld [vmem:[%s7166_s25 + $0x338] sm:$0xf0] }
 0x205   : > { %2370 = vmatmul.bf16.vlgmr.msra.gmra.mxu1 %v2150_v44  ;;  %2396 = vmatmul.bf16.vlgmr.msra.gmra.mxu3 %v2150_v44  ;;  %v6314_v44 = vld [vmem:[%s7166_s25 + $0x104] sm:$0xf] }
 0x206   : > { %v2145_v62 = vpop.f32.mrf.mxu3  ;;  %v5160_v60 = vor.u32 %v6314_v44, %v5157_v56  ;;  %2650 = vmatpush.bf16.msrb.mxu3 %v5232_v49  ;;  %2874 = vmatpush.bf16.msra.mxu1 %v5437_v13  ;;  %v2185_v44 = vperm.slane %v2183_v39, 0  ;;  %v5342_v56 = vld [vmem:[%s7166_s25 + $0x238] sm:$0xf0]  ;;  %v5405_v13 = vor.u32 %v6369_v11, %v5404_v10  ;;  %v6365_v39 = vld [vmem:[%s7166_s25 + $0x294] sm:$0xf0] }
 0x207   : > { %v5156_v62 = vor.u32 %v6315_v43, %v5155_v59  ;;  %v5340_v59 = vld [vmem:[%s7166_s25 + $0x230] sm:$0xf]  ;;  %v6353_v43 = vld [vmem:[%s7166_s25 + $0x234] sm:$0xf0] }
 0x208   : > { %2638 = vmatpush.bf16.msrb.mxu2 %v5160_v60  ;;  %v5341_v60 = vor.u32 %v6353_v43, %v5340_v59  ;;  %v6363_v59 = vld [vmem:[%s7166_s25 + $0x284] sm:$0xf0]  ;;  %v6362_v43 = vld [vmem:[%s7166_s25 + $0x284] sm:$0xf] }
 0x209   : > { %2612 = vmatpush.bf16.msrb.mxu0 %v5156_v62  ;;  %v6352_v62 = vld [vmem:[%s7166_s25 + $0x234] sm:$0xf] }
 0x20a   : > { %2651 = vmatpush.bf16.msrb.mxu3 %v5224_v55  ;;  %2875 = vmatpush.bf16.msra.mxu1 %v5429_v21  ;;  %v5345_v46 = vor.u32 %v6352_v62, %v5342_v56  ;;  %v5326_v21 = vld [vmem:[%s7166_s25 + $0x218] sm:$0xf0]  ;;  %v5382_v62 = vld [vmem:[%s7166_s25 + $0x288] sm:$0xf0] }
 0x20b   : > { %v5329_v23 = vor.u32 %v6348_v19, %v5326_v21  ;;  %v5385_v56 = vor.u32 %v6362_v43, %v5382_v62  ;;  %v5511_v19 = vld [vmem:[%s7166_s25 + $0x348] sm:$0xf0]  ;;  %v5152_v21 = vld [vmem:[%s7173_s24 + $0x2] sm:$0x3] }
 0x20c   : > { %2887 = vmatpush.bf16.msra.mxu2 %v5377_v4 }
 0x20d   : > { %2861 = vmatpush.bf16.msra.mxu0 %v5373_v63  ;;  %v5412_v63 = vld [vmem:[%s7166_s25 + $0x2c0] sm:$0xf] }
 0x20e   : > { %2900 = vmatpush.bf16.msra.mxu3 %v5441_v14  ;;  %2876 = vmatpush.bf16.msra.mxu1 %v5421_v29  ;;  %v5413_v2 = vor.u32 %v6371_v0, %v5412_v63  ;;  %v6368_v14 = vld [vmem:[%s7166_s25 + $0x2b4] sm:$0xf]  ;;  %v5389_v29 = vor.u32 %v6365_v39, %v5388_v38 }
 0x20f   : > { %v5409_v16 = vor.u32 %v6368_v14, %v5406_v15  ;;  %v5581_v15 = vld [vmem:[%s7166_s25 + $0x3d0] sm:$0xf] }
 0x210   : > { %2888 = vmatpush.bf16.msra.mxu2 %v5369_v12  ;;  %v5337_v12 = vor.u32 %v6350_v7, %v5334_v9  ;;  %v5591_v9 = vld [vmem:[%s7166_s25 + $0x3e8] sm:$0xf0] }
 0x211   : > { %2862 = vmatpush.bf16.msra.mxu0 %v5365_v8  ;;  %v5333_v8 = vor.u32 %v6351_v6, %v5332_v5  ;;  %v5589_v5 = vld [vmem:[%s7166_s25 + $0x3e0] sm:$0xf]  ;;  %v6407_v6 = vld [vmem:[%s7166_s25 + $0x3e4] sm:$0xf0] }
 0x212   : > { %2901 = vmatpush.bf16.msra.mxu3 %v5433_v26  ;;  %2877 = vmatpush.bf16.msra.mxu1 %v5413_v2  ;;  %v6389_v2 = vld [vmem:[%s7166_s25 + $0x354] sm:$0xf0]  ;;  %v5590_v7 = vor.u32 %v6407_v6, %v5589_v5  ;;  %v6380_v6 = vld [vmem:[%s7166_s25 + $0x314] sm:$0xf] }
 0x213   : > { %v6381_v5 = vld [vmem:[%s7166_s25 + $0x314] sm:$0xf0] }
 0x214   : > { %2889 = vmatpush.bf16.msra.mxu2 %v5361_v33  ;;  %v5316_v33 = vld [vmem:[%s7166_s25 + $0x200] sm:$0xf] }
 0x215   : > { %2863 = vmatpush.bf16.msra.mxu0 %v5357_v22  ;;  %v6367_v22 = vld [vmem:[%s7166_s25 + $0x2a4] sm:$0xf0]  ;;  %v5317_v35 = vor.u32 %v6347_v25, %v5316_v33  ;;  %v2441_v33 = vperm.slane %v5152_v21, 0  ;;  %v6384_v25 = vld [vmem:[%s7166_s25 + $0x334] sm:$0xf] }
 0x216   : > { %2902 = vmatpush.bf16.msra.mxu3 %v5425_v41  ;;  %2878 = vmatpush.bf16.msra.mxu1 %v5405_v13  ;;  %v5397_v26 = vor.u32 %v6367_v22, %v5396_v24  ;;  %v5390_v41 = vld [vmem:[%s7166_s25 + $0x298] sm:$0xf0]  ;;  %v6387_v13 = vld [vmem:[%s7166_s25 + $0x344] sm:$0xf0]  ;;  %v5506_v36 = vor.u32 %v6384_v25, %v5503_v34  ;;  %v6394_v25 = vld [vmem:[%s7166_s25 + $0x384] sm:$0xf] }
 0x218   : > { %2890 = vmatpush.bf16.msra.mxu2 %v5353_v42  ;;  %v5380_v42 = vld [vmem:[%s7166_s25 + $0x280] sm:$0xf] }
 0x219   : > { %2864 = vmatpush.bf16.msra.mxu0 %v5349_v32 }
 0x21a   : > { %2879 = vmatpush.bf16.msra.mxu1 %v5397_v26 }
 0x21c   : > { %2891 = vmatpush.bf16.msra.mxu2 %v5345_v46  ;;  %v6392_v46 = vld [vmem:[%s7166_s25 + $0x374] sm:$0xf] }
 0x21d   : > { %2865 = vmatpush.bf16.msra.mxu0 %v5341_v60  ;;  %v5533_v60 = vld [vmem:[%s7166_s25 + $0x370] sm:$0xf] }
 0x21e   : > { %2880 = vmatpush.bf16.msra.mxu1 %v5389_v29  ;;  %v2442_v29 = vperm.slane %v5152_v21, 1 }
 0x220   : > { %2892 = vmatpush.bf16.msra.mxu2 %v5337_v12  ;;  %v5509_v12 = vld [vmem:[%s7166_s25 + $0x340] sm:$0xf] }
 0x221   : > { %2866 = vmatpush.bf16.msra.mxu0 %v5333_v8  ;;  %v6406_v8 = vld [vmem:[%s7166_s25 + $0x3e4] sm:$0xf]  ;;  %v5510_v22 = vor.u32 %v6387_v13, %v5509_v12 }
 0x222   : > { %v5594_v11 = vor.u32 %v6406_v8, %v5591_v9  ;;  %v5487_v8 = vld [vmem:[%s7166_s25 + $0x318] sm:$0xf0]  ;;  %v6398_v13 = vld [vmem:[%s7166_s25 + $0x3a4] sm:$0xf] }
 0x223   : > { %v5490_v9 = vor.u32 %v6380_v6, %v5487_v8  ;;  %v5672_v6 = vld [vmem:[%s7166_s25 + $0x448] sm:$0xf0]  ;;  %v5313_v8 = vld [vmem:[%s7173_s24 + $0x4] sm:$0x3] }
 0x224   : > { %2893 = vmatpush.bf16.msra.mxu2 %v5329_v23 }
 0x225   : > { %2867 = vmatpush.bf16.msra.mxu0 %v5325_v20  ;;  %v5583_v20 = vld [vmem:[%s7166_s25 + $0x3d8] sm:$0xf0] }
 0x226   : > { %v5586_v24 = vor.u32 %v6404_v17, %v5583_v20  ;;  %v6379_v17 = vld [vmem:[%s7166_s25 + $0x304] sm:$0xf0]  ;;  %v5479_v20 = vld [vmem:[%s7166_s25 + $0x308] sm:$0xf0] }
 0x228   : > { %2894 = vmatpush.bf16.msra.mxu2 %v5321_v37 }
 0x229   : > { %2868 = vmatpush.bf16.msra.mxu0 %v5317_v35 }
 0x272   : > { %v2358_v3 = vpop.f32.mrf.mxu0 }
 0x273   : > { %v2359_v45 = vadd.f32 %v2358_v3, %v2185_v44  ;;  %v5414_v3 = vld [vmem:[%s7166_s25 + $0x2c8] sm:$0xf0]  ;;  %v5381_v44 = vor.u32 %v6363_v59, %v5380_v42 }
 0x274   : > { %v5417_v4 = vor.u32 %v6370_v1, %v5414_v3  ;;  %v5517_v1 = vld [vmem:[%s7166_s25 + $0x350] sm:$0xf]  ;;  %v6388_v3 = vld [vmem:[%s7166_s25 + $0x354] sm:$0xf] }
 0x275   : > { %2881 = vmatpush.bf16.msra.mxu1 %v5381_v44  ;;  %v5518_v10 = vor.u32 %v6389_v2, %v5517_v1  ;;  %v6400_v1 = vld [vmem:[%s7166_s25 + $0x3b4] sm:$0xf]  ;;  %v5567_v2 = vld [vmem:[%s7166_s25 + $0x3b8] sm:$0xf0] }
 0x276   : > { %2903 = vmatpush.bf16.msra.mxu3 %v5417_v4  ;;  %v5519_v4 = vld [vmem:[%s7166_s25 + $0x358] sm:$0xf0] }
 0x277   : > { %v5522_v14 = vor.u32 %v6388_v3, %v5519_v4  ;;  %v5570_v3 = vor.u32 %v6400_v1, %v5567_v2  ;;  %v5485_v4 = vld [vmem:[%s7166_s25 + $0x310] sm:$0xf] }
 0x278   : > { %v2384_v31 = vpop.f32.mrf.mxu2  ;;  %v5742_v2 = vld [vmem:[%s7166_s25 + $0x4d0] sm:$0xf] }
 0x279   : > { %v2385_v51 = vadd.f32 %v2384_v31, %v2186_v48  ;;  %v5401_v31 = vor.u32 %v6366_v28, %v5398_v30  ;;  %v5525_v48 = vld [vmem:[%s7166_s25 + $0x360] sm:$0xf]  ;;  %v5514_v28 = vor.u32 %v6386_v18, %v5511_v19  ;;  %v5501_v30 = vld [vmem:[%s7166_s25 + $0x330] sm:$0xf]  ;;  %v6378_v18 = vld [vmem:[%s7166_s25 + $0x304] sm:$0xf] }
 0x27a   : > { %v2360_v40 = vpop.f32.mrf.mxu0  ;;  %2904 = vmatpush.bf16.msra.mxu3 %v5409_v16  ;;  %v6405_v16 = vld [vmem:[%s7166_s25 + $0x3d4] sm:$0xf0]  ;;  %v5482_v21 = vor.u32 %v6378_v18, %v5479_v20  ;;  %v5664_v18 = vld [vmem:[%s7166_s25 + $0x438] sm:$0xf0] }
 0x27b   : > { %v6364_v40 = vld [vmem:[%s7166_s25 + $0x294] sm:$0xf]  ;;  %v5582_v23 = vor.u32 %v6405_v16, %v5581_v15  ;;  %v5477_v16 = vld [vmem:[%s7166_s25 + $0x300] sm:$0xf] }
 0x27c   : > { %v5393_v32 = vor.u32 %v6364_v40, %v5390_v41  ;;  %v5478_v19 = vor.u32 %v6379_v17, %v5477_v16  ;;  %v2697_v16 = vperm.slane %v5313_v8, 0  ;;  %v6416_v17 = vld [vmem:[%s7166_s25 + $0x434] sm:$0xf] }
 0x27d   : > { %v5667_v20 = vor.u32 %v6416_v17, %v5664_v18  ;;  %v6426_v17 = vld [vmem:[%s7166_s25 + $0x484] sm:$0xf] }
 0x27e   : > { %2905 = vmatpush.bf16.msra.mxu3 %v5401_v31  ;;  %v6385_v31 = vld [vmem:[%s7166_s25 + $0x334] sm:$0xf0] }
 0x27f   : > { %v5502_v35 = vor.u32 %v6385_v31, %v5501_v30  ;;  %v5541_v31 = vld [vmem:[%s7166_s25 + $0x380] sm:$0xf] }
 0x280   : > { %v2386_v27 = vpop.f32.mrf.mxu2 }
 0x281   : > { %v6393_v27 = vld [vmem:[%s7166_s25 + $0x374] sm:$0xf0] }
 0x282   : > { %v2371_v47 = vpop.f32.mrf.mxu1  ;;  %2906 = vmatpush.bf16.msra.mxu3 %v5393_v32 }
 0x283   : > { %v2372_v49 = vadd.f32 %v2371_v47, %v2359_v45  ;;  %v5534_v45 = vor.u32 %v6393_v27, %v5533_v60  ;;  %v5535_v47 = vld [vmem:[%s7166_s25 + $0x378] sm:$0xf0] }
 0x285   : > { %v2401_v50 = vmax.f32 %v2372_v49, 0.0  ;;  %v6391_v49 = vld [vmem:[%s7166_s25 + $0x364] sm:$0xf0] }
 0x286   : > { %2907 = vmatpush.bf16.msra.mxu3 %v5385_v56 }
 0x287   : > { %v2403_v52 = vpack.c.bf16 %v2401_v50, %v2401_v50  ;;  %v5538_v50 = vor.u32 %v6392_v46, %v5535_v47  ;;  %v6403_v47 = vld [vmem:[%s7166_s25 + $0x3c4] sm:$0xf0] }
 0x288   : > { %v2397_v53 = vpop.f32.mrf.mxu3 }
 0x289   : > { %v2398_v54 = vadd.f32 %v2397_v53, %v2385_v51  ;;  %2613 = vmatmul.bf16.vlgmr.msrb.gmra.mxu0 %v2403_v52  ;;  %2639 = vmatmul.bf16.vlgmr.msrb.gmra.mxu2 %v2403_v52  ;;  %v6390_v51 = vld [vmem:[%s7166_s25 + $0x364] sm:$0xf]  ;;  %v5527_v52 = vld [vmem:[%s7166_s25 + $0x368] sm:$0xf0]  ;;  %v5597_v53 = vld [vmem:[%s7166_s25 + $0x3f0] sm:$0xf] }
 0x28a   : > { %v2373_v55 = vpop.f32.mrf.mxu1  ;;  %3117 = vmatpush.bf16.msrb.mxu0 %v5534_v45  ;;  %3143 = vmatpush.bf16.msrb.mxu2 %v5538_v50  ;;  %v5573_v45 = vld [vmem:[%s7166_s25 + $0x3c0] sm:$0xf]  ;;  %v5575_v50 = vld [vmem:[%s7166_s25 + $0x3c8] sm:$0xf0] }
 0x28b   : > { %v2402_v57 = vmax.f32 %v2398_v54, 0.0  ;;  %v5526_v54 = vor.u32 %v6391_v49, %v5525_v48  ;;  %v6409_v55 = vld [vmem:[%s7166_s25 + $0x3f4] sm:$0xf0]  ;;  %v6402_v48 = vld [vmem:[%s7166_s25 + $0x3c4] sm:$0xf]  ;;  %v5574_v49 = vor.u32 %v6403_v47, %v5573_v45 }
 0x28c   : > { %v5598_v63 = vor.u32 %v6409_v55, %v5597_v53  ;;  %v6383_v53 = vld [vmem:[%s7166_s25 + $0x324] sm:$0xf0] }
 0x28d   : > { %v2404_v58 = vpack.c.bf16 %v2402_v57, %v2402_v57  ;;  %v6408_v57 = vld [vmem:[%s7166_s25 + $0x3f4] sm:$0xf] }
 0x28e   : > { %3118 = vmatpush.bf16.msrb.mxu0 %v5526_v54  ;;  %v6382_v54 = vld [vmem:[%s7166_s25 + $0x324] sm:$0xf] }
 0x28f   : > { %2626 = vmatmul.bf16.vlgmr.msrb.gmra.mxu1 %v2404_v58  ;;  %2652 = vmatmul.bf16.vlgmr.msrb.gmra.mxu3 %v2404_v58  ;;  %v5599_v58 = vld [vmem:[%s7166_s25 + $0x3f8] sm:$0xf0] }
 0x290   : > { %v2399_v61 = vpop.f32.mrf.mxu3  ;;  %v5602_v0 = vor.u32 %v6408_v57, %v5599_v58  ;;  %3130 = vmatpush.bf16.msrb.mxu1 %v5598_v63  ;;  %v5495_v57 = vld [vmem:[%s7166_s25 + $0x328] sm:$0xf0]  ;;  %v5565_v58 = vld [vmem:[%s7166_s25 + $0x3b0] sm:$0xf] }
 0x291   : > { %v5530_v61 = vor.u32 %v6390_v51, %v5527_v52  ;;  %v5578_v51 = vor.u32 %v6402_v48, %v5575_v50  ;;  %v5493_v52 = vld [vmem:[%s7166_s25 + $0x320] sm:$0xf]  ;;  %v5498_v63 = vor.u32 %v6382_v54, %v5495_v57  ;;  %v5678_v48 = vld [vmem:[%s7166_s25 + $0x450] sm:$0xf]  ;;  %v6420_v50 = vld [vmem:[%s7166_s25 + $0x454] sm:$0xf] }
 0x292   : > { %3156 = vmatpush.bf16.msrb.mxu3 %v5602_v0  ;;  %3119 = vmatpush.bf16.msrb.mxu0 %v5518_v10  ;;  %v5494_v55 = vor.u32 %v6383_v53, %v5493_v52  ;;  %v5557_v10 = vld [vmem:[%s7166_s25 + $0x3a0] sm:$0xf]  ;;  %v6439_v53 = vld [vmem:[%s7166_s25 + $0x4e4] sm:$0xf0]  ;;  %v5752_v57 = vld [vmem:[%s7166_s25 + $0x4e8] sm:$0xf0] }
 0x293   : > { %3144 = vmatpush.bf16.msrb.mxu2 %v5530_v61  ;;  %v6401_v61 = vld [vmem:[%s7166_s25 + $0x3b4] sm:$0xf0]  ;;  %v5750_v52 = vld [vmem:[%s7166_s25 + $0x4e0] sm:$0xf] }
 0x294   : > { %3131 = vmatpush.bf16.msrb.mxu1 %v5590_v7  ;;  %v5566_v0 = vor.u32 %v6401_v61, %v5565_v58  ;;  %v5486_v7 = vor.u32 %v6381_v5, %v5485_v4  ;;  %v5751_v54 = vor.u32 %v6439_v53, %v5750_v52  ;;  %v6436_v4 = vld [vmem:[%s7166_s25 + $0x4d4] sm:$0xf]  ;;  %v6418_v5 = vld [vmem:[%s7166_s25 + $0x444] sm:$0xf]  ;;  %v6413_v52 = vld [vmem:[%s7166_s25 + $0x414] sm:$0xf0] }
 0x295   : > { %v6412_v53 = vld [vmem:[%s7166_s25 + $0x414] sm:$0xf] }
 0x296   : > { %3157 = vmatpush.bf16.msrb.mxu3 %v5594_v11  ;;  %3120 = vmatpush.bf16.msrb.mxu0 %v5510_v22  ;;  %v6399_v11 = vld [vmem:[%s7166_s25 + $0x3a4] sm:$0xf0]  ;;  %v6396_v22 = vld [vmem:[%s7166_s25 + $0x394] sm:$0xf] }
 0x297   : > { %3145 = vmatpush.bf16.msrb.mxu2 %v5522_v14  ;;  %v5558_v12 = vor.u32 %v6399_v11, %v5557_v10  ;;  %v5559_v14 = vld [vmem:[%s7166_s25 + $0x3a8] sm:$0xf0] }
 0x298   : > { %3132 = vmatpush.bf16.msrb.mxu1 %v5582_v23  ;;  %v5562_v15 = vor.u32 %v6398_v13, %v5559_v14  ;;  %v5549_v23 = vld [vmem:[%s7166_s25 + $0x390] sm:$0xf]  ;;  %v5675_v13 = vor.u32 %v6418_v5, %v5672_v6  ;;  %v6410_v5 = vld [vmem:[%s7166_s25 + $0x404] sm:$0xf] }
 0x299   : > { %v5662_v14 = vld [vmem:[%s7166_s25 + $0x430] sm:$0xf] }
 0x29a   : > { %3158 = vmatpush.bf16.msrb.mxu3 %v5586_v24  ;;  %3121 = vmatpush.bf16.msrb.mxu0 %v5502_v35  ;;  %v6397_v24 = vld [vmem:[%s7166_s25 + $0x394] sm:$0xf0]  ;;  %v5543_v35 = vld [vmem:[%s7166_s25 + $0x388] sm:$0xf0] }
 0x29b   : > { %3146 = vmatpush.bf16.msrb.mxu2 %v5514_v28  ;;  %v5551_v28 = vld [vmem:[%s7166_s25 + $0x398] sm:$0xf0] }
 0x29c   : > { %3133 = vmatpush.bf16.msrb.mxu1 %v5574_v49  ;;  %v5554_v30 = vor.u32 %v6396_v22, %v5551_v28  ;;  %v6421_v49 = vld [vmem:[%s7166_s25 + $0x454] sm:$0xf0] }
 0x29d   : > { %v5679_v58 = vor.u32 %v6421_v49, %v5678_v48  ;;  %v6432_v48 = vld [vmem:[%s7166_s25 + $0x4b4] sm:$0xf]  ;;  %v5728_v49 = vld [vmem:[%s7166_s25 + $0x4b8] sm:$0xf0] }
 0x29e   : > { %3159 = vmatpush.bf16.msrb.mxu3 %v5578_v51  ;;  %3122 = vmatpush.bf16.msrb.mxu0 %v5494_v55  ;;  %v5680_v51 = vld [vmem:[%s7166_s25 + $0x458] sm:$0xf0]  ;;  %v6438_v55 = vld [vmem:[%s7166_s25 + $0x4e4] sm:$0xf] }
 0x29f   : > { %3147 = vmatpush.bf16.msrb.mxu2 %v5506_v36  ;;  %v5546_v36 = vor.u32 %v6394_v25, %v5543_v35  ;;  %v5755_v61 = vor.u32 %v6438_v55, %v5752_v57  ;;  %v5683_v1 = vor.u32 %v6420_v50, %v5680_v51  ;;  %v5731_v50 = vor.u32 %v6432_v48, %v5728_v49  ;;  %v5646_v51 = vld [vmem:[%s7166_s25 + $0x410] sm:$0xf]  ;;  %v5648_v55 = vld [vmem:[%s7166_s25 + $0x418] sm:$0xf0] }
 0x2a0   : > { %3134 = vmatpush.bf16.msrb.mxu1 %v5566_v0  ;;  %v6419_v0 = vld [vmem:[%s7166_s25 + $0x444] sm:$0xf0]  ;;  %v5651_v57 = vor.u32 %v6412_v53, %v5648_v55  ;;  %v5903_v49 = vld [vmem:[%s7166_s25 + $0x5d0] sm:$0xf]  ;;  %v5833_v53 = vld [vmem:[%s7166_s25 + $0x548] sm:$0xf0] }
 0x2a1   : > { %v5474_v55 = vld [vmem:[%s7173_s24 + $0x6] sm:$0x3] }
 0x2a2   : > { %3160 = vmatpush.bf16.msrb.mxu3 %v5570_v3  ;;  %3123 = vmatpush.bf16.msrb.mxu0 %v5486_v7  ;;  %v6437_v3 = vld [vmem:[%s7166_s25 + $0x4d4] sm:$0xf0]  ;;  %v5744_v7 = vld [vmem:[%s7166_s25 + $0x4d8] sm:$0xf0] }
 0x2a3   : > { %3148 = vmatpush.bf16.msrb.mxu2 %v5498_v63  ;;  %v5670_v63 = vld [vmem:[%s7166_s25 + $0x440] sm:$0xf]  ;;  %v5747_v10 = vor.u32 %v6436_v4, %v5744_v7  ;;  %v6411_v4 = vld [vmem:[%s7166_s25 + $0x404] sm:$0xf0]  ;;  %v5640_v7 = vld [vmem:[%s7166_s25 + $0x408] sm:$0xf0] }
 0x2a4   : > { %3135 = vmatpush.bf16.msrb.mxu1 %v5558_v12  ;;  %v5671_v11 = vor.u32 %v6419_v0, %v5670_v63  ;;  %v6430_v0 = vld [vmem:[%s7166_s25 + $0x4a4] sm:$0xf] }
 0x2a6   : > { %3161 = vmatpush.bf16.msrb.mxu3 %v5562_v15  ;;  %3124 = vmatpush.bf16.msrb.mxu0 %v5478_v19  ;;  %v6417_v15 = vld [vmem:[%s7166_s25 + $0x434] sm:$0xf0] }
 0x2a7   : > { %3149 = vmatpush.bf16.msrb.mxu2 %v5490_v9  ;;  %v5743_v9 = vor.u32 %v6437_v3, %v5742_v2  ;;  %v5663_v19 = vor.u32 %v6417_v15, %v5662_v14  ;;  %v5638_v3 = vld [vmem:[%s7166_s25 + $0x400] sm:$0xf] }
 0x2a8   : > { %v5639_v6 = vor.u32 %v6411_v4, %v5638_v3  ;;  %v5702_v15 = vld [vmem:[%s7166_s25 + $0x480] sm:$0xf]  ;;  %v2953_v3 = vperm.slane %v5474_v55, 0  ;;  %v6448_v4 = vld [vmem:[%s7166_s25 + $0x534] sm:$0xf] }
 0x2aa   : > { %3162 = vmatpush.bf16.msrb.mxu3 %v5554_v30 }
 0x2ab   : > { %3150 = vmatpush.bf16.msrb.mxu2 %v5482_v21 }
 0x2ae   : > { %3163 = vmatpush.bf16.msrb.mxu3 %v5546_v36 }
 0x306   : > { %v2614_v26 = vpop.f32.mrf.mxu0 }
 0x307   : > { %v2615_v37 = vadd.f32 %v2614_v26, %v2441_v33  ;;  %v5550_v26 = vor.u32 %v6397_v24, %v5549_v23  ;;  %v6395_v33 = vld [vmem:[%s7166_s25 + $0x384] sm:$0xf0] }
 0x308   : > { %v5542_v34 = vor.u32 %v6395_v33, %v5541_v31 }
 0x309   : > { %3136 = vmatpush.bf16.msrb.mxu1 %v5550_v26  ;;  %v2698_v26 = vperm.slane %v5313_v8, 1  ;;  %v5643_v8 = vor.u32 %v6410_v5, %v5640_v7  ;;  %v5825_v5 = vld [vmem:[%s7166_s25 + $0x538] sm:$0xf0] }
 0x30a   : > { %v5828_v7 = vor.u32 %v6448_v4, %v5825_v5  ;;  %v6458_v4 = vld [vmem:[%s7166_s25 + $0x584] sm:$0xf] }
 0x30c   : > { %v2627_v38 = vpop.f32.mrf.mxu1  ;;  %v2640_v39 = vpop.f32.mrf.mxu2 }
 0x30d   : > { %v2628_v40 = vadd.f32 %v2627_v38, %v2615_v37  ;;  %v2641_v59 = vadd.f32 %v2640_v39, %v2442_v29  ;;  %3137 = vmatpush.bf16.msrb.mxu1 %v5542_v34  ;;  %v5694_v37 = vld [vmem:[%s7166_s25 + $0x470] sm:$0xf]  ;;  %v6425_v38 = vld [vmem:[%s7166_s25 + $0x474] sm:$0xf0]  ;;  %v6424_v39 = vld [vmem:[%s7166_s25 + $0x474] sm:$0xf] }
 0x30e   : > { %v2616_v41 = vpop.f32.mrf.mxu0  ;;  %v5696_v29 = vld [vmem:[%s7166_s25 + $0x478] sm:$0xf0] }
 0x30f   : > { %v2657_v32 = vmax.f32 %v2628_v40, 0.0  ;;  %v5695_v40 = vor.u32 %v6425_v38, %v5694_v37  ;;  %v5686_v41 = vld [vmem:[%s7166_s25 + $0x460] sm:$0xf] }
 0x311   : > { %v2659_v42 = vpack.c.bf16 %v2657_v32, %v2657_v32  ;;  %v6423_v32 = vld [vmem:[%s7166_s25 + $0x464] sm:$0xf0] }
 0x312   : > { %v2653_v43 = vpop.f32.mrf.mxu3 }
 0x313   : > { %v2654_v44 = vadd.f32 %v2653_v43, %v2641_v59  ;;  %2869 = vmatmul.bf16.vlgmr.msra.gmra.mxu0 %v2659_v42  ;;  %2895 = vmatmul.bf16.vlgmr.msra.gmra.mxu2 %v2659_v42  ;;  %v5699_v42 = vor.u32 %v6424_v39, %v5696_v29  ;;  %v6422_v59 = vld [vmem:[%s7166_s25 + $0x464] sm:$0xf]  ;;  %v5688_v43 = vld [vmem:[%s7166_s25 + $0x468] sm:$0xf0]  ;;  %v6435_v29 = vld [vmem:[%s7166_s25 + $0x4c4] sm:$0xf0] }
 0x314   : > { %v2629_v62 = vpop.f32.mrf.mxu1  ;;  %v2642_v56 = vpop.f32.mrf.mxu2  ;;  %3373 = vmatpush.bf16.msra.mxu0 %v5695_v40  ;;  %v5734_v40 = vld [vmem:[%s7166_s25 + $0x4c0] sm:$0xf] }
 0x315   : > { %v2658_v60 = vmax.f32 %v2654_v44, 0.0  ;;  %v5758_v44 = vld [vmem:[%s7166_s25 + $0x4f0] sm:$0xf]  ;;  %v5687_v62 = vor.u32 %v6423_v32, %v5686_v41  ;;  %v6441_v56 = vld [vmem:[%s7166_s25 + $0x4f4] sm:$0xf0]  ;;  %3399 = vmatpush.bf16.msra.mxu2 %v5699_v42  ;;  %v5735_v32 = vor.u32 %v6435_v29, %v5734_v40 }
 0x316   : > { %v5759_v45 = vor.u32 %v6441_v56, %v5758_v44  ;;  %v6434_v41 = vld [vmem:[%s7166_s25 + $0x4c4] sm:$0xf]  ;;  %v5736_v42 = vld [vmem:[%s7166_s25 + $0x4c8] sm:$0xf0]  ;;  %v6415_v44 = vld [vmem:[%s7166_s25 + $0x424] sm:$0xf0] }
 0x317   : > { %v2660_v27 = vpack.c.bf16 %v2658_v60, %v2658_v60  ;;  %v6440_v60 = vld [vmem:[%s7166_s25 + $0x4f4] sm:$0xf] }
 0x318   : > { %3374 = vmatpush.bf16.msra.mxu0 %v5687_v62  ;;  %v6414_v62 = vld [vmem:[%s7166_s25 + $0x424] sm:$0xf] }
 0x319   : > { %2882 = vmatmul.bf16.vlgmr.msra.gmra.mxu1 %v2660_v27  ;;  %2908 = vmatmul.bf16.vlgmr.msra.gmra.mxu3 %v2660_v27  ;;  %v5760_v27 = vld [vmem:[%s7166_s25 + $0x4f8] sm:$0xf0] }
 0x31a   : > { %v2655_v46 = vpop.f32.mrf.mxu3  ;;  %v5763_v47 = vor.u32 %v6440_v60, %v5760_v27  ;;  %3386 = vmatpush.bf16.msra.mxu1 %v5759_v45  ;;  %v5656_v60 = vld [vmem:[%s7166_s25 + $0x428] sm:$0xf0]  ;;  %v5726_v27 = vld [vmem:[%s7166_s25 + $0x4b0] sm:$0xf] }
 0x31b   : > { %v5691_v46 = vor.u32 %v6422_v59, %v5688_v43  ;;  %v5739_v59 = vor.u32 %v6434_v41, %v5736_v42  ;;  %v5654_v43 = vld [vmem:[%s7166_s25 + $0x420] sm:$0xf]  ;;  %v5659_v45 = vor.u32 %v6414_v62, %v5656_v60  ;;  %v5839_v41 = vld [vmem:[%s7166_s25 + $0x550] sm:$0xf]  ;;  %v6452_v42 = vld [vmem:[%s7166_s25 + $0x554] sm:$0xf] }
 0x31c   : > { %3412 = vmatpush.bf16.msra.mxu3 %v5763_v47  ;;  %3375 = vmatpush.bf16.msra.mxu0 %v5679_v58  ;;  %v5655_v56 = vor.u32 %v6415_v44, %v5654_v43  ;;  %v5718_v58 = vld [vmem:[%s7166_s25 + $0x4a0] sm:$0xf]  ;;  %v6471_v44 = vld [vmem:[%s7166_s25 + $0x5e4] sm:$0xf0]  ;;  %v5913_v60 = vld [vmem:[%s7166_s25 + $0x5e8] sm:$0xf0] }
 0x31d   : > { %3400 = vmatpush.bf16.msra.mxu2 %v5691_v46  ;;  %v6433_v46 = vld [vmem:[%s7166_s25 + $0x4b4] sm:$0xf0]  ;;  %v5911_v43 = vld [vmem:[%s7166_s25 + $0x5e0] sm:$0xf] }
 0x31e   : > { %3387 = vmatpush.bf16.msra.mxu1 %v5751_v54  ;;  %v5727_v47 = vor.u32 %v6433_v46, %v5726_v27  ;;  %v5647_v54 = vor.u32 %v6413_v52, %v5646_v51  ;;  %v5912_v62 = vor.u32 %v6471_v44, %v5911_v43  ;;  %v6468_v51 = vld [vmem:[%s7166_s25 + $0x5d4] sm:$0xf]  ;;  %v6450_v52 = vld [vmem:[%s7166_s25 + $0x544] sm:$0xf]  ;;  %v6445_v43 = vld [vmem:[%s7166_s25 + $0x514] sm:$0xf0] }
 0x31f   : > { %v6444_v44 = vld [vmem:[%s7166_s25 + $0x514] sm:$0xf] }
 0x320   : > { %3413 = vmatpush.bf16.msra.mxu3 %v5755_v61  ;;  %3376 = vmatpush.bf16.msra.mxu0 %v5671_v11  ;;  %v6431_v61 = vld [vmem:[%s7166_s25 + $0x4a4] sm:$0xf0]  ;;  %v6428_v11 = vld [vmem:[%s7166_s25 + $0x494] sm:$0xf] }
 0x321   : > { %3401 = vmatpush.bf16.msra.mxu2 %v5683_v1  ;;  %v5719_v63 = vor.u32 %v6431_v61, %v5718_v58  ;;  %v5720_v1 = vld [vmem:[%s7166_s25 + $0x4a8] sm:$0xf0] }
 0x322   : > { %3388 = vmatpush.bf16.msra.mxu1 %v5743_v9  ;;  %v5723_v2 = vor.u32 %v6430_v0, %v5720_v1  ;;  %v5710_v9 = vld [vmem:[%s7166_s25 + $0x490] sm:$0xf]  ;;  %v5836_v0 = vor.u32 %v6450_v52, %v5833_v53  ;;  %v6442_v52 = vld [vmem:[%s7166_s25 + $0x504] sm:$0xf] }
 0x323   : > { %v5823_v1 = vld [vmem:[%s7166_s25 + $0x530] sm:$0xf] }
 0x324   : > { %3414 = vmatpush.bf16.msra.mxu3 %v5747_v10  ;;  %3377 = vmatpush.bf16.msra.mxu0 %v5663_v19  ;;  %v6429_v10 = vld [vmem:[%s7166_s25 + $0x494] sm:$0xf0]  ;;  %v5704_v19 = vld [vmem:[%s7166_s25 + $0x488] sm:$0xf0] }
 0x325   : > { %3402 = vmatpush.bf16.msra.mxu2 %v5675_v13  ;;  %v5712_v13 = vld [vmem:[%s7166_s25 + $0x498] sm:$0xf0] }
 0x326   : > { %3389 = vmatpush.bf16.msra.mxu1 %v5735_v32  ;;  %v5715_v14 = vor.u32 %v6428_v11, %v5712_v13  ;;  %v6453_v32 = vld [vmem:[%s7166_s25 + $0x554] sm:$0xf0] }
 0x327   : > { %v5840_v27 = vor.u32 %v6453_v32, %v5839_v41  ;;  %v6464_v41 = vld [vmem:[%s7166_s25 + $0x5b4] sm:$0xf]  ;;  %v5889_v32 = vld [vmem:[%s7166_s25 + $0x5b8] sm:$0xf0] }
 0x328   : > { %3415 = vmatpush.bf16.msra.mxu3 %v5739_v59  ;;  %3378 = vmatpush.bf16.msra.mxu0 %v5655_v56  ;;  %v5841_v59 = vld [vmem:[%s7166_s25 + $0x558] sm:$0xf0]  ;;  %v6470_v56 = vld [vmem:[%s7166_s25 + $0x5e4] sm:$0xf] }
 0x329   : > { %3403 = vmatpush.bf16.msra.mxu2 %v5667_v20  ;;  %v5707_v20 = vor.u32 %v6426_v17, %v5704_v19  ;;  %v5916_v46 = vor.u32 %v6470_v56, %v5913_v60  ;;  %v5844_v48 = vor.u32 %v6452_v42, %v5841_v59  ;;  %v5892_v42 = vor.u32 %v6464_v41, %v5889_v32  ;;  %v5807_v59 = vld [vmem:[%s7166_s25 + $0x510] sm:$0xf]  ;;  %v5809_v56 = vld [vmem:[%s7166_s25 + $0x518] sm:$0xf0] }
 0x32a   : > { %3390 = vmatpush.bf16.msra.mxu1 %v5727_v47  ;;  %v6451_v47 = vld [vmem:[%s7166_s25 + $0x544] sm:$0xf0]  ;;  %v5812_v60 = vor.u32 %v6444_v44, %v5809_v56  ;;  %v6064_v32 = vld [vmem:[%s7166_s25 + $0x6d0] sm:$0xf]  ;;  %v5994_v44 = vld [vmem:[%s7166_s25 + $0x648] sm:$0xf0] }
 0x32b   : > { %v5635_v56 = vld [vmem:[%s7173_s24 + $0x8] sm:$0x3] }
 0x32c   : > { %3416 = vmatpush.bf16.msra.mxu3 %v5731_v50  ;;  %3379 = vmatpush.bf16.msra.mxu0 %v5647_v54  ;;  %v6469_v50 = vld [vmem:[%s7166_s25 + $0x5d4] sm:$0xf0]  ;;  %v5905_v54 = vld [vmem:[%s7166_s25 + $0x5d8] sm:$0xf0] }
 0x32d   : > { %3404 = vmatpush.bf16.msra.mxu2 %v5659_v45  ;;  %v5831_v45 = vld [vmem:[%s7166_s25 + $0x540] sm:$0xf]  ;;  %v5908_v58 = vor.u32 %v6468_v51, %v5905_v54  ;;  %v6443_v51 = vld [vmem:[%s7166_s25 + $0x504] sm:$0xf0]  ;;  %v5801_v54 = vld [vmem:[%s7166_s25 + $0x508] sm:$0xf0] }
 0x32e   : > { %3391 = vmatpush.bf16.msra.mxu1 %v5719_v63  ;;  %v5832_v61 = vor.u32 %v6451_v47, %v5831_v45  ;;  %v6462_v47 = vld [vmem:[%s7166_s25 + $0x5a4] sm:$0xf] }
 0x330   : > { %3417 = vmatpush.bf16.msra.mxu3 %v5723_v2  ;;  %3380 = vmatpush.bf16.msra.mxu0 %v5639_v6  ;;  %v6449_v2 = vld [vmem:[%s7166_s25 + $0x534] sm:$0xf0] }
 0x331   : > { %3405 = vmatpush.bf16.msra.mxu2 %v5651_v57  ;;  %v5904_v57 = vor.u32 %v6469_v50, %v5903_v49  ;;  %v5824_v6 = vor.u32 %v6449_v2, %v5823_v1  ;;  %v5799_v50 = vld [vmem:[%s7166_s25 + $0x500] sm:$0xf] }
 0x332   : > { %v5800_v53 = vor.u32 %v6443_v51, %v5799_v50  ;;  %v5863_v2 = vld [vmem:[%s7166_s25 + $0x580] sm:$0xf]  ;;  %v3209_v50 = vperm.slane %v5635_v56, 0  ;;  %v6480_v51 = vld [vmem:[%s7166_s25 + $0x634] sm:$0xf] }
 0x334   : > { %3418 = vmatpush.bf16.msra.mxu3 %v5715_v14 }
 0x335   : > { %3406 = vmatpush.bf16.msra.mxu2 %v5643_v8 }
 0x338   : > { %3419 = vmatpush.bf16.msra.mxu3 %v5707_v20 }
 0x390   : > { %v2870_v12 = vpop.f32.mrf.mxu0 }
 0x391   : > { %v2871_v21 = vadd.f32 %v2870_v12, %v2697_v16  ;;  %v5711_v12 = vor.u32 %v6429_v10, %v5710_v9  ;;  %v6427_v16 = vld [vmem:[%s7166_s25 + $0x484] sm:$0xf0] }
 0x392   : > { %v5703_v18 = vor.u32 %v6427_v16, %v5702_v15 }
 0x393   : > { %3392 = vmatpush.bf16.msra.mxu1 %v5711_v12  ;;  %v2954_v12 = vperm.slane %v5474_v55, 1  ;;  %v5804_v55 = vor.u32 %v6442_v52, %v5801_v54  ;;  %v5986_v52 = vld [vmem:[%s7166_s25 + $0x638] sm:$0xf0] }
 0x394   : > { %v5989_v54 = vor.u32 %v6480_v51, %v5986_v52  ;;  %v6490_v51 = vld [vmem:[%s7166_s25 + $0x684] sm:$0xf] }
 0x396   : > { %v2883_v23 = vpop.f32.mrf.mxu1  ;;  %v2896_v24 = vpop.f32.mrf.mxu2 }
 0x397   : > { %v2884_v22 = vadd.f32 %v2883_v23, %v2871_v21  ;;  %v2897_v33 = vadd.f32 %v2896_v24, %v2698_v26  ;;  %3393 = vmatpush.bf16.msra.mxu1 %v5703_v18  ;;  %v5855_v21 = vld [vmem:[%s7166_s25 + $0x570] sm:$0xf]  ;;  %v6457_v23 = vld [vmem:[%s7166_s25 + $0x574] sm:$0xf0]  ;;  %v6456_v24 = vld [vmem:[%s7166_s25 + $0x574] sm:$0xf] }
 0x398   : > { %v2872_v28 = vpop.f32.mrf.mxu0  ;;  %v5857_v26 = vld [vmem:[%s7166_s25 + $0x578] sm:$0xf0] }
 0x399   : > { %v2913_v30 = vmax.f32 %v2884_v22, 0.0  ;;  %v5856_v22 = vor.u32 %v6457_v23, %v5855_v21  ;;  %v5847_v28 = vld [vmem:[%s7166_s25 + $0x560] sm:$0xf] }
 0x39b   : > { %v2915_v31 = vpack.c.bf16 %v2913_v30, %v2913_v30  ;;  %v6455_v30 = vld [vmem:[%s7166_s25 + $0x564] sm:$0xf0] }
 0x39c   : > { %v2909_v25 = vpop.f32.mrf.mxu3 }
 0x39d   : > { %v2910_v34 = vadd.f32 %v2909_v25, %v2897_v33  ;;  %3125 = vmatmul.bf16.vlgmr.msrb.gmra.mxu0 %v2915_v31  ;;  %3151 = vmatmul.bf16.vlgmr.msrb.gmra.mxu2 %v2915_v31  ;;  %v5860_v31 = vor.u32 %v6456_v24, %v5857_v26  ;;  %v6454_v33 = vld [vmem:[%s7166_s25 + $0x564] sm:$0xf]  ;;  %v5849_v25 = vld [vmem:[%s7166_s25 + $0x568] sm:$0xf0]  ;;  %v6467_v26 = vld [vmem:[%s7166_s25 + $0x5c4] sm:$0xf0] }
 0x39e   : > { %v2885_v35 = vpop.f32.mrf.mxu1  ;;  %v2898_v36 = vpop.f32.mrf.mxu2  ;;  %3629 = vmatpush.bf16.msrb.mxu0 %v5856_v22  ;;  %v5895_v22 = vld [vmem:[%s7166_s25 + $0x5c0] sm:$0xf] }
 0x39f   : > { %v2914_v37 = vmax.f32 %v2910_v34, 0.0  ;;  %v5919_v34 = vld [vmem:[%s7166_s25 + $0x5f0] sm:$0xf]  ;;  %v5848_v35 = vor.u32 %v6455_v30, %v5847_v28  ;;  %v6473_v36 = vld [vmem:[%s7166_s25 + $0x5f4] sm:$0xf0]  ;;  %3655 = vmatpush.bf16.msrb.mxu2 %v5860_v31  ;;  %v5896_v30 = vor.u32 %v6467_v26, %v5895_v22 }
 0x3a0   : > { %v5920_v40 = vor.u32 %v6473_v36, %v5919_v34  ;;  %v6466_v28 = vld [vmem:[%s7166_s25 + $0x5c4] sm:$0xf]  ;;  %v5897_v31 = vld [vmem:[%s7166_s25 + $0x5c8] sm:$0xf0]  ;;  %v6447_v34 = vld [vmem:[%s7166_s25 + $0x524] sm:$0xf0] }
 0x3a1   : > { %v2916_v38 = vpack.c.bf16 %v2914_v37, %v2914_v37  ;;  %v6472_v37 = vld [vmem:[%s7166_s25 + $0x5f4] sm:$0xf] }
 0x3a2   : > { %3630 = vmatpush.bf16.msrb.mxu0 %v5848_v35  ;;  %v6446_v35 = vld [vmem:[%s7166_s25 + $0x524] sm:$0xf] }
 0x3a3   : > { %3138 = vmatmul.bf16.vlgmr.msrb.gmra.mxu1 %v2916_v38  ;;  %3164 = vmatmul.bf16.vlgmr.msrb.gmra.mxu3 %v2916_v38  ;;  %v5921_v38 = vld [vmem:[%s7166_s25 + $0x5f8] sm:$0xf0] }
 0x3a4   : > { %v2911_v39 = vpop.f32.mrf.mxu3  ;;  %v5924_v29 = vor.u32 %v6472_v37, %v5921_v38  ;;  %3642 = vmatpush.bf16.msrb.mxu1 %v5920_v40  ;;  %v5817_v37 = vld [vmem:[%s7166_s25 + $0x528] sm:$0xf0]  ;;  %v5887_v38 = vld [vmem:[%s7166_s25 + $0x5b0] sm:$0xf] }
 0x3a5   : > { %v5852_v39 = vor.u32 %v6454_v33, %v5849_v25  ;;  %v5900_v33 = vor.u32 %v6466_v28, %v5897_v31  ;;  %v5815_v25 = vld [vmem:[%s7166_s25 + $0x520] sm:$0xf]  ;;  %v5820_v40 = vor.u32 %v6446_v35, %v5817_v37  ;;  %v6000_v28 = vld [vmem:[%s7166_s25 + $0x650] sm:$0xf]  ;;  %v6484_v31 = vld [vmem:[%s7166_s25 + $0x654] sm:$0xf] }
 0x3a6   : > { %3668 = vmatpush.bf16.msrb.mxu3 %v5924_v29  ;;  %3631 = vmatpush.bf16.msrb.mxu0 %v5840_v27  ;;  %v5816_v36 = vor.u32 %v6447_v34, %v5815_v25  ;;  %v5879_v27 = vld [vmem:[%s7166_s25 + $0x5a0] sm:$0xf]  ;;  %v6503_v34 = vld [vmem:[%s7166_s25 + $0x6e4] sm:$0xf0]  ;;  %v6074_v37 = vld [vmem:[%s7166_s25 + $0x6e8] sm:$0xf0] }
 0x3a7   : > { %3656 = vmatpush.bf16.msrb.mxu2 %v5852_v39  ;;  %v6465_v39 = vld [vmem:[%s7166_s25 + $0x5b4] sm:$0xf0]  ;;  %v6072_v25 = vld [vmem:[%s7166_s25 + $0x6e0] sm:$0xf] }
 0x3a8   : > { %3643 = vmatpush.bf16.msrb.mxu1 %v5912_v62  ;;  %v5888_v29 = vor.u32 %v6465_v39, %v5887_v38  ;;  %v5808_v62 = vor.u32 %v6445_v43, %v5807_v59  ;;  %v6073_v35 = vor.u32 %v6503_v34, %v6072_v25  ;;  %v6500_v59 = vld [vmem:[%s7166_s25 + $0x6d4] sm:$0xf]  ;;  %v6482_v43 = vld [vmem:[%s7166_s25 + $0x644] sm:$0xf]  ;;  %v6477_v25 = vld [vmem:[%s7166_s25 + $0x614] sm:$0xf0] }
 0x3a9   : > { %v6476_v34 = vld [vmem:[%s7166_s25 + $0x614] sm:$0xf] }
 0x3aa   : > { %3669 = vmatpush.bf16.msrb.mxu3 %v5916_v46  ;;  %3632 = vmatpush.bf16.msrb.mxu0 %v5832_v61  ;;  %v6463_v46 = vld [vmem:[%s7166_s25 + $0x5a4] sm:$0xf0]  ;;  %v6460_v61 = vld [vmem:[%s7166_s25 + $0x594] sm:$0xf] }
 0x3ab   : > { %3657 = vmatpush.bf16.msrb.mxu2 %v5844_v48  ;;  %v5880_v45 = vor.u32 %v6463_v46, %v5879_v27  ;;  %v5881_v48 = vld [vmem:[%s7166_s25 + $0x5a8] sm:$0xf0] }
 0x3ac   : > { %3644 = vmatpush.bf16.msrb.mxu1 %v5904_v57  ;;  %v5884_v49 = vor.u32 %v6462_v47, %v5881_v48  ;;  %v5871_v57 = vld [vmem:[%s7166_s25 + $0x590] sm:$0xf]  ;;  %v5997_v47 = vor.u32 %v6482_v43, %v5994_v44  ;;  %v6474_v43 = vld [vmem:[%s7166_s25 + $0x604] sm:$0xf] }
 0x3ad   : > { %v5984_v48 = vld [vmem:[%s7166_s25 + $0x630] sm:$0xf] }
 0x3ae   : > { %3670 = vmatpush.bf16.msrb.mxu3 %v5908_v58  ;;  %3633 = vmatpush.bf16.msrb.mxu0 %v5824_v6  ;;  %v6461_v58 = vld [vmem:[%s7166_s25 + $0x594] sm:$0xf0]  ;;  %v5865_v6 = vld [vmem:[%s7166_s25 + $0x588] sm:$0xf0] }
 0x3af   : > { %3658 = vmatpush.bf16.msrb.mxu2 %v5836_v0  ;;  %v5873_v0 = vld [vmem:[%s7166_s25 + $0x598] sm:$0xf0] }
 0x3b0   : > { %3645 = vmatpush.bf16.msrb.mxu1 %v5896_v30  ;;  %v5876_v1 = vor.u32 %v6460_v61, %v5873_v0  ;;  %v6485_v30 = vld [vmem:[%s7166_s25 + $0x654] sm:$0xf0] }
 0x3b1   : > { %v6001_v38 = vor.u32 %v6485_v30, %v6000_v28  ;;  %v6496_v28 = vld [vmem:[%s7166_s25 + $0x6b4] sm:$0xf]  ;;  %v6050_v30 = vld [vmem:[%s7166_s25 + $0x6b8] sm:$0xf0] }
 0x3b2   : > { %3671 = vmatpush.bf16.msrb.mxu3 %v5900_v33  ;;  %3634 = vmatpush.bf16.msrb.mxu0 %v5816_v36  ;;  %v6002_v33 = vld [vmem:[%s7166_s25 + $0x658] sm:$0xf0]  ;;  %v6502_v36 = vld [vmem:[%s7166_s25 + $0x6e4] sm:$0xf] }
 0x3b3   : > { %3659 = vmatpush.bf16.msrb.mxu2 %v5828_v7  ;;  %v5868_v7 = vor.u32 %v6458_v4, %v5865_v6  ;;  %v6077_v39 = vor.u32 %v6502_v36, %v6074_v37  ;;  %v6005_v41 = vor.u32 %v6484_v31, %v6002_v33  ;;  %v6053_v31 = vor.u32 %v6496_v28, %v6050_v30  ;;  %v5968_v33 = vld [vmem:[%s7166_s25 + $0x610] sm:$0xf]  ;;  %v5970_v36 = vld [vmem:[%s7166_s25 + $0x618] sm:$0xf0] }
 0x3b4   : > { %3646 = vmatpush.bf16.msrb.mxu1 %v5888_v29  ;;  %v6483_v29 = vld [vmem:[%s7166_s25 + $0x644] sm:$0xf0]  ;;  %v5973_v37 = vor.u32 %v6476_v34, %v5970_v36 }
 0x3b6   : > { %3672 = vmatpush.bf16.msrb.mxu3 %v5892_v42  ;;  %3635 = vmatpush.bf16.msrb.mxu0 %v5808_v62  ;;  %v6501_v42 = vld [vmem:[%s7166_s25 + $0x6d4] sm:$0xf0]  ;;  %v6066_v62 = vld [vmem:[%s7166_s25 + $0x6d8] sm:$0xf0] }
 0x3b7   : > { %3660 = vmatpush.bf16.msrb.mxu2 %v5820_v40  ;;  %v5992_v40 = vld [vmem:[%s7166_s25 + $0x640] sm:$0xf]  ;;  %v6069_v27 = vor.u32 %v6500_v59, %v6066_v62  ;;  %v6475_v59 = vld [vmem:[%s7166_s25 + $0x604] sm:$0xf0]  ;;  %v5962_v62 = vld [vmem:[%s7166_s25 + $0x608] sm:$0xf0] }
 0x3b8   : > { %3647 = vmatpush.bf16.msrb.mxu1 %v5880_v45  ;;  %v5993_v46 = vor.u32 %v6483_v29, %v5992_v40  ;;  %v6494_v29 = vld [vmem:[%s7166_s25 + $0x6a4] sm:$0xf] }
 0x3ba   : > { %3673 = vmatpush.bf16.msrb.mxu3 %v5884_v49  ;;  %3636 = vmatpush.bf16.msrb.mxu0 %v5800_v53  ;;  %v6481_v49 = vld [vmem:[%s7166_s25 + $0x634] sm:$0xf0] }
 0x3bb   : > { %3661 = vmatpush.bf16.msrb.mxu2 %v5812_v60  ;;  %v6065_v60 = vor.u32 %v6501_v42, %v6064_v32  ;;  %v5985_v53 = vor.u32 %v6481_v49, %v5984_v48  ;;  %v5960_v42 = vld [vmem:[%s7166_s25 + $0x600] sm:$0xf] }
 0x3bc   : > { %v5961_v44 = vor.u32 %v6475_v59, %v5960_v42  ;;  %v6024_v49 = vld [vmem:[%s7166_s25 + $0x680] sm:$0xf]  ;;  %v6614_v59 = vld [vmem:[%s560_s23] ss:$0 sm:$0xff] }
 0x3be   : > { %3674 = vmatpush.bf16.msrb.mxu3 %v5876_v1 }
 0x3bf   : > { %3662 = vmatpush.bf16.msrb.mxu2 %v5804_v55 }
 0x3c2   : > { %3675 = vmatpush.bf16.msrb.mxu3 %v5868_v7 }
 0x41a   : > { %v3126_v63 = vpop.f32.mrf.mxu0 }
 0x41b   : > { %v3127_v8 = vadd.f32 %v3126_v63, %v2953_v3  ;;  %v5872_v63 = vor.u32 %v6461_v58, %v5871_v57  ;;  %v6459_v3 = vld [vmem:[%s7166_s25 + $0x584] sm:$0xf0] }
 0x41c   : > { %v5864_v5 = vor.u32 %v6459_v3, %v5863_v2 }
 0x41d   : > { %3648 = vmatpush.bf16.msrb.mxu1 %v5872_v63  ;;  %v3210_v63 = vperm.slane %v5635_v56, 1  ;;  %v5965_v56 = vor.u32 %v6474_v43, %v5962_v62 }
 0x420   : > { %v3139_v9 = vpop.f32.mrf.mxu1  ;;  %v3152_v10 = vpop.f32.mrf.mxu2 }
 0x421   : > { %v3140_v11 = vadd.f32 %v3139_v9, %v3127_v8  ;;  %v3153_v16 = vadd.f32 %v3152_v10, %v2954_v12  ;;  %3649 = vmatpush.bf16.msrb.mxu1 %v5864_v5  ;;  %v6016_v8 = vld [vmem:[%s7166_s25 + $0x670] sm:$0xf]  ;;  %v6489_v9 = vld [vmem:[%s7166_s25 + $0x674] sm:$0xf0]  ;;  %v6488_v10 = vld [vmem:[%s7166_s25 + $0x674] sm:$0xf] }
 0x422   : > { %v3128_v13 = vpop.f32.mrf.mxu0  ;;  %v6018_v12 = vld [vmem:[%s7166_s25 + $0x678] sm:$0xf0] }
 0x423   : > { %v3169_v14 = vmax.f32 %v3140_v11, 0.0  ;;  %v6017_v11 = vor.u32 %v6489_v9, %v6016_v8  ;;  %v6008_v13 = vld [vmem:[%s7166_s25 + $0x660] sm:$0xf] }
 0x425   : > { %v3171_v15 = vpack.c.bf16 %v3169_v14, %v3169_v14  ;;  %v6487_v14 = vld [vmem:[%s7166_s25 + $0x664] sm:$0xf0] }
 0x426   : > { %v3165_v17 = vpop.f32.mrf.mxu3 }
 0x427   : > { %v3166_v18 = vadd.f32 %v3165_v17, %v3153_v16  ;;  %3381 = vmatmul.bf16.vlgmr.msra.gmra.mxu0 %v3171_v15  ;;  %3407 = vmatmul.bf16.vlgmr.msra.gmra.mxu2 %v3171_v15  ;;  %v6021_v15 = vor.u32 %v6488_v10, %v6018_v12  ;;  %v6486_v16 = vld [vmem:[%s7166_s25 + $0x664] sm:$0xf]  ;;  %v6010_v17 = vld [vmem:[%s7166_s25 + $0x668] sm:$0xf0]  ;;  %v6499_v12 = vld [vmem:[%s7166_s25 + $0x6c4] sm:$0xf0] }
 0x428   : > { %v3141_v19 = vpop.f32.mrf.mxu1  ;;  %v3154_v20 = vpop.f32.mrf.mxu2  ;;  %3885 = vmatpush.bf16.msra.mxu0 %v6017_v11  ;;  %v6056_v11 = vld [vmem:[%s7166_s25 + $0x6c0] sm:$0xf] }
 0x429   : > { %v3170_v21 = vmax.f32 %v3166_v18, 0.0  ;;  %v6080_v18 = vld [vmem:[%s7166_s25 + $0x6f0] sm:$0xf]  ;;  %v6009_v19 = vor.u32 %v6487_v14, %v6008_v13  ;;  %v6505_v20 = vld [vmem:[%s7166_s25 + $0x6f4] sm:$0xf0]  ;;  %3911 = vmatpush.bf16.msra.mxu2 %v6021_v15  ;;  %v6057_v14 = vor.u32 %v6499_v12, %v6056_v11 }
 0x42a   : > { %v6081_v22 = vor.u32 %v6505_v20, %v6080_v18  ;;  %v6498_v13 = vld [vmem:[%s7166_s25 + $0x6c4] sm:$0xf]  ;;  %v6058_v15 = vld [vmem:[%s7166_s25 + $0x6c8] sm:$0xf0]  ;;  %v6479_v18 = vld [vmem:[%s7166_s25 + $0x624] sm:$0xf0] }
 0x42b   : > { %v3172_v23 = vpack.c.bf16 %v3170_v21, %v3170_v21  ;;  %v6504_v21 = vld [vmem:[%s7166_s25 + $0x6f4] sm:$0xf] }
 0x42c   : > { %3886 = vmatpush.bf16.msra.mxu0 %v6009_v19  ;;  %v6478_v19 = vld [vmem:[%s7166_s25 + $0x624] sm:$0xf] }
 0x42d   : > { %3394 = vmatmul.bf16.vlgmr.msra.gmra.mxu1 %v3172_v23  ;;  %3420 = vmatmul.bf16.vlgmr.msra.gmra.mxu3 %v3172_v23  ;;  %v6082_v23 = vld [vmem:[%s7166_s25 + $0x6f8] sm:$0xf0] }
 0x42e   : > { %v3167_v24 = vpop.f32.mrf.mxu3  ;;  %v6085_v26 = vor.u32 %v6504_v21, %v6082_v23  ;;  %3898 = vmatpush.bf16.msra.mxu1 %v6081_v22  ;;  %v5978_v21 = vld [vmem:[%s7166_s25 + $0x628] sm:$0xf0]  ;;  %v6048_v23 = vld [vmem:[%s7166_s25 + $0x6b0] sm:$0xf] }
 0x42f   : > { %v6013_v24 = vor.u32 %v6486_v16, %v6010_v17  ;;  %v6061_v16 = vor.u32 %v6498_v13, %v6058_v15  ;;  %v5976_v17 = vld [vmem:[%s7166_s25 + $0x620] sm:$0xf]  ;;  %v5981_v22 = vor.u32 %v6478_v19, %v5978_v21  ;;  %v5957_v15 = vld [vmem:[%s7173_s24 + $0xc] sm:$0x3]  ;;  %v3942_v19 = vld [vmem:[%s634_s19] sm:$0x3] }
 0x430   : > { %3924 = vmatpush.bf16.msra.mxu3 %v6085_v26  ;;  %3887 = vmatpush.bf16.msra.mxu0 %v6001_v38  ;;  %v5977_v20 = vor.u32 %v6479_v18, %v5976_v17  ;;  %v6040_v38 = vld [vmem:[%s7166_s25 + $0x6a0] sm:$0xf] }
 0x431   : > { %3912 = vmatpush.bf16.msra.mxu2 %v6013_v24  ;;  %v6497_v24 = vld [vmem:[%s7166_s25 + $0x6b4] sm:$0xf0] }
 0x432   : > { %3899 = vmatpush.bf16.msra.mxu1 %v6073_v35  ;;  %v6049_v26 = vor.u32 %v6497_v24, %v6048_v23  ;;  %v5969_v35 = vor.u32 %v6477_v25, %v5968_v33  ;;  %v3943_v24 = vunpack.c.l.bf16 %v3942_v19 }
 0x434   : > { %3925 = vmatpush.bf16.msra.mxu3 %v6077_v39  ;;  %3888 = vmatpush.bf16.msra.mxu0 %v5993_v46  ;;  %v6495_v39 = vld [vmem:[%s7166_s25 + $0x6a4] sm:$0xf0]  ;;  %v6492_v46 = vld [vmem:[%s7166_s25 + $0x694] sm:$0xf] }
 0x435   : > { %3913 = vmatpush.bf16.msra.mxu2 %v6005_v41  ;;  %v6041_v40 = vor.u32 %v6495_v39, %v6040_v38  ;;  %v6042_v41 = vld [vmem:[%s7166_s25 + $0x6a8] sm:$0xf0] }
 0x436   : > { %3900 = vmatpush.bf16.msra.mxu1 %v6065_v60  ;;  %v6045_v32 = vor.u32 %v6494_v29, %v6042_v41  ;;  %v6032_v60 = vld [vmem:[%s7166_s25 + $0x690] sm:$0xf]  ;;  %v3946_v29 = vperm.slane %v3943_v24, 2 }
 0x438   : > { %3926 = vmatpush.bf16.msra.mxu3 %v6069_v27  ;;  %3889 = vmatpush.bf16.msra.mxu0 %v5985_v53  ;;  %v6493_v27 = vld [vmem:[%s7166_s25 + $0x694] sm:$0xf0]  ;;  %v6026_v53 = vld [vmem:[%s7166_s25 + $0x688] sm:$0xf0] }
 0x439   : > { %3914 = vmatpush.bf16.msra.mxu2 %v5997_v47  ;;  %v6034_v47 = vld [vmem:[%s7166_s25 + $0x698] sm:$0xf0] }
 0x43a   : > { %3901 = vmatpush.bf16.msra.mxu1 %v6057_v14  ;;  %v6037_v48 = vor.u32 %v6492_v46, %v6034_v47 }
 0x43c   : > { %3927 = vmatpush.bf16.msra.mxu3 %v6061_v16  ;;  %3890 = vmatpush.bf16.msra.mxu0 %v5977_v20  ;;  %v3721_v16 = vperm.slane %v5957_v15, 0  ;;  %v3722_v20 = vperm.slane %v5957_v15, 1 }
 0x43d   : > { %3915 = vmatpush.bf16.msra.mxu2 %v5989_v54  ;;  %v6029_v54 = vor.u32 %v6490_v51, %v6026_v53 }
 0x43e   : > { %3902 = vmatpush.bf16.msra.mxu1 %v6049_v26 }
 0x440   : > { %3928 = vmatpush.bf16.msra.mxu3 %v6053_v31  ;;  %3891 = vmatpush.bf16.msra.mxu0 %v5969_v35  ;;  %v3945_v31 = vperm.slane %v3943_v24, 0 }
 0x441   : > { %3916 = vmatpush.bf16.msra.mxu2 %v5981_v22 }
 0x442   : > { %3903 = vmatpush.bf16.msra.mxu1 %v6041_v40 }
 0x444   : > { %3929 = vmatpush.bf16.msra.mxu3 %v6045_v32  ;;  %3892 = vmatpush.bf16.msra.mxu0 %v5961_v44  ;;  %v3950_v32 = vperm.slane %v3946_v29, 0 }
 0x445   : > { %3917 = vmatpush.bf16.msra.mxu2 %v5973_v37  ;;  %v3949_v37 = vperm.slane %v3945_v31, 0 }
 0x448   : > { %3930 = vmatpush.bf16.msra.mxu3 %v6037_v48 }
 0x449   : > { %3918 = vmatpush.bf16.msra.mxu2 %v5965_v56 }
 0x44c   : > { %3931 = vmatpush.bf16.msra.mxu3 %v6029_v54 }
 0x4a4   : > { %v3382_v45 = vpop.f32.mrf.mxu0 }
 0x4a5   : > { %v3383_v55 = vadd.f32 %v3382_v45, %v3209_v50  ;;  %v6033_v45 = vor.u32 %v6493_v27, %v6032_v60  ;;  %v6491_v50 = vld [vmem:[%s7166_s25 + $0x684] sm:$0xf0] }
 0x4a6   : > { %v6025_v52 = vor.u32 %v6491_v50, %v6024_v49 }
 0x4a7   : > { %3904 = vmatpush.bf16.msra.mxu1 %v6033_v45 }
 0x4aa   : > { %v3395_v57 = vpop.f32.mrf.mxu1  ;;  %v3408_v58 = vpop.f32.mrf.mxu2 }
 0x4ab   : > { %v3396_v61 = vadd.f32 %v3395_v57, %v3383_v55  ;;  %v3409_v3 = vadd.f32 %v3408_v58, %v3210_v63  ;;  %3905 = vmatpush.bf16.msra.mxu1 %v6025_v52  ;;  %v5796_v55 = vld [vmem:[%s7173_s24 + $0xa] sm:$0x3] }
 0x4ac   : > { %v3384_v0 = vpop.f32.mrf.mxu0  ;;  %v3465_v58 = vperm.slane %v5796_v55, 0 }
 0x4ad   : > { %v3425_v1 = vmax.f32 %v3396_v61, 0.0 }
 0x4af   : > { %v3427_v2 = vpack.c.bf16 %v3425_v1, %v3425_v1 }
 0x4b0   : > { %v3421_v4 = vpop.f32.mrf.mxu3 }
 0x4b1   : > { %v3422_v5 = vadd.f32 %v3421_v4, %v3409_v3  ;;  %3637 = vmatmul.bf16.vlgmr.msrb.gmra.mxu0 %v3427_v2  ;;  %3663 = vmatmul.bf16.vlgmr.msrb.gmra.mxu2 %v3427_v2  ;;  %v3466_v2 = vperm.slane %v5796_v55, 1 }
 0x4b2   : > { %v3397_v6 = vpop.f32.mrf.mxu1  ;;  %v3410_v7 = vpop.f32.mrf.mxu2 }
 0x4b3   : > { %v3426_v8 = vmax.f32 %v3422_v5, 0.0 }
 0x4b5   : > { %v3428_v9 = vpack.c.bf16 %v3426_v8, %v3426_v8 }
 0x4b7   : > { %3650 = vmatmul.bf16.vlgmr.msrb.gmra.mxu1 %v3428_v9  ;;  %3676 = vmatmul.bf16.vlgmr.msrb.gmra.mxu3 %v3428_v9 }
 0x4b8   : > { %v3423_v10 = vpop.f32.mrf.mxu3 }
 0x52e   : > { %v3638_v57 = vpop.f32.mrf.mxu0 }
 0x52f   : > { %v3639_v61 = vadd.f32 %v3638_v57, %v3465_v58 }
 0x534   : > { %v3651_v63 = vpop.f32.mrf.mxu1  ;;  %v3664_v0 = vpop.f32.mrf.mxu2 }
 0x535   : > { %v3652_v1 = vadd.f32 %v3651_v63, %v3639_v61  ;;  %v3665_v6 = vadd.f32 %v3664_v0, %v3466_v2 }
 0x536   : > { %v3640_v3 = vpop.f32.mrf.mxu0 }
 0x537   : > { %v3681_v4 = vmax.f32 %v3652_v1, 0.0 }
 0x539   : > { %v3683_v5 = vpack.c.bf16 %v3681_v4, %v3681_v4 }
 0x53a   : > { %v3677_v7 = vpop.f32.mrf.mxu3 }
 0x53b   : > { %v3678_v8 = vadd.f32 %v3677_v7, %v3665_v6  ;;  %3893 = vmatmul.bf16.vlgmr.msra.gmra.mxu0 %v3683_v5  ;;  %3919 = vmatmul.bf16.vlgmr.msra.gmra.mxu2 %v3683_v5 }
 0x53c   : > { %v3653_v9 = vpop.f32.mrf.mxu1  ;;  %v3666_v10 = vpop.f32.mrf.mxu2 }
 0x53d   : > { %v3682_v11 = vmax.f32 %v3678_v8, 0.0 }
 0x53f   : > { %v3684_v12 = vpack.c.bf16 %v3682_v11, %v3682_v11 }
 0x541   : > { %3906 = vmatmul.bf16.vlgmr.msra.gmra.mxu1 %v3684_v12  ;;  %3932 = vmatmul.bf16.vlgmr.msra.gmra.mxu3 %v3684_v12 }
 0x542   : > { %v3679_v13 = vpop.f32.mrf.mxu3 }
 0x5b8   : > { %v3894_v14 = vpop.f32.mrf.mxu0 }
 0x5b9   : > { %v3895_v23 = vadd.f32 %v3894_v14, %v3721_v16 }
 0x5be   : > { %v3907_v17 = vpop.f32.mrf.mxu1  ;;  %v3920_v18 = vpop.f32.mrf.mxu2 }
 0x5bf   : > { %v3908_v22 = vadd.f32 %v3907_v17, %v3895_v23  ;;  %v3921_v26 = vadd.f32 %v3920_v18, %v3722_v20 }
 0x5c0   : > { %v3896_v21 = vpop.f32.mrf.mxu0 }
 0x5c1   : > { %v3937_v34 = vmax.f32 %v3908_v22, 0.0 }
 0x5c4   : > { %v3933_v28 = vpop.f32.mrf.mxu3 }
 0x5c5   : > { %v3934_v30 = vadd.f32 %v3933_v28, %v3921_v26 }
 0x5c6   : > { %v3909_v33 = vpop.f32.mrf.mxu1  ;;  %v3922_v25 = vpop.f32.mrf.mxu2 }
 0x5c7   : > { %v3938_v35 = vmax.f32 %v3934_v30, 0.0 }
 0x5c9   : > { %v3939_v36 = vpack.c.bf16 %v3938_v35, %v3937_v34 }
 0x5cb   : > { %v3940_v38 = vunpack.c.l.bf16 %v3939_v36  ;;  %v3941_v41 = vunpack.c.h.bf16 %v3939_v36 }
 0x5cc   : > { %v3935_v39 = vpop.f32.mrf.mxu3 }
 0x5cd   : > { %v3951_v40 = vmul.f32 %v3949_v37, %v3940_v38  ;;  %v3952_v42 = vmul.f32 %v3950_v32, %v3941_v41 }
 0x5cf   : > { %3953 = vadd.xlane.f32.xlu0 %v3951_v40 }
 0x5d7   : > { %3961 = vadd.xlane.f32.xlu0 %v3952_v42 }
 0x642   : > { %v3954_v43 = vpop.xlane.xlu0 %3953 }
 0x643   : > { %v3958_v44 = vadd.f32 %v6614_v59, %v3954_v43 }
 0x645   : > { %3960 = vst.msk [vmem:[%s641_s22] sm:$0xff] %vm3959_vm0, %v3958_v44 }
 0x64a   : > { %v3962_v62 = vpop.xlane.xlu0 %3961 }
 0x64b   : > { %v3963_v56 = vadd.f32 %v6614_v59, %v3962_v62 }
 0x64d   : > { %3965 = vst.msk [vmem:[%s641_s22] sm:$0xff] %vm3964_vm1, %v3963_v56 }
 0x64e PF: > { %s32_s14 = sadd.s32 1, %s6921_s14   ;;  %s8137_s12 = sld [smem:[#allocation20_spill]] }
 0x64f   : > { %p29_p2 = scmp.ge.s32.totalorder %s32_s14, 4   ;;  %s8138_s11 = sld [smem:[#allocation22_spill]] }
 0x650   : > { %s8139_s15 = sld [smem:[#allocation21_spill]]  ;;  %s8140_s30 = smov %s6905_s10 }
 0x652   :  { %31 = sbr.rel (!%p29_p2) target bundleno = 17 (0x11), region = 189 }
 0x654   : > { %s8141_s10 = smov %s8137_s12  ;;  %s8142_s12 = smov %s6917_s13 }
 0x656   : > { %s8143_s13 = smov %s8139_s15 }
 0x657   :  { %3991 = vsyncpa [#allocation3], 1 }
 0x658   :  { %3993 = vsyncpa [#allocation3 + $0x1], 1 }
 0x659   :  { %3994 = vsyncpa [#allocation5], 1 }
 0x65a   :  { %3996 = vsyncpa [#allocation5 + $0x1], 1 }
 0x65b   :  { %3997 = vsyncpa [#allocation8], 1 }
 0x65c   :  { %3999 = vsyncpa [#allocation8 + $0x1], 1 }
 0x65d   :  { %4000 = vsyncpa [#allocation11], 1 }
 0x65e   :  { %4002 = vsyncpa [#allocation11 + $0x1], 1 }
 0x65f   :  { %4003 = vsyncpa [#allocation14], 1 }
 0x660   :  { %4005 = vsyncpa [#allocation14 + $0x1], 1 }

</bundles_post_ra>
